<compile_context>
chip_gen: v7x
topology: tpu7x:2x2x1
jax: 0.10.0
libtpu: 0.0.40
codegen_flags: <defaults>
</compile_context>

<pallas_src>
import functools

import jax
import jax.numpy as jnp
from jax.experimental import pallas as pl
from jax.experimental.pallas import tpu as pltpu


# --------------------------------------------------------------------------- loss helper
def _batch_ce_loss(pred, tgt):
    """F.normalize(p=2) -> scores = pn @ tn.T -> CrossEntropy vs arange(B), mean. -> (1,1)."""
    b = pred.shape[0]
    # x * rsqrt(max(||x||^2, eps^2)) == x / max(||x||, eps)  (eps = 1e-12), rsqrt -> EUP slot
    pn = pred * jax.lax.rsqrt(jnp.maximum(jnp.sum(pred * pred, axis=-1, keepdims=True), 1e-24))
    tn = tgt * jax.lax.rsqrt(jnp.maximum(jnp.sum(tgt * tgt, axis=-1, keepdims=True), 1e-24))
    scores = jax.lax.dot_general(
        pn, tn, (((1,), (1,)), ((), ())), preferred_element_type=jnp.float32
    )  # (B, B) == pn @ tn.T without an explicit transpose
    m = jnp.max(scores, axis=-1, keepdims=True)                                  # (B, 1)
    lse = m + jnp.log(jnp.sum(jnp.exp(scores - m), axis=-1, keepdims=True))      # (B, 1)
    eye = (jax.lax.broadcasted_iota(jnp.int32, (b, b), 0)
           == jax.lax.broadcasted_iota(jnp.int32, (b, b), 1)).astype(scores.dtype)
    diag = jnp.sum(scores * eye, axis=-1, keepdims=True)                         # (B, 1)
    return jnp.sum(lse - diag, axis=0, keepdims=True) / b                        # (1, 1)


# --------------------------------------------------------------------------- fused kernel
def _polyvore_kernel(xcat_ref, valid_ref,
                     fcw_ref, fcb_ref,
                     wih_ref, bih_ref, whh_ref,
                     khat_ref, r1hat_ref, loss_ref,
                     gx_ref, *, b_real):
    # xcat_ref: (T*BP, 2E) time-major [img | txt], batch padded to BP (multiple of 8)
    # fcw: (2E, H); fcb: (1, H)
    # wih: (H, 8H) = [W_ih_fw^T | W_ih_bw^T], gate columns permuted to [i,f,o,g]
    # bih: (1, 8H) combined (b_ih + b_hh) biases, same permutation
    # whh: (2H, 4H) = [W_hh_fw^T ; W_hh_bw^T] (block-diagonal use), same permutation
    # gx_ref scratch: (max(T-1,1), 2BP, 4H) restacked gates
    n = xcat_ref.shape[0]
    bp = valid_ref.shape[0]
    t_len = n // bp
    h = fcw_ref.shape[1]
    g4 = 4 * h
    two_bp = 2 * bp

    # ---- fused fc for every position (LSTM inputs + actual_k / actual_1), one K=2E matmul ----
    x_all = (jnp.dot(xcat_ref[...], fcw_ref[...], preferred_element_type=jnp.float32)
             + fcb_ref[...])                                   # (T*BP, H)
    actual_1 = x_all[0:b_real, :]                              # fc output at position 0
    actual_k = x_all[(t_len - 1) * bp:(t_len - 1) * bp + b_real, :]  # fc output at T-1

    # ---- input-side gates for BOTH directions, hoisted out of the recurrence ----
    gx_all = (jnp.dot(x_all, wih_ref[...], preferred_element_type=jnp.float32)
              + bih_ref[...])                                  # (T*BP, 8H): [fwd | bwd]

    # ---- prologue restack: block t = [fwd gates @ t ; bwd gates @ T-1-t] ----
    # One contiguous (2BP, 4H) load per serial step; no per-step concat/strided slices.
    for t in range(t_len - 1):
        gx_ref[t, 0:bp, :] = gx_all[t * bp:(t + 1) * bp, 0:g4]
        gx_ref[t, bp:, :] = gx_all[(t_len - 1 - t) * bp:(t_len - t) * bp, g4:]

    # ---- hoisted block-diagonal mask for the stacked recurrence (computed once) ----
    ridx = jax.lax.broadcasted_iota(jnp.int32, (two_bp, 2 * h), 0)
    cidx = jax.lax.broadcasted_iota(jnp.int32, (two_bp, 2 * h), 1)
    m2d = ((ridx < bp) == (cidx < h)).astype(jnp.float32)      # (2BP, 2H)

    # ---- stacked recurrence: rows 0..BP-1 forward, rows BP..2BP-1 backward ----
    def step(t, carry):
        h_prev, c_prev = carry                                 # each (2BP, H)
        gx_t = gx_ref[t]                                       # (2BP, 4H) contiguous load
        # block-diagonal recurrent matmul: one MXU op covers both directions
        h_pad = jnp.concatenate([h_prev, h_prev], axis=1) * m2d        # (2BP, 2H)
        gates = gx_t + jnp.dot(h_pad, whh_ref[...], preferred_element_type=jnp.float32)
        sig = jax.nn.sigmoid(gates[:, 0:3 * h])                # one wide sigmoid: [i | f | o]
        g_g = jnp.tanh(gates[:, 3 * h:])
        i_g = sig[:, 0:h]
        f_g = sig[:, h:2 * h]
        o_g = sig[:, 2 * h:3 * h]
        c_new = f_g * c_prev + i_g * g_g
        h_new = o_g * jnp.tanh(c_new)
        return h_new, c_new

    h0 = jnp.zeros((two_bp, h), jnp.float32)
    c0 = jnp.zeros((two_bp, h), jnp.float32)
    h_fin, _ = jax.lax.fori_loop(0, t_len - 1, step, (h0, c0), unroll=True)

    # pack/pad_packed semantics: output index T-2 is nonzero only for length >= T samples.
    valid = valid_ref[...]                                     # (BP, 1) f32, padded rows = 0
    k_hat = h_fin[0:bp, :] * valid
    r1_hat = h_fin[bp:, :] * valid
    khat_ref[...] = k_hat
    r1hat_ref[...] = r1_hat

    # fused contrastive batch loss (forward + backward) over the real B rows only
    loss_ref[...] = (_batch_ce_loss(k_hat[0:b_real, :], actual_k)
                     + _batch_ce_loss(r1_hat[0:b_real, :], actual_1))


# --------------------------------------------------------------------------- wrapper
def polyvore_forward(params, image_embeddings, text_embeddings, lengths, mode="train"):
    b, t, e = image_embeddings.shape
    h = params["fc_w"].shape[0]
    assert params["fc_w"].shape[1] == 2 * e
    assert e == h, "module wiring (fc: 2E->H feeding LSTM with input_size=E) requires E == H"

    # pad batch to the 8-sublane tile; padded rows are zero and masked out of outputs/loss
    bp = max(8, ((b + 7) // 8) * 8)

    # time-major, batch-padded, fused [img | txt]: row index = time*BP + batch
    xcat = jnp.concatenate([image_embeddings, text_embeddings], axis=-1)   # (B, T, 2E)
    xcat_tm = jnp.transpose(xcat, (1, 0, 2))                               # (T, B, 2E)
    xcat_tm = jnp.pad(xcat_tm, ((0, 0), (0, bp - b), (0, 0)))              # (T, BP, 2E)
    xcat_tm = xcat_tm.reshape(t * bp, 2 * e)

    # forward_out[:, -1] / backward_out[:, -1] are valid iff length >= T (else pad -> zeros)
    valid = (lengths >= t).astype(jnp.float32).reshape(b, 1)
    valid = jnp.pad(valid, ((0, bp - b), (0, 0)))                          # (BP, 1)

    def perm_gates(w):
        # last-axis 4H blocks: PyTorch order [i, f, g, o] -> kernel order [i, f, o, g]
        i_, f_, g_, o_ = jnp.split(w, 4, axis=-1)
        return jnp.concatenate([i_, f_, o_, g_], axis=-1)

    fcw = params["fc_w"].T                                                  # (2E, H)
    fcb = params["fc_b"].reshape(1, h)
    # stacked input->gates weights / combined biases: lanes [0:4H] fwd, [4H:8H] bwd
    wih = jnp.concatenate([perm_gates(params["fw_w_ih"].T),
                           perm_gates(params["bw_w_ih"].T)], axis=1)        # (H, 8H)
    bih = jnp.concatenate(
        [perm_gates((params["fw_b_ih"] + params["fw_b_hh"]).reshape(1, 4 * h)),
         perm_gates((params["bw_b_ih"] + params["bw_b_hh"]).reshape(1, 4 * h))],
        axis=1)                                                             # (1, 8H)
    # block-diagonal recurrent weights: rows [0:H] fwd, [H:2H] bwd
    whh = jnp.concatenate([perm_gates(params["fw_w_hh"].T),
                           perm_gates(params["bw_w_hh"].T)], axis=0)        # (2H, 4H)

    kernel = functools.partial(_polyvore_kernel, b_real=b)

    k_hat_p, r1_hat_p, loss = pl.pallas_call(
        kernel,
        out_shape=(jax.ShapeDtypeStruct((bp, h), jnp.float32),
                   jax.ShapeDtypeStruct((bp, h), jnp.float32),
                   jax.ShapeDtypeStruct((1, 1), jnp.float32)),
        scratch_shapes=[pltpu.VMEM((max(t - 1, 1), 2 * bp, 4 * h), jnp.float32)],
        compiler_params=pltpu.CompilerParams(vmem_limit_bytes=64 * 1024 * 1024),
    )(xcat_tm, valid, fcw, fcb, wih, bih, whh)

    if mode == "train":
        return loss[0, 0]
    return k_hat_p[:b], r1_hat_p[:b]


# --------------------------------------------------------------------------- params
def init_params(key, e, h):
    # TODO(synk): num_layers fixed to 1 (module default num_layers=None is invalid); dropout inactive.
    keys = jax.random.split(key, 10)
    s = 0.05

    def w(k, shape):
        return s * jax.random.normal(k, shape, jnp.float32)

    return {
        "fc_w": w(keys[0], (h, 2 * e)),
        "fc_b": w(keys[1], (h,)),
        "fw_w_ih": w(keys[2], (4 * h, e)),
        "fw_w_hh": w(keys[3], (4 * h, h)),
        "fw_b_ih": w(keys[4], (4 * h,)),
        "fw_b_hh": w(keys[5], (4 * h,)),
        "bw_w_ih": w(keys[6], (4 * h, e)),
        "bw_w_hh": w(keys[7], (4 * h, h)),
        "bw_b_ih": w(keys[8], (4 * h,)),
        "bw_b_hh": w(keys[9], (4 * h,)),
    }


# ----------------------------------------------------- pure-JAX reference (original logic)
def _reference_forward(params, image_embeddings, text_embeddings, lengths, mode="train"):
    bsz, t, e = image_embeddings.shape
    h = params["fc_w"].shape[0]
    eps = 1e-12

    def fc(img, txt):
        x = jnp.concatenate([img, txt], axis=-1)
        return x @ params["fc_w"].T + params["fc_b"]

    def run_lstm(x, lens, prefix):
        w_ih, w_hh = params[prefix + "_w_ih"], params[prefix + "_w_hh"]
        bias = params[prefix + "_b_ih"] + params[prefix + "_b_hh"]

        def step(carry, xt):
            hh, cc = carry
            g = xt @ w_ih.T + hh @ w_hh.T + bias
            i = jax.nn.sigmoid(g[:, :h]); f = jax.nn.sigmoid(g[:, h:2 * h])
            gg = jnp.tanh(g[:, 2 * h:3 * h]); o = jax.nn.sigmoid(g[:, 3 * h:])
            cc = f * cc + i * gg
            hh = o * jnp.tanh(cc)
            return (hh, cc), hh

        x_tm = jnp.transpose(x, (1, 0, 2))
        (_, _), hs = jax.lax.scan(step, (jnp.zeros((bsz, h)), jnp.zeros((bsz, h))), x_tm)
        hs = jnp.transpose(hs, (1, 0, 2))
        tt = x.shape[1]
        mask = (jnp.arange(tt)[None, :] < lens[:, None]).astype(hs.dtype)
        return hs * mask[:, :, None]

    def reverse_seq(x, lens):
        _, tt, _ = x.shape
        tidx = jnp.arange(tt)[None, :]
        l = lens[:, None]
        in_range = tidx < l
        rev_idx = jnp.where(in_range, l - 1 - tidx, 0)
        g = jnp.take_along_axis(x, rev_idx[:, :, None], axis=1)
        return jnp.where(in_range[:, :, None], g, 0.0)

    def batch_loss(k_hat, actual_k):
        kn = k_hat / jnp.maximum(jnp.sqrt(jnp.sum(k_hat * k_hat, -1, keepdims=True)), eps)
        an = actual_k / jnp.maximum(jnp.sqrt(jnp.sum(actual_k * actual_k, -1, keepdims=True)), eps)
        scores = kn @ an.T
        return jnp.mean(jax.nn.logsumexp(scores, axis=-1) - jnp.diagonal(scores))

    sl = lengths - 1
    fwd_in = fc(image_embeddings[:, :-1, :], text_embeddings[:, :-1, :])
    forward_out = run_lstm(fwd_in, sl, "fw")
    k_hat = forward_out[:, -1, :]
    actual_k = fc(image_embeddings[:, -1:, :], text_embeddings[:, -1:, :])[:, 0, :]
    rev_img = reverse_seq(image_embeddings, lengths)
    rev_txt = reverse_seq(text_embeddings, lengths)
    bwd_in = fc(rev_img[:, :-1, :], rev_txt[:, :-1, :])
    backward_out = run_lstm(bwd_in, sl, "bw")
    r1_hat = backward_out[:, -1, :]
    actual_1 = fc(image_embeddings[:, :1, :], text_embeddings[:, :1, :])[:, 0, :]
    if mode == "train":
        return batch_loss(k_hat, actual_k) + batch_loss(r1_hat, actual_1)
    return k_hat, r1_hat


# --------------------------------------------------------------------------- demo / check
if __name__ == "__main__":
    B, T, E, H = 2, 8, 128, 128  # E == H required by the module's own wiring
    key = jax.random.PRNGKey(0)
    k1, k2, k3 = jax.random.split(key, 3)
    image_embeddings = jax.random.normal(k1, (B, T, E), jnp.float32)
    text_embeddings = jax.random.normal(k2, (B, T, E), jnp.float32)
    lengths = jnp.array([T, T - 3], dtype=jnp.int32)

    params = init_params(k3, E, H)

    total_loss = jax.jit(functools.partial(polyvore_forward, params))(
        image_embeddings, text_embeddings, lengths
    )
    jax.block_until_ready(total_loss)

    k_hat, rev_1_hat = jax.jit(functools.partial(polyvore_forward, params, mode="eval"))(
        image_embeddings, text_embeddings, lengths
    )
    jax.block_until_ready((k_hat, rev_1_hat))

    # correctness spot-check against a pure-JAX transcription of the original module
    ref_loss = _reference_forward(params, image_embeddings, text_embeddings, lengths)
    ref_k, ref_r1 = _reference_forward(
        params, image_embeddings, text_embeddings, lengths, mode="eval"
    )

    assert total_loss.shape == ()
    assert k_hat.shape == (B, H) and rev_1_hat.shape == (B, H)
    assert jnp.allclose(total_loss, ref_loss, rtol=2e-3, atol=2e-3)
    assert jnp.allclose(k_hat, ref_k, rtol=2e-3, atol=2e-3)
    assert jnp.allclose(rev_1_hat, ref_r1, rtol=2e-3, atol=2e-3)
    print("KERNEL_OK")
</pallas_src>

<mosaic_0001>
module attributes {stable_mosaic.version = 11 : i64} {
  func.func @_polyvore_kernel(%arg0: memref<64x256xf32, #tpu.memory_space<vmem>>, %arg1: memref<8x1xf32, #tpu.memory_space<vmem>>, %arg2: memref<256x128xf32, #tpu.memory_space<vmem>>, %arg3: memref<1x128xf32, #tpu.memory_space<vmem>>, %arg4: memref<128x1024xf32, #tpu.memory_space<vmem>>, %arg5: memref<1x1024xf32, #tpu.memory_space<vmem>>, %arg6: memref<256x512xf32, #tpu.memory_space<vmem>>, %arg7: memref<8x128xf32, #tpu.memory_space<vmem>>, %arg8: memref<8x128xf32, #tpu.memory_space<vmem>>, %arg9: memref<1x1xf32, #tpu.memory_space<vmem>>, %arg10: memref<7x16x512xf32, #tpu.memory_space<vmem>>) attributes {dimension_semantics = [], scalar_prefetch = 0 : i64, scratch_operands = 1 : i64, tpu.core_type = #tpu.core_type<tc>} {
    %c0 = arith.constant 0 : index
    %c0_0 = arith.constant 0 : index
    %0 = vector.load %arg0[%c0, %c0_0] : memref<64x256xf32, #tpu.memory_space<vmem>>, vector<64x256xf32>
    %c0_1 = arith.constant 0 : index
    %c0_2 = arith.constant 0 : index
    %1 = vector.load %arg2[%c0_1, %c0_2] : memref<256x128xf32, #tpu.memory_space<vmem>>, vector<256x128xf32>
    %cst = arith.constant dense<0.000000e+00> : vector<64x128xf32>
    %2 = tpu.matmul %0, %1, %cst {dimension_numbers = #tpu.dot_dimension_numbers<[1], [0], [0], [1], [0, 0, 1, 1], [], []>} : vector<64x256xf32>, vector<256x128xf32>, vector<64x128xf32> -> vector<64x128xf32>
    %c0_3 = arith.constant 0 : index
    %c0_4 = arith.constant 0 : index
    %3 = vector.load %arg3[%c0_3, %c0_4] : memref<1x128xf32, #tpu.memory_space<vmem>>, vector<1x128xf32>
    %4 = vector.broadcast %3 : vector<1x128xf32> to vector<64x128xf32>
    %5 = arith.addf %2, %4 : vector<64x128xf32>
    %6 = vector.extract_strided_slice %5 {offsets = [0, 0], sizes = [2, 128], strides = [1, 1]} : vector<64x128xf32> to vector<2x128xf32>
    %7 = vector.extract_strided_slice %5 {offsets = [56, 0], sizes = [2, 128], strides = [1, 1]} : vector<64x128xf32> to vector<2x128xf32>
    %c0_5 = arith.constant 0 : index
    %c0_6 = arith.constant 0 : index
    %8 = vector.load %arg4[%c0_5, %c0_6] : memref<128x1024xf32, #tpu.memory_space<vmem>>, vector<128x1024xf32>
    %cst_7 = arith.constant dense<0.000000e+00> : vector<64x1024xf32>
    %9 = tpu.matmul %5, %8, %cst_7 {dimension_numbers = #tpu.dot_dimension_numbers<[1], [0], [0], [1], [0, 0, 1, 1], [], []>} : vector<64x128xf32>, vector<128x1024xf32>, vector<64x1024xf32> -> vector<64x1024xf32>
    %c0_8 = arith.constant 0 : index
    %c0_9 = arith.constant 0 : index
    %10 = vector.load %arg5[%c0_8, %c0_9] : memref<1x1024xf32, #tpu.memory_space<vmem>>, vector<1x1024xf32>
    %11 = vector.broadcast %10 : vector<1x1024xf32> to vector<64x1024xf32>
    %12 = arith.addf %9, %11 : vector<64x1024xf32>
    %13 = vector.extract_strided_slice %12 {offsets = [0, 0], sizes = [8, 512], strides = [1, 1]} : vector<64x1024xf32> to vector<8x512xf32>
    %c0_10 = arith.constant 0 : index
    %c0_11 = arith.constant 0 : index
    %c0_12 = arith.constant 0 : index
    %14 = vector.load %arg10[%c0_10, %c0_11, %c0_12] : memref<7x16x512xf32, #tpu.memory_space<vmem>>, vector<1x8x512xf32>
    %15 = vector.shape_cast %14 : vector<1x8x512xf32> to vector<8x512xf32>
    %16 = vector.shape_cast %13 : vector<8x512xf32> to vector<1x8x512xf32>
    tpu.vector_store %arg10[%c0_10, %c0_11, %c0_12], %16 {strides = array<i32>} : memref<7x16x512xf32, #tpu.memory_space<vmem>>, vector<1x8x512xf32>,
    %17 = vector.extract_strided_slice %12 {offsets = [56, 512], sizes = [8, 512], strides = [1, 1]} : vector<64x1024xf32> to vector<8x512xf32>
    %c0_13 = arith.constant 0 : index
    %c8 = arith.constant 8 : index
    %c0_14 = arith.constant 0 : index
    %18 = vector.load %arg10[%c0_13, %c8, %c0_14] : memref<7x16x512xf32, #tpu.memory_space<vmem>>, vector<1x8x512xf32>
    %19 = vector.shape_cast %18 : vector<1x8x512xf32> to vector<8x512xf32>
    %20 = vector.shape_cast %17 : vector<8x512xf32> to vector<1x8x512xf32>
    tpu.vector_store %arg10[%c0_13, %c8, %c0_14], %20 {strides = array<i32>} : memref<7x16x512xf32, #tpu.memory_space<vmem>>, vector<1x8x512xf32>,
    %21 = vector.extract_strided_slice %12 {offsets = [8, 0], sizes = [8, 512], strides = [1, 1]} : vector<64x1024xf32> to vector<8x512xf32>
    %c1 = arith.constant 1 : index
    %c0_15 = arith.constant 0 : index
    %c0_16 = arith.constant 0 : index
    %22 = vector.load %arg10[%c1, %c0_15, %c0_16] : memref<7x16x512xf32, #tpu.memory_space<vmem>>, vector<1x8x512xf32>
    %23 = vector.shape_cast %22 : vector<1x8x512xf32> to vector<8x512xf32>
    %24 = vector.shape_cast %21 : vector<8x512xf32> to vector<1x8x512xf32>
    tpu.vector_store %arg10[%c1, %c0_15, %c0_16], %24 {strides = array<i32>} : memref<7x16x512xf32, #tpu.memory_space<vmem>>, vector<1x8x512xf32>,
    %25 = vector.extract_strided_slice %12 {offsets = [48, 512], sizes = [8, 512], strides = [1, 1]} : vector<64x1024xf32> to vector<8x512xf32>
    %c1_17 = arith.constant 1 : index
    %c8_18 = arith.constant 8 : index
    %c0_19 = arith.constant 0 : index
    %26 = vector.load %arg10[%c1_17, %c8_18, %c0_19] : memref<7x16x512xf32, #tpu.memory_space<vmem>>, vector<1x8x512xf32>
    %27 = vector.shape_cast %26 : vector<1x8x512xf32> to vector<8x512xf32>
    %28 = vector.shape_cast %25 : vector<8x512xf32> to vector<1x8x512xf32>
    tpu.vector_store %arg10[%c1_17, %c8_18, %c0_19], %28 {strides = array<i32>} : memref<7x16x512xf32, #tpu.memory_space<vmem>>, vector<1x8x512xf32>,
    %29 = vector.extract_strided_slice %12 {offsets = [16, 0], sizes = [8, 512], strides = [1, 1]} : vector<64x1024xf32> to vector<8x512xf32>
    %c2 = arith.constant 2 : index
    %c0_20 = arith.constant 0 : index
    %c0_21 = arith.constant 0 : index
    %30 = vector.load %arg10[%c2, %c0_20, %c0_21] : memref<7x16x512xf32, #tpu.memory_space<vmem>>, vector<1x8x512xf32>
    %31 = vector.shape_cast %30 : vector<1x8x512xf32> to vector<8x512xf32>
    %32 = vector.shape_cast %29 : vector<8x512xf32> to vector<1x8x512xf32>
    tpu.vector_store %arg10[%c2, %c0_20, %c0_21], %32 {strides = array<i32>} : memref<7x16x512xf32, #tpu.memory_space<vmem>>, vector<1x8x512xf32>,
    %33 = vector.extract_strided_slice %12 {offsets = [40, 512], sizes = [8, 512], strides = [1, 1]} : vector<64x1024xf32> to vector<8x512xf32>
    %c2_22 = arith.constant 2 : index
    %c8_23 = arith.constant 8 : index
    %c0_24 = arith.constant 0 : index
    %34 = vector.load %arg10[%c2_22, %c8_23, %c0_24] : memref<7x16x512xf32, #tpu.memory_space<vmem>>, vector<1x8x512xf32>
    %35 = vector.shape_cast %34 : vector<1x8x512xf32> to vector<8x512xf32>
    %36 = vector.shape_cast %33 : vector<8x512xf32> to vector<1x8x512xf32>
    tpu.vector_store %arg10[%c2_22, %c8_23, %c0_24], %36 {strides = array<i32>} : memref<7x16x512xf32, #tpu.memory_space<vmem>>, vector<1x8x512xf32>,
    %37 = vector.extract_strided_slice %12 {offsets = [24, 0], sizes = [8, 512], strides = [1, 1]} : vector<64x1024xf32> to vector<8x512xf32>
    %c3 = arith.constant 3 : index
    %c0_25 = arith.constant 0 : index
    %c0_26 = arith.constant 0 : index
    %38 = vector.load %arg10[%c3, %c0_25, %c0_26] : memref<7x16x512xf32, #tpu.memory_space<vmem>>, vector<1x8x512xf32>
    %39 = vector.shape_cast %38 : vector<1x8x512xf32> to vector<8x512xf32>
    %40 = vector.shape_cast %37 : vector<8x512xf32> to vector<1x8x512xf32>
    tpu.vector_store %arg10[%c3, %c0_25, %c0_26], %40 {strides = array<i32>} : memref<7x16x512xf32, #tpu.memory_space<vmem>>, vector<1x8x512xf32>,
    %41 = vector.extract_strided_slice %12 {offsets = [32, 512], sizes = [8, 512], strides = [1, 1]} : vector<64x1024xf32> to vector<8x512xf32>
    %c3_27 = arith.constant 3 : index
    %c8_28 = arith.constant 8 : index
    %c0_29 = arith.constant 0 : index
    %42 = vector.load %arg10[%c3_27, %c8_28, %c0_29] : memref<7x16x512xf32, #tpu.memory_space<vmem>>, vector<1x8x512xf32>
    %43 = vector.shape_cast %42 : vector<1x8x512xf32> to vector<8x512xf32>
    %44 = vector.shape_cast %41 : vector<8x512xf32> to vector<1x8x512xf32>
    tpu.vector_store %arg10[%c3_27, %c8_28, %c0_29], %44 {strides = array<i32>} : memref<7x16x512xf32, #tpu.memory_space<vmem>>, vector<1x8x512xf32>,
    %45 = vector.extract_strided_slice %12 {offsets = [32, 0], sizes = [8, 512], strides = [1, 1]} : vector<64x1024xf32> to vector<8x512xf32>
    %c4 = arith.constant 4 : index
    %c0_30 = arith.constant 0 : index
    %c0_31 = arith.constant 0 : index
    %46 = vector.load %arg10[%c4, %c0_30, %c0_31] : memref<7x16x512xf32, #tpu.memory_space<vmem>>, vector<1x8x512xf32>
    %47 = vector.shape_cast %46 : vector<1x8x512xf32> to vector<8x512xf32>
    %48 = vector.shape_cast %45 : vector<8x512xf32> to vector<1x8x512xf32>
    tpu.vector_store %arg10[%c4, %c0_30, %c0_31], %48 {strides = array<i32>} : memref<7x16x512xf32, #tpu.memory_space<vmem>>, vector<1x8x512xf32>,
    %49 = vector.extract_strided_slice %12 {offsets = [24, 512], sizes = [8, 512], strides = [1, 1]} : vector<64x1024xf32> to vector<8x512xf32>
    %c4_32 = arith.constant 4 : index
    %c8_33 = arith.constant 8 : index
    %c0_34 = arith.constant 0 : index
    %50 = vector.load %arg10[%c4_32, %c8_33, %c0_34] : memref<7x16x512xf32, #tpu.memory_space<vmem>>, vector<1x8x512xf32>
    %51 = vector.shape_cast %50 : vector<1x8x512xf32> to vector<8x512xf32>
    %52 = vector.shape_cast %49 : vector<8x512xf32> to vector<1x8x512xf32>
    tpu.vector_store %arg10[%c4_32, %c8_33, %c0_34], %52 {strides = array<i32>} : memref<7x16x512xf32, #tpu.memory_space<vmem>>, vector<1x8x512xf32>,
    %53 = vector.extract_strided_slice %12 {offsets = [40, 0], sizes = [8, 512], strides = [1, 1]} : vector<64x1024xf32> to vector<8x512xf32>
    %c5 = arith.constant 5 : index
    %c0_35 = arith.constant 0 : index
    %c0_36 = arith.constant 0 : index
    %54 = vector.load %arg10[%c5, %c0_35, %c0_36] : memref<7x16x512xf32, #tpu.memory_space<vmem>>, vector<1x8x512xf32>
    %55 = vector.shape_cast %54 : vector<1x8x512xf32> to vector<8x512xf32>
    %56 = vector.shape_cast %53 : vector<8x512xf32> to vector<1x8x512xf32>
    tpu.vector_store %arg10[%c5, %c0_35, %c0_36], %56 {strides = array<i32>} : memref<7x16x512xf32, #tpu.memory_space<vmem>>, vector<1x8x512xf32>,
    %57 = vector.extract_strided_slice %12 {offsets = [16, 512], sizes = [8, 512], strides = [1, 1]} : vector<64x1024xf32> to vector<8x512xf32>
    %c5_37 = arith.constant 5 : index
    %c8_38 = arith.constant 8 : index
    %c0_39 = arith.constant 0 : index
    %58 = vector.load %arg10[%c5_37, %c8_38, %c0_39] : memref<7x16x512xf32, #tpu.memory_space<vmem>>, vector<1x8x512xf32>
    %59 = vector.shape_cast %58 : vector<1x8x512xf32> to vector<8x512xf32>
    %60 = vector.shape_cast %57 : vector<8x512xf32> to vector<1x8x512xf32>
    tpu.vector_store %arg10[%c5_37, %c8_38, %c0_39], %60 {strides = array<i32>} : memref<7x16x512xf32, #tpu.memory_space<vmem>>, vector<1x8x512xf32>,
    %61 = vector.extract_strided_slice %12 {offsets = [48, 0], sizes = [8, 512], strides = [1, 1]} : vector<64x1024xf32> to vector<8x512xf32>
    %c6 = arith.constant 6 : index
    %c0_40 = arith.constant 0 : index
    %c0_41 = arith.constant 0 : index
    %62 = vector.load %arg10[%c6, %c0_40, %c0_41] : memref<7x16x512xf32, #tpu.memory_space<vmem>>, vector<1x8x512xf32>
    %63 = vector.shape_cast %62 : vector<1x8x512xf32> to vector<8x512xf32>
    %64 = vector.shape_cast %61 : vector<8x512xf32> to vector<1x8x512xf32>
    tpu.vector_store %arg10[%c6, %c0_40, %c0_41], %64 {strides = array<i32>} : memref<7x16x512xf32, #tpu.memory_space<vmem>>, vector<1x8x512xf32>,
    %65 = vector.extract_strided_slice %12 {offsets = [8, 512], sizes = [8, 512], strides = [1, 1]} : vector<64x1024xf32> to vector<8x512xf32>
    %c6_42 = arith.constant 6 : index
    %c8_43 = arith.constant 8 : index
    %c0_44 = arith.constant 0 : index
    %66 = vector.load %arg10[%c6_42, %c8_43, %c0_44] : memref<7x16x512xf32, #tpu.memory_space<vmem>>, vector<1x8x512xf32>
    %67 = vector.shape_cast %66 : vector<1x8x512xf32> to vector<8x512xf32>
    %68 = vector.shape_cast %65 : vector<8x512xf32> to vector<1x8x512xf32>
    tpu.vector_store %arg10[%c6_42, %c8_43, %c0_44], %68 {strides = array<i32>} : memref<7x16x512xf32, #tpu.memory_space<vmem>>, vector<1x8x512xf32>,
    %69 = tpu.iota {dimensions = array<i32: 0>} : vector<16x256xi32>
    %70 = tpu.iota {dimensions = array<i32: 1>} : vector<16x256xi32>
    %c8_i32 = arith.constant 8 : i32
    %71 = vector.broadcast %c8_i32 : i32 to vector<16x256xi32>
    %72 = arith.cmpi slt, %69, %71 : vector<16x256xi32>
    %c128_i32 = arith.constant 128 : i32
    %73 = vector.broadcast %c128_i32 : i32 to vector<16x256xi32>
    %74 = arith.cmpi slt, %70, %73 : vector<16x256xi32>
    %75 = arith.xori %72, %74 : vector<16x256xi1>
    %cst_45 = arith.constant dense<true> : vector<16x256xi1>
    %76 = arith.xori %75, %cst_45 : vector<16x256xi1>
    %77 = arith.extui %76 : vector<16x256xi1> to vector<16x256xi32>
    %78 = arith.sitofp %77 : vector<16x256xi32> to vector<16x256xf32>
    %cst_46 = arith.constant 0.000000e+00 : f32
    %79 = vector.broadcast %cst_46 : f32 to vector<16x128xf32>
    %cst_47 = arith.constant 0.000000e+00 : f32
    %80 = vector.broadcast %cst_47 : f32 to vector<16x128xf32>
    %c0_i32 = arith.constant 0 : i32
    %81 = arith.index_cast %c0_i32 : i32 to index
    %c0_48 = arith.constant 0 : index
    %c0_49 = arith.constant 0 : index
    %82 = vector.load %arg10[%81, %c0_48, %c0_49] : memref<7x16x512xf32, #tpu.memory_space<vmem>>, vector<1x16x512xf32>
    %83 = vector.shape_cast %82 : vector<1x16x512xf32> to vector<16x512xf32>
    %84 = tpu.concatenate %79, %79 in 1 : vector<16x128xf32>, vector<16x128xf32> -> vector<16x256xf32>
    %85 = arith.mulf %84, %78 : vector<16x256xf32>
    %c0_50 = arith.constant 0 : index
    %c0_51 = arith.constant 0 : index
    %86 = vector.load %arg6[%c0_50, %c0_51] : memref<256x512xf32, #tpu.memory_space<vmem>>, vector<256x512xf32>
    %cst_52 = arith.constant dense<0.000000e+00> : vector<16x512xf32>
    %87 = tpu.matmul %85, %86, %cst_52 {dimension_numbers = #tpu.dot_dimension_numbers<[1], [0], [0], [1], [0, 0, 1, 1], [], []>} : vector<16x256xf32>, vector<256x512xf32>, vector<16x512xf32> -> vector<16x512xf32>
    %88 = arith.addf %83, %87 : vector<16x512xf32>
    %89 = vector.extract_strided_slice %88 {offsets = [0, 0], sizes = [16, 384], strides = [1, 1]} : vector<16x512xf32> to vector<16x384xf32>
    %90 = arith.negf %89 : vector<16x384xf32>
    %91 = math.exp %90 : vector<16x384xf32>
    %cst_53 = arith.constant 1.000000e+00 : f32
    %92 = vector.broadcast %cst_53 : f32 to vector<16x384xf32>
    %93 = arith.addf %92, %91 : vector<16x384xf32>
    %94 = arith.divf %92, %93 : vector<16x384xf32>
    %95 = vector.extract_strided_slice %88 {offsets = [0, 384], sizes = [16, 128], strides = [1, 1]} : vector<16x512xf32> to vector<16x128xf32>
    %96 = math.tanh %95 : vector<16x128xf32>
    %97 = vector.extract_strided_slice %94 {offsets = [0, 0], sizes = [16, 128], strides = [1, 1]} : vector<16x384xf32> to vector<16x128xf32>
    %98 = vector.extract_strided_slice %94 {offsets = [0, 128], sizes = [16, 128], strides = [1, 1]} : vector<16x384xf32> to vector<16x128xf32>
    %99 = vector.extract_strided_slice %94 {offsets = [0, 256], sizes = [16, 128], strides = [1, 1]} : vector<16x384xf32> to vector<16x128xf32>
    %100 = arith.mulf %98, %80 : vector<16x128xf32>
    %101 = arith.mulf %97, %96 : vector<16x128xf32>
    %102 = arith.addf %100, %101 : vector<16x128xf32>
    %103 = math.tanh %102 : vector<16x128xf32>
    %104 = arith.mulf %99, %103 : vector<16x128xf32>
    %c1_i32 = arith.constant 1 : i32
    %105 = arith.index_cast %c1_i32 : i32 to index
    %c0_54 = arith.constant 0 : index
    %c0_55 = arith.constant 0 : index
    %106 = vector.load %arg10[%105, %c0_54, %c0_55] : memref<7x16x512xf32, #tpu.memory_space<vmem>>, vector<1x16x512xf32>
    %107 = vector.shape_cast %106 : vector<1x16x512xf32> to vector<16x512xf32>
    %108 = tpu.concatenate %104, %104 in 1 : vector<16x128xf32>, vector<16x128xf32> -> vector<16x256xf32>
    %109 = arith.mulf %108, %78 : vector<16x256xf32>
    %c0_56 = arith.constant 0 : index
    %c0_57 = arith.constant 0 : index
    %110 = vector.load %arg6[%c0_56, %c0_57] : memref<256x512xf32, #tpu.memory_space<vmem>>, vector<256x512xf32>
    %cst_58 = arith.constant dense<0.000000e+00> : vector<16x512xf32>
    %111 = tpu.matmul %109, %110, %cst_58 {dimension_numbers = #tpu.dot_dimension_numbers<[1], [0], [0], [1], [0, 0, 1, 1], [], []>} : vector<16x256xf32>, vector<256x512xf32>, vector<16x512xf32> -> vector<16x512xf32>
    %112 = arith.addf %107, %111 : vector<16x512xf32>
    %113 = vector.extract_strided_slice %112 {offsets = [0, 0], sizes = [16, 384], strides = [1, 1]} : vector<16x512xf32> to vector<16x384xf32>
    %114 = arith.negf %113 : vector<16x384xf32>
    %115 = math.exp %114 : vector<16x384xf32>
    %cst_59 = arith.constant 1.000000e+00 : f32
    %116 = vector.broadcast %cst_59 : f32 to vector<16x384xf32>
    %117 = arith.addf %116, %115 : vector<16x384xf32>
    %118 = arith.divf %116, %117 : vector<16x384xf32>
    %119 = vector.extract_strided_slice %112 {offsets = [0, 384], sizes = [16, 128], strides = [1, 1]} : vector<16x512xf32> to vector<16x128xf32>
    %120 = math.tanh %119 : vector<16x128xf32>
    %121 = vector.extract_strided_slice %118 {offsets = [0, 0], sizes = [16, 128], strides = [1, 1]} : vector<16x384xf32> to vector<16x128xf32>
    %122 = vector.extract_strided_slice %118 {offsets = [0, 128], sizes = [16, 128], strides = [1, 1]} : vector<16x384xf32> to vector<16x128xf32>
    %123 = vector.extract_strided_slice %118 {offsets = [0, 256], sizes = [16, 128], strides = [1, 1]} : vector<16x384xf32> to vector<16x128xf32>
    %124 = arith.mulf %122, %102 : vector<16x128xf32>
    %125 = arith.mulf %121, %120 : vector<16x128xf32>
    %126 = arith.addf %124, %125 : vector<16x128xf32>
    %127 = math.tanh %126 : vector<16x128xf32>
    %128 = arith.mulf %123, %127 : vector<16x128xf32>
    %c2_i32 = arith.constant 2 : i32
    %129 = arith.index_cast %c2_i32 : i32 to index
    %c0_60 = arith.constant 0 : index
    %c0_61 = arith.constant 0 : index
    %130 = vector.load %arg10[%129, %c0_60, %c0_61] : memref<7x16x512xf32, #tpu.memory_space<vmem>>, vector<1x16x512xf32>
    %131 = vector.shape_cast %130 : vector<1x16x512xf32> to vector<16x512xf32>
    %132 = tpu.concatenate %128, %128 in 1 : vector<16x128xf32>, vector<16x128xf32> -> vector<16x256xf32>
    %133 = arith.mulf %132, %78 : vector<16x256xf32>
    %c0_62 = arith.constant 0 : index
    %c0_63 = arith.constant 0 : index
    %134 = vector.load %arg6[%c0_62, %c0_63] : memref<256x512xf32, #tpu.memory_space<vmem>>, vector<256x512xf32>
    %cst_64 = arith.constant dense<0.000000e+00> : vector<16x512xf32>
    %135 = tpu.matmul %133, %134, %cst_64 {dimension_numbers = #tpu.dot_dimension_numbers<[1], [0], [0], [1], [0, 0, 1, 1], [], []>} : vector<16x256xf32>, vector<256x512xf32>, vector<16x512xf32> -> vector<16x512xf32>
    %136 = arith.addf %131, %135 : vector<16x512xf32>
    %137 = vector.extract_strided_slice %136 {offsets = [0, 0], sizes = [16, 384], strides = [1, 1]} : vector<16x512xf32> to vector<16x384xf32>
    %138 = arith.negf %137 : vector<16x384xf32>
    %139 = math.exp %138 : vector<16x384xf32>
    %cst_65 = arith.constant 1.000000e+00 : f32
    %140 = vector.broadcast %cst_65 : f32 to vector<16x384xf32>
    %141 = arith.addf %140, %139 : vector<16x384xf32>
    %142 = arith.divf %140, %141 : vector<16x384xf32>
    %143 = vector.extract_strided_slice %136 {offsets = [0, 384], sizes = [16, 128], strides = [1, 1]} : vector<16x512xf32> to vector<16x128xf32>
    %144 = math.tanh %143 : vector<16x128xf32>
    %145 = vector.extract_strided_slice %142 {offsets = [0, 0], sizes = [16, 128], strides = [1, 1]} : vector<16x384xf32> to vector<16x128xf32>
    %146 = vector.extract_strided_slice %142 {offsets = [0, 128], sizes = [16, 128], strides = [1, 1]} : vector<16x384xf32> to vector<16x128xf32>
    %147 = vector.extract_strided_slice %142 {offsets = [0, 256], sizes = [16, 128], strides = [1, 1]} : vector<16x384xf32> to vector<16x128xf32>
    %148 = arith.mulf %146, %126 : vector<16x128xf32>
    %149 = arith.mulf %145, %144 : vector<16x128xf32>
    %150 = arith.addf %148, %149 : vector<16x128xf32>
    %151 = math.tanh %150 : vector<16x128xf32>
    %152 = arith.mulf %147, %151 : vector<16x128xf32>
    %c3_i32 = arith.constant 3 : i32
    %153 = arith.index_cast %c3_i32 : i32 to index
    %c0_66 = arith.constant 0 : index
    %c0_67 = arith.constant 0 : index
    %154 = vector.load %arg10[%153, %c0_66, %c0_67] : memref<7x16x512xf32, #tpu.memory_space<vmem>>, vector<1x16x512xf32>
    %155 = vector.shape_cast %154 : vector<1x16x512xf32> to vector<16x512xf32>
    %156 = tpu.concatenate %152, %152 in 1 : vector<16x128xf32>, vector<16x128xf32> -> vector<16x256xf32>
    %157 = arith.mulf %156, %78 : vector<16x256xf32>
    %c0_68 = arith.constant 0 : index
    %c0_69 = arith.constant 0 : index
    %158 = vector.load %arg6[%c0_68, %c0_69] : memref<256x512xf32, #tpu.memory_space<vmem>>, vector<256x512xf32>
    %cst_70 = arith.constant dense<0.000000e+00> : vector<16x512xf32>
    %159 = tpu.matmul %157, %158, %cst_70 {dimension_numbers = #tpu.dot_dimension_numbers<[1], [0], [0], [1], [0, 0, 1, 1], [], []>} : vector<16x256xf32>, vector<256x512xf32>, vector<16x512xf32> -> vector<16x512xf32>
    %160 = arith.addf %155, %159 : vector<16x512xf32>
    %161 = vector.extract_strided_slice %160 {offsets = [0, 0], sizes = [16, 384], strides = [1, 1]} : vector<16x512xf32> to vector<16x384xf32>
    %162 = arith.negf %161 : vector<16x384xf32>
    %163 = math.exp %162 : vector<16x384xf32>
    %cst_71 = arith.constant 1.000000e+00 : f32
    %164 = vector.broadcast %cst_71 : f32 to vector<16x384xf32>
    %165 = arith.addf %164, %163 : vector<16x384xf32>
    %166 = arith.divf %164, %165 : vector<16x384xf32>
    %167 = vector.extract_strided_slice %160 {offsets = [0, 384], sizes = [16, 128], strides = [1, 1]} : vector<16x512xf32> to vector<16x128xf32>
    %168 = math.tanh %167 : vector<16x128xf32>
    %169 = vector.extract_strided_slice %166 {offsets = [0, 0], sizes = [16, 128], strides = [1, 1]} : vector<16x384xf32> to vector<16x128xf32>
    %170 = vector.extract_strided_slice %166 {offsets = [0, 128], sizes = [16, 128], strides = [1, 1]} : vector<16x384xf32> to vector<16x128xf32>
    %171 = vector.extract_strided_slice %166 {offsets = [0, 256], sizes = [16, 128], strides = [1, 1]} : vector<16x384xf32> to vector<16x128xf32>
    %172 = arith.mulf %170, %150 : vector<16x128xf32>
    %173 = arith.mulf %169, %168 : vector<16x128xf32>
    %174 = arith.addf %172, %173 : vector<16x128xf32>
    %175 = math.tanh %174 : vector<16x128xf32>
    %176 = arith.mulf %171, %175 : vector<16x128xf32>
    %c4_i32 = arith.constant 4 : i32
    %177 = arith.index_cast %c4_i32 : i32 to index
    %c0_72 = arith.constant 0 : index
    %c0_73 = arith.constant 0 : index
    %178 = vector.load %arg10[%177, %c0_72, %c0_73] : memref<7x16x512xf32, #tpu.memory_space<vmem>>, vector<1x16x512xf32>
    %179 = vector.shape_cast %178 : vector<1x16x512xf32> to vector<16x512xf32>
    %180 = tpu.concatenate %176, %176 in 1 : vector<16x128xf32>, vector<16x128xf32> -> vector<16x256xf32>
    %181 = arith.mulf %180, %78 : vector<16x256xf32>
    %c0_74 = arith.constant 0 : index
    %c0_75 = arith.constant 0 : index
    %182 = vector.load %arg6[%c0_74, %c0_75] : memref<256x512xf32, #tpu.memory_space<vmem>>, vector<256x512xf32>
    %cst_76 = arith.constant dense<0.000000e+00> : vector<16x512xf32>
    %183 = tpu.matmul %181, %182, %cst_76 {dimension_numbers = #tpu.dot_dimension_numbers<[1], [0], [0], [1], [0, 0, 1, 1], [], []>} : vector<16x256xf32>, vector<256x512xf32>, vector<16x512xf32> -> vector<16x512xf32>
    %184 = arith.addf %179, %183 : vector<16x512xf32>
    %185 = vector.extract_strided_slice %184 {offsets = [0, 0], sizes = [16, 384], strides = [1, 1]} : vector<16x512xf32> to vector<16x384xf32>
    %186 = arith.negf %185 : vector<16x384xf32>
    %187 = math.exp %186 : vector<16x384xf32>
    %cst_77 = arith.constant 1.000000e+00 : f32
    %188 = vector.broadcast %cst_77 : f32 to vector<16x384xf32>
    %189 = arith.addf %188, %187 : vector<16x384xf32>
    %190 = arith.divf %188, %189 : vector<16x384xf32>
    %191 = vector.extract_strided_slice %184 {offsets = [0, 384], sizes = [16, 128], strides = [1, 1]} : vector<16x512xf32> to vector<16x128xf32>
    %192 = math.tanh %191 : vector<16x128xf32>
    %193 = vector.extract_strided_slice %190 {offsets = [0, 0], sizes = [16, 128], strides = [1, 1]} : vector<16x384xf32> to vector<16x128xf32>
    %194 = vector.extract_strided_slice %190 {offsets = [0, 128], sizes = [16, 128], strides = [1, 1]} : vector<16x384xf32> to vector<16x128xf32>
    %195 = vector.extract_strided_slice %190 {offsets = [0, 256], sizes = [16, 128], strides = [1, 1]} : vector<16x384xf32> to vector<16x128xf32>
    %196 = arith.mulf %194, %174 : vector<16x128xf32>
    %197 = arith.mulf %193, %192 : vector<16x128xf32>
    %198 = arith.addf %196, %197 : vector<16x128xf32>
    %199 = math.tanh %198 : vector<16x128xf32>
    %200 = arith.mulf %195, %199 : vector<16x128xf32>
    %c5_i32 = arith.constant 5 : i32
    %201 = arith.index_cast %c5_i32 : i32 to index
    %c0_78 = arith.constant 0 : index
    %c0_79 = arith.constant 0 : index
    %202 = vector.load %arg10[%201, %c0_78, %c0_79] : memref<7x16x512xf32, #tpu.memory_space<vmem>>, vector<1x16x512xf32>
    %203 = vector.shape_cast %202 : vector<1x16x512xf32> to vector<16x512xf32>
    %204 = tpu.concatenate %200, %200 in 1 : vector<16x128xf32>, vector<16x128xf32> -> vector<16x256xf32>
    %205 = arith.mulf %204, %78 : vector<16x256xf32>
    %c0_80 = arith.constant 0 : index
    %c0_81 = arith.constant 0 : index
    %206 = vector.load %arg6[%c0_80, %c0_81] : memref<256x512xf32, #tpu.memory_space<vmem>>, vector<256x512xf32>
    %cst_82 = arith.constant dense<0.000000e+00> : vector<16x512xf32>
    %207 = tpu.matmul %205, %206, %cst_82 {dimension_numbers = #tpu.dot_dimension_numbers<[1], [0], [0], [1], [0, 0, 1, 1], [], []>} : vector<16x256xf32>, vector<256x512xf32>, vector<16x512xf32> -> vector<16x512xf32>
    %208 = arith.addf %203, %207 : vector<16x512xf32>
    %209 = vector.extract_strided_slice %208 {offsets = [0, 0], sizes = [16, 384], strides = [1, 1]} : vector<16x512xf32> to vector<16x384xf32>
    %210 = arith.negf %209 : vector<16x384xf32>
    %211 = math.exp %210 : vector<16x384xf32>
    %cst_83 = arith.constant 1.000000e+00 : f32
    %212 = vector.broadcast %cst_83 : f32 to vector<16x384xf32>
    %213 = arith.addf %212, %211 : vector<16x384xf32>
    %214 = arith.divf %212, %213 : vector<16x384xf32>
    %215 = vector.extract_strided_slice %208 {offsets = [0, 384], sizes = [16, 128], strides = [1, 1]} : vector<16x512xf32> to vector<16x128xf32>
    %216 = math.tanh %215 : vector<16x128xf32>
    %217 = vector.extract_strided_slice %214 {offsets = [0, 0], sizes = [16, 128], strides = [1, 1]} : vector<16x384xf32> to vector<16x128xf32>
    %218 = vector.extract_strided_slice %214 {offsets = [0, 128], sizes = [16, 128], strides = [1, 1]} : vector<16x384xf32> to vector<16x128xf32>
    %219 = vector.extract_strided_slice %214 {offsets = [0, 256], sizes = [16, 128], strides = [1, 1]} : vector<16x384xf32> to vector<16x128xf32>
    %220 = arith.mulf %218, %198 : vector<16x128xf32>
    %221 = arith.mulf %217, %216 : vector<16x128xf32>
    %222 = arith.addf %220, %221 : vector<16x128xf32>
    %223 = math.tanh %222 : vector<16x128xf32>
    %224 = arith.mulf %219, %223 : vector<16x128xf32>
    %c6_i32 = arith.constant 6 : i32
    %225 = arith.index_cast %c6_i32 : i32 to index
    %c0_84 = arith.constant 0 : index
    %c0_85 = arith.constant 0 : index
    %226 = vector.load %arg10[%225, %c0_84, %c0_85] : memref<7x16x512xf32, #tpu.memory_space<vmem>>, vector<1x16x512xf32>
    %227 = vector.shape_cast %226 : vector<1x16x512xf32> to vector<16x512xf32>
    %228 = tpu.concatenate %224, %224 in 1 : vector<16x128xf32>, vector<16x128xf32> -> vector<16x256xf32>
    %229 = arith.mulf %228, %78 : vector<16x256xf32>
    %c0_86 = arith.constant 0 : index
    %c0_87 = arith.constant 0 : index
    %230 = vector.load %arg6[%c0_86, %c0_87] : memref<256x512xf32, #tpu.memory_space<vmem>>, vector<256x512xf32>
    %cst_88 = arith.constant dense<0.000000e+00> : vector<16x512xf32>
    %231 = tpu.matmul %229, %230, %cst_88 {dimension_numbers = #tpu.dot_dimension_numbers<[1], [0], [0], [1], [0, 0, 1, 1], [], []>} : vector<16x256xf32>, vector<256x512xf32>, vector<16x512xf32> -> vector<16x512xf32>
    %232 = arith.addf %227, %231 : vector<16x512xf32>
    %233 = vector.extract_strided_slice %232 {offsets = [0, 0], sizes = [16, 384], strides = [1, 1]} : vector<16x512xf32> to vector<16x384xf32>
    %234 = arith.negf %233 : vector<16x384xf32>
    %235 = math.exp %234 : vector<16x384xf32>
    %cst_89 = arith.constant 1.000000e+00 : f32
    %236 = vector.broadcast %cst_89 : f32 to vector<16x384xf32>
    %237 = arith.addf %236, %235 : vector<16x384xf32>
    %238 = arith.divf %236, %237 : vector<16x384xf32>
    %239 = vector.extract_strided_slice %232 {offsets = [0, 384], sizes = [16, 128], strides = [1, 1]} : vector<16x512xf32> to vector<16x128xf32>
    %240 = math.tanh %239 : vector<16x128xf32>
    %241 = vector.extract_strided_slice %238 {offsets = [0, 0], sizes = [16, 128], strides = [1, 1]} : vector<16x384xf32> to vector<16x128xf32>
    %242 = vector.extract_strided_slice %238 {offsets = [0, 128], sizes = [16, 128], strides = [1, 1]} : vector<16x384xf32> to vector<16x128xf32>
    %243 = vector.extract_strided_slice %238 {offsets = [0, 256], sizes = [16, 128], strides = [1, 1]} : vector<16x384xf32> to vector<16x128xf32>
    %244 = arith.mulf %242, %222 : vector<16x128xf32>
    %245 = arith.mulf %241, %240 : vector<16x128xf32>
    %246 = arith.addf %244, %245 : vector<16x128xf32>
    %247 = math.tanh %246 : vector<16x128xf32>
    %248 = arith.mulf %243, %247 : vector<16x128xf32>
    %c7_i32 = arith.constant 7 : i32
    %c0_90 = arith.constant 0 : index
    %c0_91 = arith.constant 0 : index
    %249 = vector.load %arg1[%c0_90, %c0_91] : memref<8x1xf32, #tpu.memory_space<vmem>>, vector<8x1xf32>
    %250 = vector.extract_strided_slice %248 {offsets = [0, 0], sizes = [8, 128], strides = [1, 1]} : vector<16x128xf32> to vector<8x128xf32>
    %251 = vector.broadcast %249 : vector<8x1xf32> to vector<8x128xf32>
    %252 = arith.mulf %250, %251 : vector<8x128xf32>
    %253 = vector.extract_strided_slice %248 {offsets = [8, 0], sizes = [8, 128], strides = [1, 1]} : vector<16x128xf32> to vector<8x128xf32>
    %254 = vector.broadcast %249 : vector<8x1xf32> to vector<8x128xf32>
    %255 = arith.mulf %253, %254 : vector<8x128xf32>
    %c0_92 = arith.constant 0 : index
    %c0_93 = arith.constant 0 : index
    %256 = vector.load %arg7[%c0_92, %c0_93] : memref<8x128xf32, #tpu.memory_space<vmem>>, vector<8x128xf32>
    tpu.vector_store %arg7[%c0_92, %c0_93], %252 {strides = array<i32>} : memref<8x128xf32, #tpu.memory_space<vmem>>, vector<8x128xf32>,
    %c0_94 = arith.constant 0 : index
    %c0_95 = arith.constant 0 : index
    %257 = vector.load %arg8[%c0_94, %c0_95] : memref<8x128xf32, #tpu.memory_space<vmem>>, vector<8x128xf32>
    tpu.vector_store %arg8[%c0_94, %c0_95], %255 {strides = array<i32>} : memref<8x128xf32, #tpu.memory_space<vmem>>, vector<8x128xf32>,
    %258 = vector.extract_strided_slice %252 {offsets = [0, 0], sizes = [2, 128], strides = [1, 1]} : vector<8x128xf32> to vector<2x128xf32>
    %259 = arith.mulf %258, %258 : vector<2x128xf32>
    %cst_96 = arith.constant dense<0.000000e+00> : vector<2xf32>
    %260 = vector.multi_reduction <add>, %259, %cst_96 [1] : vector<2x128xf32> to vector<2xf32>
    %261 = vector.shape_cast %260 : vector<2xf32> to vector<2x1xf32>
    %cst_97 = arith.constant 1.000000e-24 : f32
    %262 = vector.broadcast %cst_97 : f32 to vector<2x1xf32>
    %263 = arith.maximumf %261, %262 : vector<2x1xf32>
    %264 = math.rsqrt %263 : vector<2x1xf32>
    %265 = vector.broadcast %264 : vector<2x1xf32> to vector<2x128xf32>
    %266 = arith.mulf %258, %265 : vector<2x128xf32>
    %267 = arith.mulf %7, %7 : vector<2x128xf32>
    %cst_98 = arith.constant dense<0.000000e+00> : vector<2xf32>
    %268 = vector.multi_reduction <add>, %267, %cst_98 [1] : vector<2x128xf32> to vector<2xf32>
    %269 = vector.shape_cast %268 : vector<2xf32> to vector<2x1xf32>
    %cst_99 = arith.constant 1.000000e-24 : f32
    %270 = vector.broadcast %cst_99 : f32 to vector<2x1xf32>
    %271 = arith.maximumf %269, %270 : vector<2x1xf32>
    %272 = math.rsqrt %271 : vector<2x1xf32>
    %273 = vector.broadcast %272 : vector<2x1xf32> to vector<2x128xf32>
    %274 = arith.mulf %7, %273 : vector<2x128xf32>
    %cst_100 = arith.constant dense<0.000000e+00> : vector<2x2xf32>
    %275 = tpu.matmul %266, %274, %cst_100 {dimension_numbers = #tpu.dot_dimension_numbers<[1], [1], [0], [0], [0, 0, 1, 0], [], []>} : vector<2x128xf32>, vector<2x128xf32>, vector<2x2xf32> -> vector<2x2xf32>
    %cst_101 = arith.constant dense<0xFF800000> : vector<2xf32>
    %276 = vector.multi_reduction <maximumf>, %275, %cst_101 [1] : vector<2x2xf32> to vector<2xf32>
    %277 = vector.shape_cast %276 : vector<2xf32> to vector<2x1xf32>
    %278 = vector.broadcast %277 : vector<2x1xf32> to vector<2x2xf32>
    %279 = arith.subf %275, %278 : vector<2x2xf32>
    %280 = math.exp %279 : vector<2x2xf32>
    %cst_102 = arith.constant dense<0.000000e+00> : vector<2xf32>
    %281 = vector.multi_reduction <add>, %280, %cst_102 [1] : vector<2x2xf32> to vector<2xf32>
    %282 = vector.shape_cast %281 : vector<2xf32> to vector<2x1xf32>
    %283 = math.log %282 : vector<2x1xf32>
    %284 = arith.addf %277, %283 : vector<2x1xf32>
    %285 = tpu.iota {dimensions = array<i32: 0>} : vector<2x2xi32>
    %286 = tpu.iota {dimensions = array<i32: 1>} : vector<2x2xi32>
    %287 = arith.cmpi eq, %285, %286 : vector<2x2xi32>
    %288 = arith.extui %287 : vector<2x2xi1> to vector<2x2xi32>
    %289 = arith.sitofp %288 : vector<2x2xi32> to vector<2x2xf32>
    %290 = arith.mulf %275, %289 : vector<2x2xf32>
    %cst_103 = arith.constant dense<0.000000e+00> : vector<2xf32>
    %291 = vector.multi_reduction <add>, %290, %cst_103 [1] : vector<2x2xf32> to vector<2xf32>
    %292 = vector.shape_cast %291 : vector<2xf32> to vector<2x1xf32>
    %293 = arith.subf %284, %292 : vector<2x1xf32>
    %cst_104 = arith.constant dense<0.000000e+00> : vector<1xf32>
    %294 = vector.multi_reduction <add>, %293, %cst_104 [0] : vector<2x1xf32> to vector<1xf32>
    %295 = vector.shape_cast %294 : vector<1xf32> to vector<1x1xf32>
    %cst_105 = arith.constant 2.000000e+00 : f32
    %296 = vector.broadcast %cst_105 : f32 to vector<1x1xf32>
    %297 = arith.divf %295, %296 : vector<1x1xf32>
    %298 = vector.extract_strided_slice %255 {offsets = [0, 0], sizes = [2, 128], strides = [1, 1]} : vector<8x128xf32> to vector<2x128xf32>
    %299 = arith.mulf %298, %298 : vector<2x128xf32>
    %cst_106 = arith.constant dense<0.000000e+00> : vector<2xf32>
    %300 = vector.multi_reduction <add>, %299, %cst_106 [1] : vector<2x128xf32> to vector<2xf32>
    %301 = vector.shape_cast %300 : vector<2xf32> to vector<2x1xf32>
    %cst_107 = arith.constant 1.000000e-24 : f32
    %302 = vector.broadcast %cst_107 : f32 to vector<2x1xf32>
    %303 = arith.maximumf %301, %302 : vector<2x1xf32>
    %304 = math.rsqrt %303 : vector<2x1xf32>
    %305 = vector.broadcast %304 : vector<2x1xf32> to vector<2x128xf32>
    %306 = arith.mulf %298, %305 : vector<2x128xf32>
    %307 = arith.mulf %6, %6 : vector<2x128xf32>
    %cst_108 = arith.constant dense<0.000000e+00> : vector<2xf32>
    %308 = vector.multi_reduction <add>, %307, %cst_108 [1] : vector<2x128xf32> to vector<2xf32>
    %309 = vector.shape_cast %308 : vector<2xf32> to vector<2x1xf32>
    %cst_109 = arith.constant 1.000000e-24 : f32
    %310 = vector.broadcast %cst_109 : f32 to vector<2x1xf32>
    %311 = arith.maximumf %309, %310 : vector<2x1xf32>
    %312 = math.rsqrt %311 : vector<2x1xf32>
    %313 = vector.broadcast %312 : vector<2x1xf32> to vector<2x128xf32>
    %314 = arith.mulf %6, %313 : vector<2x128xf32>
    %cst_110 = arith.constant dense<0.000000e+00> : vector<2x2xf32>
    %315 = tpu.matmul %306, %314, %cst_110 {dimension_numbers = #tpu.dot_dimension_numbers<[1], [1], [0], [0], [0, 0, 1, 0], [], []>} : vector<2x128xf32>, vector<2x128xf32>, vector<2x2xf32> -> vector<2x2xf32>
    %cst_111 = arith.constant dense<0xFF800000> : vector<2xf32>
    %316 = vector.multi_reduction <maximumf>, %315, %cst_111 [1] : vector<2x2xf32> to vector<2xf32>
    %317 = vector.shape_cast %316 : vector<2xf32> to vector<2x1xf32>
    %318 = vector.broadcast %317 : vector<2x1xf32> to vector<2x2xf32>
    %319 = arith.subf %315, %318 : vector<2x2xf32>
    %320 = math.exp %319 : vector<2x2xf32>
    %cst_112 = arith.constant dense<0.000000e+00> : vector<2xf32>
    %321 = vector.multi_reduction <add>, %320, %cst_112 [1] : vector<2x2xf32> to vector<2xf32>
    %322 = vector.shape_cast %321 : vector<2xf32> to vector<2x1xf32>
    %323 = math.log %322 : vector<2x1xf32>
    %324 = arith.addf %317, %323 : vector<2x1xf32>
    %325 = tpu.iota {dimensions = array<i32: 0>} : vector<2x2xi32>
    %326 = tpu.iota {dimensions = array<i32: 1>} : vector<2x2xi32>
    %327 = arith.cmpi eq, %325, %326 : vector<2x2xi32>
    %328 = arith.extui %327 : vector<2x2xi1> to vector<2x2xi32>
    %329 = arith.sitofp %328 : vector<2x2xi32> to vector<2x2xf32>
    %330 = arith.mulf %315, %329 : vector<2x2xf32>
    %cst_113 = arith.constant dense<0.000000e+00> : vector<2xf32>
    %331 = vector.multi_reduction <add>, %330, %cst_113 [1] : vector<2x2xf32> to vector<2xf32>
    %332 = vector.shape_cast %331 : vector<2xf32> to vector<2x1xf32>
    %333 = arith.subf %324, %332 : vector<2x1xf32>
    %cst_114 = arith.constant dense<0.000000e+00> : vector<1xf32>
    %334 = vector.multi_reduction <add>, %333, %cst_114 [0] : vector<2x1xf32> to vector<1xf32>
    %335 = vector.shape_cast %334 : vector<1xf32> to vector<1x1xf32>
    %cst_115 = arith.constant 2.000000e+00 : f32
    %336 = vector.broadcast %cst_115 : f32 to vector<1x1xf32>
    %337 = arith.divf %335, %336 : vector<1x1xf32>
    %338 = arith.addf %297, %337 : vector<1x1xf32>
    %c0_116 = arith.constant 0 : index
    %c0_117 = arith.constant 0 : index
    %339 = vector.load %arg9[%c0_116, %c0_117] : memref<1x1xf32, #tpu.memory_space<vmem>>, vector<1x1xf32>
    tpu.vector_store %arg9[%c0_116, %c0_117], %338 {strides = array<i32>} : memref<1x1xf32, #tpu.memory_space<vmem>>, vector<1x1xf32>,
    return
  }
}

</mosaic_0001>

<bundles_post_ra>
// kernel: polyvore_forward.1
= control target key start
LH: loop header
LB: loop body
LE: loop exit
PB: predicated region body
PF: predicated region fallthrough
CT: control target
= control target key end

     0   :  { %15 = vsyncpa [#allocation4], 0  ;;  %s5760_s0 = inlined_call_operand.hbm [shape: f32[64,256], index: 0, kind: input, shape index: {}]   ;;  %s5761_s1 = inlined_call_operand.hbm [shape: f32[8,1], index: 1, kind: input, shape index: {}]   ;;  %s5762_s2 = inlined_call_operand.hbm [shape: f32[256,128], index: 2, kind: input, shape index: {}]   ;;  %s5763_s3 = inlined_call_operand.hbm [shape: f32[1,128], index: 3, kind: input, shape index: {}]   ;;  %s5764_s4 = inlined_call_operand.hbm [shape: f32[128,1024], index: 4, kind: input, shape index: {}]   ;;  %s5765_s5 = inlined_call_operand.hbm [shape: f32[1,1024], index: 5, kind: input, shape index: {}]   ;;  %s5766_s6 = inlined_call_operand.hbm [shape: f32[256,512], index: 6, kind: input, shape index: {}]   ;;  %s5767_s7 = inlined_call_operand.hbm [shape: f32[8,128], index: 7, kind: output, shape index: {0}]   ;;  %s5768_s8 = inlined_call_operand.hbm [shape: f32[8,128], index: 8, kind: output, shape index: {1}]   ;;  %s5769_s9 = inlined_call_operand.hbm [shape: f32[1,1], index: 9, kind: output, shape index: {2}]  }
   0x1   :  { %16 = vsyncpa [#allocation7], 0 }
   0x2   :  { %17 = vsyncpa [#allocation10], 0 }
   0x3   :  { %18 = vsyncpa [#allocation13], 0 }
   0x4   :  { %19 = vsyncpa [#allocation5], 0 }
   0x5   :  { %20 = vsyncpa [#allocation17], 0  ;;  %s4722_s30 = smov [#allocation6]   ;;  %s4723_s11 = smov [#allocation9]  }
   0x6   :  { %s39_s10 = sshll.u32 %s4722_s30, 4  ;;  %s61_s12 = sshll.u32 %s4723_s11, 4  ;;  %s40_s10 = int_to_ptr.vmem [resolvable:$true] %s39_s10  ;;  %s62_s12 = int_to_ptr.vmem [resolvable:$true] %s61_s12 }
   0x7   :  { %s4490_s15 = scalar_lea.hbm %s5761_s1, 128 }
   0x8   :  { %p4491_p0 = scmp.ne.s32.totalorder %s5761_s1, %s4490_s15  ;;  %p4494_p1 = scmp.lt.u32.totalorder %s4490_s15, %s5761_s1 }
   0xa   :  { %p4496_p2 = pnand %p4494_p1, %p4491_p0 }
   0xc   :  { %4499 = shalt.err (!%p4496_p2)
}
   0xd   :  { %s4500_s20 = scalar_lea.vmem %s40_s10, 128  ;;  %p4505_p4 = scmp.lt.s32.totalorder %s40_s10, %s40_s10 }
   0xe   :  { %p4501_p3 = scmp.ne.s32.totalorder %s40_s10, %s4500_s20  ;;  %p4506_p5 = scmp.lt.s32.totalorder %s4500_s20, %s4500_s20 }
  0x10   :  { %p4507_p6 = por %p4506_p5, %p4505_p4 }
  0x12   :  { %p4508_p7 = pnand %p4507_p6, %p4501_p3 }
  0x14   :  { %4511 = shalt.err (!%p4508_p7)
}
  0x15   :  { %42 = dma.hbm_to_vmem [thread:$0]  %s5761_s1, 128, %s40_s10, [#allocation7]  }
  0x16   :  { %s4512_s25 = scalar_lea.hbm %s5763_s3, 16 }
  0x17   :  { %p4513_p8 = scmp.ne.s32.totalorder %s5763_s3, %s4512_s25  ;;  %p4516_p9 = scmp.lt.u32.totalorder %s4512_s25, %s5763_s3 }
  0x19   :  { %p4518_p10 = pnand %p4516_p9, %p4513_p8 }
  0x1b   :  { %4521 = shalt.err (!%p4518_p10)
}
  0x1c   :  { %s4522_s30 = scalar_lea.vmem %s62_s12, 16  ;;  %s4526_s11 = scalar_lea.vmem %s62_s12, 32 }
  0x1d   :  { %p4523_p11 = scmp.ne.s32.totalorder %s62_s12, %s4522_s30  ;;  %p4527_p12 = scmp.lt.s32.totalorder %s62_s12, %s62_s12 }
  0x1e   :  { %p4528_p13 = scmp.lt.s32.totalorder %s4526_s11, %s4522_s30 }
  0x20   :  { %p4529_p0 = por %p4528_p13, %p4527_p12 }
  0x22   :  { %p4530_p1 = pnand %p4529_p0, %p4523_p11 }
  0x24   :  { %4533 = shalt.err (!%p4530_p1)
}
  0x25   :  { %64 = dma.hbm_to_vmem [thread:$0]  %s5763_s3, 16, %s62_s12, [#allocation10]  }
  0x26   :  { %s4724_s13 = smov [#allocation12]   ;;  %s4725_s15 = smov [#allocation3]  }
  0x27   :  { %s83_s14 = sshll.u32 %s4724_s13, 4  ;;  %s26_s16 = sshll.u32 %s4725_s15, 4  ;;  %s84_s14 = int_to_ptr.vmem [resolvable:$true] %s83_s14  ;;  %s4817_s16 = int_to_ptr.vmem [resolvable:$true] %s26_s16 }
  0x28   :  { %s4534_s19 = scalar_lea.hbm %s5765_s5, 128 }
  0x29   :  { %p4535_p2 = scmp.ne.s32.totalorder %s5765_s5, %s4534_s19  ;;  %p4538_p3 = scmp.lt.u32.totalorder %s4534_s19, %s5765_s5 }
  0x2b   :  { %p4540_p4 = pnand %p4538_p3, %p4535_p2 }
  0x2d   :  { %4543 = shalt.err (!%p4540_p4)
}
  0x2e   :  { %s4544_s3 = scalar_lea.vmem %s84_s14, 128  ;;  %p4549_p6 = scmp.lt.s32.totalorder %s84_s14, %s84_s14 }
  0x2f   :  { %p4545_p5 = scmp.ne.s32.totalorder %s84_s14, %s4544_s3  ;;  %p4550_p7 = scmp.lt.s32.totalorder %s4544_s3, %s4544_s3 }
  0x31   :  { %p4551_p8 = por %p4550_p7, %p4549_p6 }
  0x33   :  { %p4552_p9 = pnand %p4551_p8, %p4545_p5 }
  0x35   :  { %4555 = shalt.err (!%p4552_p9)
}
  0x36   :  { %86 = dma.hbm_to_vmem [thread:$0]  %s5765_s5, 128, %s84_s14, [#allocation13]  }
  0x37   :  { %s4556_s27 = scalar_lea.hbm %s5760_s0, 2048 }
  0x38   :  { %p4557_p10 = scmp.ne.s32.totalorder %s5760_s0, %s4556_s27  ;;  %p4560_p11 = scmp.lt.u32.totalorder %s4556_s27, %s5760_s0 }
  0x3a   :  { %p4562_p12 = pnand %p4560_p11, %p4557_p10 }
  0x3c   :  { %4565 = shalt.err (!%p4562_p12)
}
  0x3d   :  { %s4566_s1 = scalar_lea.vmem %s4817_s16, 2048  ;;  %p4571_p0 = scmp.lt.s32.totalorder %s4817_s16, %s4817_s16 }
  0x3e   :  { %p4567_p13 = scmp.ne.s32.totalorder %s4817_s16, %s4566_s1  ;;  %p4572_p1 = scmp.lt.s32.totalorder %s4566_s1, %s4566_s1 }
  0x40   :  { %p4573_p2 = por %p4572_p1, %p4571_p0 }
  0x42   :  { %p4574_p3 = pnand %p4573_p2, %p4567_p13 }
  0x44   :  { %4577 = shalt.err (!%p4574_p3)
}
  0x45   :  { %s4726_s5 = smov 256   ;;  %s4727_s10 = smov 16  }
  0x46   :  { %32 = dma.hbm_to_vmem [thread:$0]  %s5760_s0, 2048, %s4817_s16, [#allocation4], %s4726_s5, %s4726_s5, %s4727_s10  }
  0x47   :  { %s4728_s15 = smov [#allocation8]   ;;  %s4578_s20 = scalar_lea.hbm %s5762_s2, 4096 }
  0x48   :  { %s48_s17 = sshll.u32 %s4728_s15, 4  ;;  %p4579_p4 = scmp.ne.s32.totalorder %s5762_s2, %s4578_s20  ;;  %s49_s17 = int_to_ptr.vmem [resolvable:$true] %s48_s17 }
  0x49   :  { %p4582_p5 = scmp.lt.u32.totalorder %s4578_s20, %s5762_s2 }
  0x4b   :  { %p4584_p6 = pnand %p4582_p5, %p4579_p4 }
  0x4d   :  { %4587 = shalt.err (!%p4584_p6)
}
  0x4e   :  { %s4588_s12 = scalar_lea.vmem %s49_s17, 4096  ;;  %p4593_p8 = scmp.lt.s32.totalorder %s49_s17, %s49_s17 }
  0x4f   :  { %p4589_p7 = scmp.ne.s32.totalorder %s49_s17, %s4588_s12  ;;  %p4594_p9 = scmp.lt.s32.totalorder %s4588_s12, %s4588_s12 }
  0x51   :  { %p4595_p10 = por %p4594_p9, %p4593_p8 }
  0x53   :  { %p4596_p11 = pnand %p4595_p10, %p4589_p7 }
  0x55   :  { %4599 = shalt.err (!%p4596_p11)
}
  0x56   :  { %s4729_s0 = smov 128   ;;  %s4730_s16 = smov 8  }
  0x57   :  { %54 = dma.hbm_to_vmem [thread:$0]  %s5762_s2, 4096, %s49_s17, [#allocation7], %s4729_s0, %s4729_s0, %s4730_s16  }
  0x58   :  { %s4731_s26 = smov [#allocation11]   ;;  %s4600_s30 = scalar_lea.hbm %s5764_s4, 16384 }
  0x59   :  { %s70_s27 = sshll.u32 %s4731_s26, 4  ;;  %p4601_p12 = scmp.ne.s32.totalorder %s5764_s4, %s4600_s30  ;;  %s71_s27 = int_to_ptr.vmem [resolvable:$true] %s70_s27 }
  0x5a   :  { %p4604_p13 = scmp.lt.u32.totalorder %s4600_s30, %s5764_s4 }
  0x5c   :  { %p4606_p0 = pnand %p4604_p13, %p4601_p12 }
  0x5e   :  { %4609 = shalt.err (!%p4606_p0)
}
  0x5f   :  { %s4610_s13 = scalar_lea.vmem %s71_s27, 16384  ;;  %p4615_p2 = scmp.lt.s32.totalorder %s71_s27, %s71_s27 }
  0x60   :  { %p4611_p1 = scmp.ne.s32.totalorder %s71_s27, %s4610_s13  ;;  %p4616_p3 = scmp.lt.s32.totalorder %s4610_s13, %s4610_s13 }
  0x62   :  { %p4617_p4 = por %p4616_p3, %p4615_p2 }
  0x64   :  { %p4618_p5 = pnand %p4617_p4, %p4611_p1 }
  0x66   :  { %4621 = shalt.err (!%p4618_p5)
}
  0x67   :  { %s4732_s2 = smov 1024   ;;  %s4733_s14 = smov 64  }
  0x68   :  { %76 = dma.hbm_to_vmem [thread:$0]  %s5764_s4, 16384, %s71_s27, [#allocation10], %s4732_s2, %s4732_s2, %s4733_s14  }
  0x69   :  { %s4734_s18 = smov [#allocation14]   ;;  %s4622_s22 = scalar_lea.hbm %s5766_s6, 16384 }
  0x6a   :  { %s92_s19 = sshll.u32 %s4734_s18, 4  ;;  %p4623_p6 = scmp.ne.s32.totalorder %s5766_s6, %s4622_s22  ;;  %s93_s19 = int_to_ptr.vmem [resolvable:$true] %s92_s19 }
  0x6b   :  { %p4626_p7 = scmp.lt.u32.totalorder %s4622_s22, %s5766_s6 }
  0x6d   :  { %p4628_p8 = pnand %p4626_p7, %p4623_p6 }
  0x6f   :  { %4631 = shalt.err (!%p4628_p8)
}
  0x70   :  { %s4632_s16 = scalar_lea.vmem %s93_s19, 16384  ;;  %p4637_p10 = scmp.lt.s32.totalorder %s93_s19, %s93_s19 }
  0x71   :  { %p4633_p9 = scmp.ne.s32.totalorder %s93_s19, %s4632_s16  ;;  %p4638_p11 = scmp.lt.s32.totalorder %s4632_s16, %s4632_s16 }
  0x73   :  { %p4639_p12 = por %p4638_p11, %p4637_p10 }
  0x75   :  { %p4640_p13 = pnand %p4639_p12, %p4633_p9 }
  0x77   :  { %4643 = shalt.err (!%p4640_p13)
}
  0x78   :  { %s4735_s4 = smov 512   ;;  %s4736_s24 = smov 32  }
  0x79   :  { %98 = dma.hbm_to_vmem [thread:$0]  %s5766_s6, 16384, %s93_s19, [#allocation13], %s4735_s4, %s4735_s4, %s4736_s24  }
  0x7a   :  { %4710 = dma.done.wait [#allocation4], 2048  }
  0x7b   :  { %4711 = vsyncadd [#allocation4], 4294965248 }
  0x7c   :  { %4712 = dma.done.wait [#allocation7], 4224  }
  0x7d   :  { %4713 = vsyncadd [#allocation7], 4294963072 }
  0x7e   :  { %4714 = dma.done.wait [#allocation10], 16400  }
  0x7f   :  { %4715 = vsyncadd [#allocation10], 4294950896 }
  0x80   :  { %4716 = dma.done.wait [#allocation13], 16512  }
  0x81   :  { %4717 = vsyncadd [#allocation13], 4294950784  ;;  %v152_v0 = vld [vmem:[#allocation8 + $0x80] sm:$0xff]  ;;  %v153_v1 = vld [vmem:[#allocation8 + $0x88] sm:$0xff]  ;;  %vm2675_vm0 = vcmask 1041408   ;;  %vm4739_vm1 = vmmov 0  }
  0x82   :  { %v136_v2 = vld [vmem:[#allocation8] sm:$0xff]  ;;  %v3060_v3 = vpack.c.bf16 %v153_v1, %v152_v0  ;;  %v137_v4 = vld [vmem:[#allocation8 + $0x8] sm:$0xff]  ;;  %v154_v5 = vld [vmem:[#allocation8 + $0x90] sm:$0xff]  ;;  %vm2759_vm2 = vcmask 9216   ;;  %s4740_s6 = smov [#allocation16]   ;;  %s4741_s28 = smov [#allocation15]  }
  0x83   :  { %v155_v6 = vld [vmem:[#allocation8 + $0x98] sm:$0xff]  ;;  %v3062_v7 = vpack.c.bf16 %v137_v4, %v136_v2  ;;  %v138_v9 = vld [vmem:[#allocation8 + $0x10] sm:$0xff]  ;;  %v156_v11 = vld [vmem:[#allocation8 + $0xa0] sm:$0xff]  ;;  %s2917_s27 = sshll.u32 %s4740_s6, 4  ;;  %s2907_s29 = sshll.u32 %s4741_s28, 4  ;;  %s2918_s27 = int_to_ptr.vmem [resolvable:$true] %s2917_s27  ;;  %s2908_s29 = int_to_ptr.vmem [resolvable:$true] %s2907_s29 }
  0x84   :  { %v3064_v8 = vpack.c.bf16 %v155_v6, %v154_v5  ;;  %v139_v10 = vld [vmem:[#allocation8 + $0x18] sm:$0xff]  ;;  %3061 = vmatprep.subr.bf16.mxu0 %v3060_v3  ;;  %v157_v12 = vld [vmem:[#allocation8 + $0xa8] sm:$0xff]  ;;  %v140_v15 = vld [vmem:[#allocation8 + $0x20] sm:$0xff]  ;;  %s4644_s30 = scalar_lea.vmem %s2918_s27, 128  ;;  %p4649_p1 = scmp.lt.s32.totalorder %s2918_s27, %s2918_s27 }
  0x85   :  { %3063 = vmatpush3.bf16.msra.mxu0 %v3062_v7  ;;  %v3066_v13 = vpack.c.bf16 %v139_v10, %v138_v9  ;;  %v3068_v14 = vpack.c.bf16 %v157_v12, %v156_v11  ;;  %v141_v16 = vld [vmem:[#allocation8 + $0x28] sm:$0xff]  ;;  %v158_v17 = vld [vmem:[#allocation8 + $0xb0] sm:$0xff]  ;;  %v159_v18 = vld [vmem:[#allocation8 + $0xb8] sm:$0xff]  ;;  %p4645_p0 = scmp.ne.s32.totalorder %s2918_s27, %s4644_s30  ;;  %p4650_p2 = scmp.lt.s32.totalorder %s4644_s30, %s4644_s30 }
  0x86   :  { %3065 = vmatprep.subr.bf16.mxu0 %v3064_v8  ;;  %v3070_v19 = vpack.c.bf16 %v141_v16, %v140_v15  ;;  %v3072_v20 = vpack.c.bf16 %v159_v18, %v158_v17  ;;  %v142_v21 = vld [vmem:[#allocation8 + $0x30] sm:$0xff]  ;;  %v143_v22 = vld [vmem:[#allocation8 + $0x38] sm:$0xff]  ;;  %v160_v23 = vld [vmem:[#allocation8 + $0xc0] sm:$0xff] }
  0x87   :  { %v161_v24 = vld [vmem:[#allocation8 + $0xc8] sm:$0xff]  ;;  %v121_v25 = vld [vmem:[#allocation3 + $0x8] sm:$0xff]  ;;  %v3074_v26 = vpack.c.bf16 %v143_v22, %v142_v21  ;;  %v162_v30 = vld [vmem:[#allocation8 + $0xd0] sm:$0xff]  ;;  %p4651_p3 = por %p4650_p2, %p4649_p1 }
  0x88   :  { %239 = vmatprep.mubr.f32.mxu0 %v121_v25  ;;  %v3076_v27 = vpack.c.bf16 %v161_v24, %v160_v23  ;;  %v144_v28 = vld [vmem:[#allocation8 + $0x40] sm:$0xff]  ;;  %v145_v29 = vld [vmem:[#allocation8 + $0x48] sm:$0xff]  ;;  %v163_v31 = vld [vmem:[#allocation8 + $0xd8] sm:$0xff] }
  0x89   :  { %3067 = vmatpush3.bf16.msra.mxu0 %v3066_v13  ;;  %v3078_v32 = vpack.c.bf16 %v145_v29, %v144_v28  ;;  %v146_v33 = vld [vmem:[#allocation8 + $0x50] sm:$0xff]  ;;  %v3080_v36 = vpack.c.bf16 %v163_v31, %v162_v30  ;;  %v147_v37 = vld [vmem:[#allocation8 + $0x58] sm:$0xff]  ;;  %v280_v39 = vld [vmem:[#allocation11] sm:$0xff]  ;;  %p4652_p4 = pnand %p4651_p3, %p4645_p0 }
  0x8a   :  { %3069 = vmatprep.subr.bf16.mxu0 %v3068_v14  ;;  %v281_v34 = vld [vmem:[#allocation11 + $0x8] sm:$0xff]  ;;  %v288_v40 = vld [vmem:[#allocation11 + $0x40] sm:$0xff]  ;;  %v3082_v46 = vpack.c.bf16 %v147_v37, %v146_v33  ;;  %v167_v57 = vld [vmem:[#allocation8 + $0xf8] sm:$0xff] }
  0x8b   :  { %v289_v35 = vld [vmem:[#allocation11 + $0x48] sm:$0xff]  ;;  %v164_v41 = vld [vmem:[#allocation8 + $0xe0] sm:$0xff]  ;;  %v3094_v43 = vpack.c.bf16 %v288_v40, %v280_v39  ;;  %v151_v3 = vld [vmem:[#allocation8 + $0x78] sm:$0xff] }
  0x8c   :  { %v3092_v38 = vpack.c.bf16 %v289_v35, %v281_v34  ;;  %v165_v42 = vld [vmem:[#allocation8 + $0xe8] sm:$0xff]  ;;  %v148_v47 = vld [vmem:[#allocation8 + $0x60] sm:$0xff]  ;;  %v166_v56 = vld [vmem:[#allocation8 + $0xf0] sm:$0xff] }
  0x8d   :  { %3071 = vmatpush3.bf16.msra.mxu0 %v3070_v19  ;;  %v297_v44 = vld [vmem:[#allocation11 + $0x88] sm:$0xff]  ;;  %v296_v49 = vld [vmem:[#allocation11 + $0x80] sm:$0xff]  ;;  %v3084_v51 = vpack.c.bf16 %v165_v42, %v164_v41  ;;  %v3088_v2 = vpack.c.bf16 %v167_v57, %v166_v56  ;;  %v283_v7 = vld [vmem:[#allocation11 + $0x18] sm:$0xff] }
  0x8e   :  { %3073 = vmatprep.subr.bf16.mxu0 %v3072_v20  ;;  %3093 = vmatprep.subr.bf16.mxu1 %v3092_v38  ;;  %v305_v45 = vld [vmem:[#allocation11 + $0xc8] sm:$0xff]  ;;  %v304_v50 = vld [vmem:[#allocation11 + $0xc0] sm:$0xff]  ;;  %v291_v8 = vld [vmem:[#allocation11 + $0x58] sm:$0xff] }
  0x8f   :  { %3095 = vmatpush1.bf16.msra.mxu1 %v3094_v43  ;;  %v3096_v48 = vpack.c.bf16 %v305_v45, %v297_v44  ;;  %v149_v52 = vld [vmem:[#allocation8 + $0x68] sm:$0xff]  ;;  %v3098_v53 = vpack.c.bf16 %v304_v50, %v296_v49  ;;  %v150_v62 = vld [vmem:[#allocation8 + $0x70] sm:$0xff]  ;;  %v3124_v13 = vpack.c.bf16 %v291_v8, %v283_v7  ;;  %v299_v16 = vld [vmem:[#allocation11 + $0x98] sm:$0xff] }
  0x90   :  { %v313_v54 = vld [vmem:[#allocation11 + $0x108] sm:$0xff]  ;;  %v312_v59 = vld [vmem:[#allocation11 + $0x100] sm:$0xff]  ;;  %v3086_v61 = vpack.c.bf16 %v149_v52, %v148_v47  ;;  %v3090_v11 = vpack.c.bf16 %v151_v3, %v150_v62  ;;  %v282_v14 = vld [vmem:[#allocation11 + $0x10] sm:$0xff] }
  0x91   :  { %3075 = vmatpush3.bf16.msra.mxu0 %v3074_v26  ;;  %v321_v55 = vld [vmem:[#allocation11 + $0x148] sm:$0xff]  ;;  %3097 = vmatprep.subr.bf16.mxu1 %v3096_v48  ;;  %v320_v60 = vld [vmem:[#allocation11 + $0x140] sm:$0xff]  ;;  %v290_v15 = vld [vmem:[#allocation11 + $0x50] sm:$0xff] }
  0x92   :  { %3077 = vmatprep.subr.bf16.mxu0 %v3076_v27  ;;  %v3100_v58 = vpack.c.bf16 %v321_v55, %v313_v54  ;;  %v3102_v63 = vpack.c.bf16 %v320_v60, %v312_v59  ;;  %v329_v0 = vld [vmem:[#allocation11 + $0x188] sm:$0xff]  ;;  %v328_v5 = vld [vmem:[#allocation11 + $0x180] sm:$0xff]  ;;  %v307_v18 = vld [vmem:[#allocation11 + $0xd8] sm:$0xff]  ;;  %v3126_v25 = vpack.c.bf16 %v290_v15, %v282_v14 }
  0x93   :  { %3099 = vmatpush1.bf16.msra.mxu1 %v3098_v53  ;;  %v337_v1 = vld [vmem:[#allocation11 + $0x1c8] sm:$0xff]  ;;  %v336_v6 = vld [vmem:[#allocation11 + $0x1c0] sm:$0xff]  ;;  %v120_v23 = vld [vmem:[#allocation3] sm:$0xff]  ;;  %v3128_v26 = vpack.c.bf16 %v307_v18, %v299_v16 }
  0x94   :  { %3101 = vmatprep.subr.bf16.mxu1 %v3100_v58  ;;  %v3104_v4 = vpack.c.bf16 %v337_v1, %v329_v0  ;;  %v345_v9 = vld [vmem:[#allocation11 + $0x208] sm:$0xff]  ;;  %v3106_v12 = vpack.c.bf16 %v336_v6, %v328_v5  ;;  %v344_v19 = vld [vmem:[#allocation11 + $0x200] sm:$0xff]  ;;  %v298_v27 = vld [vmem:[#allocation11 + $0x90] sm:$0xff] }
  0x95   :  { %3079 = vmatpush3.bf16.msra.mxu0 %v3078_v32  ;;  %v353_v10 = vld [vmem:[#allocation11 + $0x248] sm:$0xff]  ;;  %v352_v20 = vld [vmem:[#allocation11 + $0x240] sm:$0xff]  ;;  %v306_v28 = vld [vmem:[#allocation11 + $0xd0] sm:$0xff] }
  0x96   :  { %3081 = vmatprep.subr.bf16.mxu0 %v3080_v36  ;;  %v3108_v17 = vpack.c.bf16 %v353_v10, %v345_v9  ;;  %v361_v21 = vld [vmem:[#allocation11 + $0x288] sm:$0xff]  ;;  %v315_v29 = vld [vmem:[#allocation11 + $0x118] sm:$0xff]  ;;  %v3110_v30 = vpack.c.bf16 %v352_v20, %v344_v19  ;;  %v360_v33 = vld [vmem:[#allocation11 + $0x280] sm:$0xff]  ;;  %v3130_v39 = vpack.c.bf16 %v306_v28, %v298_v27 }
  0x97   :  { %3103 = vmatpush1.bf16.msra.mxu1 %v3102_v63  ;;  %v369_v22 = vld [vmem:[#allocation11 + $0x2c8] sm:$0xff]  ;;  %v323_v31 = vld [vmem:[#allocation11 + $0x158] sm:$0xff]  ;;  %v368_v34 = vld [vmem:[#allocation11 + $0x2c0] sm:$0xff] }
  0x98   :  { %3105 = vmatprep.subr.bf16.mxu1 %v3104_v4  ;;  %v123_v24 = vld [vmem:[#allocation3 + $0x18] sm:$0xff]  ;;  %v3112_v32 = vpack.c.bf16 %v369_v22, %v361_v21  ;;  %v122_v37 = vld [vmem:[#allocation3 + $0x10] sm:$0xff]  ;;  %v125_v38 = vld [vmem:[#allocation3 + $0x28] sm:$0xff]  ;;  %v3132_v40 = vpack.c.bf16 %v323_v31, %v315_v29  ;;  %v3114_v44 = vpack.c.bf16 %v368_v34, %v360_v33 }
  0x99   :  { %3083 = vmatpush3.bf16.msra.mxu0 %v3082_v46  ;;  %v377_v35 = vld [vmem:[#allocation11 + $0x308] sm:$0xff]  ;;  %v314_v41 = vld [vmem:[#allocation11 + $0x110] sm:$0xff]  ;;  %v331_v43 = vld [vmem:[#allocation11 + $0x198] sm:$0xff] }
  0x9a   :  { %3085 = vmatprep.subr.bf16.mxu0 %v3084_v51  ;;  %v385_v36 = vld [vmem:[#allocation11 + $0x348] sm:$0xff]  ;;  %v322_v42 = vld [vmem:[#allocation11 + $0x150] sm:$0xff]  ;;  %v339_v45 = vld [vmem:[#allocation11 + $0x1d8] sm:$0xff] }
  0x9b   :  { %3107 = vmatpush1.bf16.msra.mxu1 %v3106_v12  ;;  %v3116_v46 = vpack.c.bf16 %v385_v36, %v377_v35  ;;  %v376_v47 = vld [vmem:[#allocation11 + $0x300] sm:$0xff]  ;;  %v124_v49 = vld [vmem:[#allocation3 + $0x20] sm:$0xff]  ;;  %v3134_v50 = vpack.c.bf16 %v322_v42, %v314_v41  ;;  %v127_v51 = vld [vmem:[#allocation3 + $0x38] sm:$0xff]  ;;  %v3136_v52 = vpack.c.bf16 %v339_v45, %v331_v43 }
  0x9c   :  { %3109 = vmatprep.subr.bf16.mxu1 %v3108_v17  ;;  %v384_v48 = vld [vmem:[#allocation11 + $0x340] sm:$0xff]  ;;  %v330_v53 = vld [vmem:[#allocation11 + $0x190] sm:$0xff]  ;;  %v347_v56 = vld [vmem:[#allocation11 + $0x218] sm:$0xff] }
  0x9d   :  { %3087 = vmatpush3.bf16.msra.mxu0 %v3086_v61  ;;  %v338_v54 = vld [vmem:[#allocation11 + $0x1d0] sm:$0xff]  ;;  %v3118_v55 = vpack.c.bf16 %v384_v48, %v376_v47  ;;  %v355_v57 = vld [vmem:[#allocation11 + $0x258] sm:$0xff]  ;;  %v126_v58 = vld [vmem:[#allocation3 + $0x30] sm:$0xff] }
  0x9e   :  { %3089 = vmatprep.subr.bf16.mxu0 %v3088_v2  ;;  %v3138_v59 = vpack.c.bf16 %v338_v54, %v330_v53  ;;  %v129_v60 = vld [vmem:[#allocation3 + $0x48] sm:$0xff]  ;;  %v3140_v61 = vpack.c.bf16 %v355_v57, %v347_v56  ;;  %v346_v62 = vld [vmem:[#allocation11 + $0x210] sm:$0xff]  ;;  %v130_v10 = vld [vmem:[#allocation3 + $0x50] sm:$0xff] }
  0x9f   :  { %3111 = vmatpush1.bf16.msra.mxu1 %v3110_v30  ;;  %v354_v63 = vld [vmem:[#allocation11 + $0x250] sm:$0xff]  ;;  %v363_v0 = vld [vmem:[#allocation11 + $0x298] sm:$0xff]  ;;  %v134_v19 = vld [vmem:[#allocation3 + $0x70] sm:$0xff] }
  0xa0   :  { %3113 = vmatprep.subr.bf16.mxu1 %v3112_v32  ;;  %v371_v1 = vld [vmem:[#allocation11 + $0x2d8] sm:$0xff]  ;;  %v3142_v3 = vpack.c.bf16 %v354_v63, %v346_v62  ;;  %v131_v4 = vld [vmem:[#allocation3 + $0x58] sm:$0xff]  ;;  %v284_v41 = vld [vmem:[#allocation11 + $0x20] sm:$0xff] }
  0xa1   :  { %3091 = vmatpush3.bf16.msra.mxu0 %v3090_v11  ;;  %v128_v2 = vld [vmem:[#allocation3 + $0x40] sm:$0xff]  ;;  %v3144_v5 = vpack.c.bf16 %v371_v1, %v363_v0  ;;  %v133_v12 = vld [vmem:[#allocation3 + $0x68] sm:$0xff]  ;;  %v135_v18 = vld [vmem:[#allocation3 + $0x78] sm:$0xff] }
  0xa2   :  { %3125 = vmatprep.subr.bf16.mxu0 %v3124_v13  ;;  %v362_v6 = vld [vmem:[#allocation11 + $0x290] sm:$0xff]  ;;  %v379_v8 = vld [vmem:[#allocation11 + $0x318] sm:$0xff]  ;;  %v393_v20 = vld [vmem:[#allocation11 + $0x388] sm:$0xff] }
  0xa3   :  { %3115 = vmatpush1.bf16.msra.mxu1 %v3114_v44  ;;  %v370_v7 = vld [vmem:[#allocation11 + $0x2d0] sm:$0xff]  ;;  %v387_v9 = vld [vmem:[#allocation11 + $0x358] sm:$0xff]  ;;  %v401_v21 = vld [vmem:[#allocation11 + $0x3c8] sm:$0xff] }
  0xa4   :  { %240 = vmatmul.mubr.f32.vlgmr.msra.gmra.mrb[0].mxu0 %v120_v23  ;;  %3117 = vmatprep.subr.bf16.mxu1 %v3116_v46  ;;  %v3146_v11 = vpack.c.bf16 %v370_v7, %v362_v6  ;;  %v3148_v13 = vpack.c.bf16 %v387_v9, %v379_v8  ;;  %v378_v14 = vld [vmem:[#allocation11 + $0x310] sm:$0xff]  ;;  %v395_v22 = vld [vmem:[#allocation11 + $0x398] sm:$0xff]  ;;  %v3120_v23 = vpack.c.bf16 %v401_v21, %v393_v20  ;;  %v285_v32 = vld [vmem:[#allocation11 + $0x28] sm:$0xff] }
  0xa5   :  { %244 = vmatprep.mubr.f32.mxu0 %v123_v24  ;;  %3127 = vmatpush1.bf16.msra.mxu0 %v3126_v25  ;;  %v386_v15 = vld [vmem:[#allocation11 + $0x350] sm:$0xff]  ;;  %v403_v24 = vld [vmem:[#allocation11 + $0x3d8] sm:$0xff]  ;;  %v392_v25 = vld [vmem:[#allocation11 + $0x380] sm:$0xff] }
  0xa6   :  { %3129 = vmatprep.subr.bf16.mxu0 %v3128_v26  ;;  %v132_v16 = vld [vmem:[#allocation3 + $0x60] sm:$0xff]  ;;  %v3150_v17 = vpack.c.bf16 %v386_v15, %v378_v14  ;;  %v400_v26 = vld [vmem:[#allocation11 + $0x3c0] sm:$0xff]  ;;  %v3152_v27 = vpack.c.bf16 %v403_v24, %v395_v22  ;;  %v293_v33 = vld [vmem:[#allocation11 + $0x68] sm:$0xff] }
  0xa7   :  { %3119 = vmatpush1.bf16.msra.mxu1 %v3118_v55  ;;  %v3122_v28 = vpack.c.bf16 %v400_v26, %v392_v25  ;;  %v394_v29 = vld [vmem:[#allocation11 + $0x390] sm:$0xff]  ;;  %v287_v34 = vld [vmem:[#allocation11 + $0x38] sm:$0xff]  ;;  %v3156_v35 = vpack.c.bf16 %v293_v33, %v285_v32  ;;  %v292_v43 = vld [vmem:[#allocation11 + $0x60] sm:$0xff] }
  0xa8   :  { %245 = vmatmul.mubr.f32.gmra.mrb[2].mxu0 %v122_v37  ;;  %v402_v30 = vld [vmem:[#allocation11 + $0x3d0] sm:$0xff]  ;;  %3121 = vmatprep.subr.bf16.mxu1 %v3120_v23  ;;  %v295_v36 = vld [vmem:[#allocation11 + $0x78] sm:$0xff]  ;;  %v300_v57 = vld [vmem:[#allocation11 + $0xa0] sm:$0xff] }
  0xa9   :  { %249 = vmatprep.mubr.f32.mxu0 %v125_v38  ;;  %3131 = vmatpush1.bf16.msra.mxu0 %v3130_v39  ;;  %v3154_v31 = vpack.c.bf16 %v402_v30, %v394_v29  ;;  %v3188_v37 = vpack.c.bf16 %v295_v36, %v287_v34  ;;  %v4737_v38 = vmov 0   ;;  %v5770_v39 = vmov 0.0   ;;  %v286_v44 = vld [vmem:[#allocation11 + $0x30] sm:$0xff]  ;;  %v4886_v46 = vld [vmem:[#allocation9] ss:$0 sm:$0xff]  ;;  %v341_v20 = vld [vmem:[#allocation11 + $0x1e8] sm:$0xff] }
  0xaa   :  { %3133 = vmatprep.subr.bf16.mxu0 %v3132_v40  ;;  %4249 = vset.pattern.permute.xlu0 %v4737_v38  ;;  %v2664_v40 = vld [vmem:[#allocation6] sm:$0xff]  ;;  %v357_v36 = vld [vmem:[#allocation11 + $0x268] sm:$0xff] }
  0xab   :  { %3123 = vmatpush1.bf16.msra.mxu1 %v3122_v28  ;;  %514 = vmatprep.mubr.f32.mxu1 %v5770_v39  ;;  %v294_v45 = vld [vmem:[#allocation11 + $0x70] sm:$0xff]  ;;  %v303_v53 = vld [vmem:[#allocation11 + $0xb8] sm:$0xff]  ;;  %v340_v28 = vld [vmem:[#allocation11 + $0x1e0] sm:$0xff] }
  0xac   :  { %250 = vmatmul.mubr.f32.gmra.mrb[4].mxu0 %v124_v49  ;;  %3157 = vmatprep.subr.bf16.mxu1 %v3156_v35  ;;  %v301_v49 = vld [vmem:[#allocation11 + $0xa8] sm:$0xff]  ;;  %v311_v54 = vld [vmem:[#allocation11 + $0xf8] sm:$0xff]  ;;  %v310_v62 = vld [vmem:[#allocation11 + $0xf0] sm:$0xff] }
  0xad   :  { %254 = vmatprep.mubr.f32.mxu0 %v127_v51  ;;  %3135 = vmatpush1.bf16.msra.mxu0 %v3134_v50  ;;  %v309_v50 = vld [vmem:[#allocation11 + $0xe8] sm:$0xff]  ;;  %v3158_v51 = vpack.c.bf16 %v292_v43, %v284_v41  ;;  %v3192_v1 = vpack.c.bf16 %v311_v54, %v303_v53  ;;  %v327_v6 = vld [vmem:[#allocation11 + $0x178] sm:$0xff]  ;;  %v318_v15 = vld [vmem:[#allocation11 + $0x130] sm:$0xff] }
  0xae   :  { %3137 = vmatprep.subr.bf16.mxu0 %v3136_v52  ;;  %2667 = vperm.xlu0 %4249, %v2664_v40   ;;  %v3190_v52 = vpack.c.bf16 %v294_v45, %v286_v44  ;;  %v335_v22 = vld [vmem:[#allocation11 + $0x1b8] sm:$0xff]  ;;  %v342_v32 = vld [vmem:[#allocation11 + $0x1f0] sm:$0xff]  ;;  %v349_v35 = vld [vmem:[#allocation11 + $0x228] sm:$0xff] }
  0xaf   :  { %v343_v23 = vld [vmem:[#allocation11 + $0x1f8] sm:$0xff]  ;;  %v348_v44 = vld [vmem:[#allocation11 + $0x220] sm:$0xff]  ;;  %v365_v53 = vld [vmem:[#allocation11 + $0x2a8] sm:$0xff] }
  0xb0   :  { %255 = vmatmul.mubr.f32.gmra.mrb[6].mxu0 %v126_v58  ;;  %v308_v58 = vld [vmem:[#allocation11 + $0xe0] sm:$0xff]  ;;  %v3200_v34 = vpack.c.bf16 %v343_v23, %v335_v22  ;;  %v351_v38 = vld [vmem:[#allocation11 + $0x238] sm:$0xff]  ;;  %v373_v54 = vld [vmem:[#allocation11 + $0x2e8] sm:$0xff] }
  0xb1   :  { %259 = vmatprep.mubr.f32.mxu0 %v129_v60  ;;  %3139 = vmatpush1.bf16.msra.mxu0 %v3138_v59  ;;  %v3160_v60 = vpack.c.bf16 %v309_v50, %v301_v49  ;;  %v359_v40 = vld [vmem:[#allocation11 + $0x278] sm:$0xff]  ;;  %v356_v45 = vld [vmem:[#allocation11 + $0x260] sm:$0xff]  ;;  %v350_v49 = vld [vmem:[#allocation11 + $0x230] sm:$0xff] }
  0xb2   :  { %3141 = vmatprep.subr.bf16.mxu0 %v3140_v61  ;;  %v302_v61 = vld [vmem:[#allocation11 + $0xb0] sm:$0xff]  ;;  %v397_v23 = vld [vmem:[#allocation11 + $0x3a8] sm:$0xff] }
  0xb3   :  { %v358_v50 = vld [vmem:[#allocation11 + $0x270] sm:$0xff] }
  0xb4   :  { %260 = vmatmul.mubr.f32.gmra.mrb[8].mxu0 %v128_v2  ;;  %v317_v2 = vld [vmem:[#allocation11 + $0x128] sm:$0xff] }
  0xb5   :  { %264 = vmatprep.mubr.f32.mxu0 %v131_v4  ;;  %3143 = vmatpush1.bf16.msra.mxu0 %v3142_v3  ;;  %v325_v3 = vld [vmem:[#allocation11 + $0x168] sm:$0xff]  ;;  %v3162_v4 = vpack.c.bf16 %v308_v58, %v300_v57  ;;  %v367_v57 = vld [vmem:[#allocation11 + $0x2b8] sm:$0xff] }
  0xb6   :  { %3145 = vmatprep.subr.bf16.mxu0 %v3144_v5  ;;  %v319_v5 = vld [vmem:[#allocation11 + $0x138] sm:$0xff]  ;;  %v3164_v14 = vpack.c.bf16 %v325_v3, %v317_v2  ;;  %v366_v2 = vld [vmem:[#allocation11 + $0x2b0] sm:$0xff] }
  0xb7   :  { %v375_v58 = vld [vmem:[#allocation11 + $0x2f8] sm:$0xff]  ;;  %v374_v3 = vld [vmem:[#allocation11 + $0x2f0] sm:$0xff] }
  0xb8   :  { %265 = vmatmul.mubr.f32.gmra.mrb[10].mxu0 %v130_v10  ;;  %v3194_v10 = vpack.c.bf16 %v310_v62, %v302_v61  ;;  %v3206_v61 = vpack.c.bf16 %v358_v50, %v350_v49  ;;  %v364_v62 = vld [vmem:[#allocation11 + $0x2a0] sm:$0xff]  ;;  %v994_v50 = vld [vmem:[#allocation14] sm:$0xff] }
  0xb9   :  { %269 = vmatprep.mubr.f32.mxu0 %v133_v12  ;;  %3147 = vmatpush1.bf16.msra.mxu0 %v3146_v11  ;;  %v316_v11 = vld [vmem:[#allocation11 + $0x120] sm:$0xff] }
  0xba   :  { %3149 = vmatprep.subr.bf16.mxu0 %v3148_v13  ;;  %v324_v12 = vld [vmem:[#allocation11 + $0x160] sm:$0xff] }
  0xbb   :  { %v3166_v21 = vpack.c.bf16 %v324_v12, %v316_v11  ;;  %v391_v11 = vld [vmem:[#allocation11 + $0x378] sm:$0xff] }
  0xbc   :  { %270 = vmatmul.mubr.f32.gmra.mrb[12].mxu0 %v132_v16  ;;  %v326_v16 = vld [vmem:[#allocation11 + $0x170] sm:$0xff] }
  0xbd   :  { %274 = vmatprep.mubr.f32.mxu0 %v135_v18  ;;  %3151 = vmatpush1.bf16.msra.mxu0 %v3150_v17  ;;  %v3196_v18 = vpack.c.bf16 %v327_v6, %v319_v5  ;;  %v3198_v26 = vpack.c.bf16 %v326_v16, %v318_v15  ;;  %v3208_v5 = vpack.c.bf16 %v375_v58, %v367_v57  ;;  %v381_v6 = vld [vmem:[#allocation11 + $0x328] sm:$0xff]  ;;  %v380_v15 = vld [vmem:[#allocation11 + $0x320] sm:$0xff]  ;;  %v1003_v57 = vld [vmem:[#allocation14 + $0x48] sm:$0xff] }
  0xbe   :  { %3153 = vmatprep.subr.bf16.mxu0 %v3152_v27  ;;  %v332_v27 = vld [vmem:[#allocation11 + $0x1a0] sm:$0xff]  ;;  %v1007_v58 = vld [vmem:[#allocation14 + $0x68] sm:$0xff] }
  0xbf   :  { %v388_v16 = vld [vmem:[#allocation11 + $0x360] sm:$0xff] }
  0xc0   :  { %275 = vmatmul.mubr.f32.gmra.mrb[14].mxu0 %v134_v19  ;;  %v333_v19 = vld [vmem:[#allocation11 + $0x1a8] sm:$0xff] }
  0xc1   :  { %3155 = vmatpush1.bf16.msra.mxu0 %v3154_v31  ;;  %625 = vmatprep.mubr.f32.mxu0 %v5770_v39  ;;  %v3168_v30 = vpack.c.bf16 %v341_v20, %v333_v19  ;;  %v334_v31 = vld [vmem:[#allocation11 + $0x1b0] sm:$0xff] }
  0xc2   :  { %3189 = vmatprep.subr.bf16.mxu0 %v3188_v37  ;;  %v3170_v37 = vpack.c.bf16 %v340_v28, %v332_v27  ;;  %v3202_v43 = vpack.c.bf16 %v342_v32, %v334_v31  ;;  %v382_v19 = vld [vmem:[#allocation11 + $0x330] sm:$0xff]  ;;  %v399_v27 = vld [vmem:[#allocation11 + $0x3b8] sm:$0xff]  ;;  %v396_v32 = vld [vmem:[#allocation11 + $0x3a0] sm:$0xff] }
  0xc3   :  { %v390_v20 = vld [vmem:[#allocation11 + $0x370] sm:$0xff]  ;;  %v407_v28 = vld [vmem:[#allocation11 + $0x3f8] sm:$0xff] }
  0xc4   :  { %v3214_v31 = vpack.c.bf16 %v390_v20, %v382_v19 }
 0x177   :  { %v3022_v42 = vpop.f32.mrb[0].mxu0 }
 0x178   :  { %v3023_v47 = vpop.f32.mrb[1].mxu0 }
 0x179   :  { %v3024_v48 = vadd.f32 %v3023_v47, %v3022_v42 }
 0x17b   :  { %v4889_v55 = vadd.f32 %v3024_v48, %v4886_v46  ;;  %v3025_v56 = vpop.f32.mrb[2].mxu0  ;;  %v3172_v48 = vpack.c.bf16 %v357_v36, %v349_v35  ;;  %v398_v36 = vld [vmem:[#allocation11 + $0x3b0] sm:$0xff] }
 0x17c   :  { %v3026_v59 = vpop.f32.mrb[3].mxu0 }
 0x17d   :  { %5836 = vst [vmem:[#allocation25_spill] sm:$0xff] %v4889_v55  ;;  %v3027_v63 = vadd.f32 %v3026_v59, %v3025_v56  ;;  %515 = vmatmul.mubr.f32.vlgmr.msra.gmra.mrb[0].mxu1 %v4889_v55  ;;  %626 = vmatmul.mubr.f32.vlgmr.msra.gmra.mrb[16].mxu0 %v4889_v55  ;;  %v2796_v0 = vmul.f32 %v4889_v55, %v4889_v55 }
 0x17e   :  { %3159 = vmatpush1.bf16.msra.mxu1 %v3158_v51  ;;  %3191 = vmatpush1.bf16.msra.mxu0 %v3190_v52  ;;  %v3204_v52 = vpack.c.bf16 %v359_v40, %v351_v38  ;;  %v3174_v56 = vpack.c.bf16 %v356_v45, %v348_v44  ;;  %v3216_v40 = vpack.c.bf16 %v407_v28, %v399_v27  ;;  %v999_v44 = vld [vmem:[#allocation14 + $0x28] sm:$0xff]  ;;  %v997_v45 = vld [vmem:[#allocation14 + $0x18] sm:$0xff]  ;;  %v1018_v28 = vld [vmem:[#allocation14 + $0xc0] sm:$0xff] }
 0x17f   :  { %v4896_v7 = vadd.f32 %v3027_v63, %v4886_v46  ;;  %v3028_v8 = vpop.f32.mrb[4].mxu0  ;;  %v2797_v9 = vsel %vm2675_vm0, %v2796_v0, 0.0  ;;  %520 = vmatprep.mubr.f32.mxu1 %v5770_v39  ;;  %631 = vmatprep.mubr.f32.mxu0 %v5770_v39  ;;  %v372_v63 = vld [vmem:[#allocation11 + $0x2e0] sm:$0xff] }
 0x180   :  { %v3029_v13 = vpop.f32.mrb[5].mxu0  ;;  %2798 = vadd.xlane.f32.xlu1 %v2797_v9  ;;  %3161 = vmatprep.subr.bf16.mxu1 %v3160_v60  ;;  %v3178_v9 = vpack.c.bf16 %v372_v63, %v364_v62 }
 0x181   :  { %v3030_v17 = vadd.f32 %v3029_v13, %v3028_v8  ;;  %3193 = vmatprep.subr.bf16.mxu0 %v3192_v1  ;;  %521 = vmatmul.mubr.f32.gmra.mrb[2].mxu1 %v4896_v7  ;;  %v3176_v1 = vpack.c.bf16 %v373_v54, %v365_v53  ;;  %v389_v8 = vld [vmem:[#allocation11 + $0x368] sm:$0xff]  ;;  %v1000_v53 = vld [vmem:[#allocation14 + $0x30] sm:$0xff] }
 0x182   :  { %632 = vmatmul.mubr.f32.gmra.mrb[18].mxu0 %v4896_v7  ;;  %3163 = vmatpush1.bf16.msra.mxu1 %v3162_v4 }
 0x183   :  { %v4904_v24 = vadd.f32 %v3030_v17, %v4886_v46  ;;  %3195 = vmatpush1.bf16.msra.mxu0 %v3194_v10  ;;  %v3031_v25 = vpop.f32.mrb[6].mxu0  ;;  %526 = vmatprep.mubr.f32.mxu1 %v5770_v39  ;;  %v383_v10 = vld [vmem:[#allocation11 + $0x338] sm:$0xff] }
 0x184   :  { %v3032_v29 = vpop.f32.mrb[7].mxu0  ;;  %637 = vmatprep.mubr.f32.mxu0 %v5770_v39  ;;  %3165 = vmatprep.subr.bf16.mxu1 %v3164_v14  ;;  %v3210_v14 = vpack.c.bf16 %v374_v3, %v366_v2  ;;  %v3212_v22 = vpack.c.bf16 %v391_v11, %v383_v10  ;;  %v1006_v2 = vld [vmem:[#allocation14 + $0x60] sm:$0xff]  ;;  %v1004_v3 = vld [vmem:[#allocation14 + $0x50] sm:$0xff]  ;;  %v1013_v10 = vld [vmem:[#allocation14 + $0x98] sm:$0xff] }
 0x185   :  { %v3033_v33 = vadd.f32 %v3032_v29, %v3031_v25  ;;  %3197 = vmatprep.subr.bf16.mxu0 %v3196_v18  ;;  %527 = vmatmul.mubr.f32.gmra.mrb[4].mxu1 %v4904_v24  ;;  %v3180_v18 = vpack.c.bf16 %v389_v8, %v381_v6  ;;  %v405_v25 = vld [vmem:[#allocation11 + $0x3e8] sm:$0xff]  ;;  %v1011_v8 = vld [vmem:[#allocation14 + $0x88] sm:$0xff]  ;;  %v1017_v11 = vld [vmem:[#allocation14 + $0xb8] sm:$0xff] }
 0x186   :  { %638 = vmatmul.mubr.f32.gmra.mrb[20].mxu0 %v4904_v24  ;;  %3167 = vmatpush1.bf16.msra.mxu1 %v3166_v21  ;;  %v3184_v35 = vpack.c.bf16 %v405_v25, %v397_v23  ;;  %v4978_v20 = vpack.c.bf16 %v1017_v11, %v1013_v10  ;;  %v1021_v23 = vld [vmem:[#allocation14 + $0xd8] sm:$0xff]  ;;  %v1042_v10 = vld [vmem:[#allocation14 + $0x180] sm:$0xff] }
 0x187   :  { %v4911_v41 = vadd.f32 %v3033_v33, %v4886_v46  ;;  %3199 = vmatpush1.bf16.msra.mxu0 %v3198_v26  ;;  %v3034_v42 = vpop.f32.mrb[8].mxu0  ;;  %532 = vmatprep.mubr.f32.mxu1 %v5770_v39  ;;  %v3182_v26 = vpack.c.bf16 %v388_v16, %v380_v15  ;;  %v404_v33 = vld [vmem:[#allocation11 + $0x3e0] sm:$0xff]  ;;  %v1010_v15 = vld [vmem:[#allocation14 + $0x80] sm:$0xff] }
 0x188   :  { %v3035_v47 = vpop.f32.mrb[9].mxu0  ;;  %643 = vmatprep.mubr.f32.mxu0 %v5770_v39  ;;  %3169 = vmatprep.subr.bf16.mxu1 %v3168_v30  ;;  %v1014_v16 = vld [vmem:[#allocation14 + $0xa0] sm:$0xff]  ;;  %v1025_v25 = vld [vmem:[#allocation14 + $0xf8] sm:$0xff] }
 0x189   :  { %v3036_v51 = vadd.f32 %v3035_v47, %v3034_v42  ;;  %3201 = vmatprep.subr.bf16.mxu0 %v3200_v34  ;;  %533 = vmatmul.mubr.f32.gmra.mrb[6].mxu1 %v4911_v41  ;;  %v995_v42 = vld [vmem:[#allocation14 + $0x8] sm:$0xff]  ;;  %v1001_v47 = vld [vmem:[#allocation14 + $0x38] sm:$0xff]  ;;  %v1046_v11 = vld [vmem:[#allocation14 + $0x1a0] sm:$0xff] }
 0x18a   :  { %644 = vmatmul.mubr.f32.gmra.mrb[22].mxu0 %v4911_v41  ;;  %3171 = vmatpush1.bf16.msra.mxu1 %v3170_v37  ;;  %v406_v37 = vld [vmem:[#allocation11 + $0x3f0] sm:$0xff] }
 0x18b   :  { %v4918_v59 = vadd.f32 %v3036_v51, %v4886_v46  ;;  %3203 = vmatpush1.bf16.msra.mxu0 %v3202_v43  ;;  %v3037_v60 = vpop.f32.mrb[10].mxu0  ;;  %538 = vmatprep.mubr.f32.mxu1 %v5770_v39  ;;  %v3186_v43 = vpack.c.bf16 %v404_v33, %v396_v32  ;;  %v3218_v49 = vpack.c.bf16 %v406_v37, %v398_v36  ;;  %v998_v51 = vld [vmem:[#allocation14 + $0x20] sm:$0xff]  ;;  %v1024_v32 = vld [vmem:[#allocation14 + $0xf0] sm:$0xff]  ;;  %v1029_v36 = vld [vmem:[#allocation14 + $0x118] sm:$0xff] }
 0x18c   :  { %v3038_v0 = vpop.f32.mrb[11].mxu0  ;;  %649 = vmatprep.mubr.f32.mxu0 %v5770_v39  ;;  %3173 = vmatprep.subr.bf16.mxu1 %v3172_v48  ;;  %v4953_v63 = vpack.c.bf16 %v998_v51, %v994_v50  ;;  %v4994_v33 = vpack.c.bf16 %v1025_v25, %v1021_v23  ;;  %v1033_v37 = vld [vmem:[#allocation14 + $0x138] sm:$0xff]  ;;  %v1039_v50 = vld [vmem:[#allocation14 + $0x168] sm:$0xff]  ;;  %v5048_v25 = vpack.c.bf16 %v1046_v11, %v1042_v10  ;;  %v1070_v10 = vld [vmem:[#allocation14 + $0x260] sm:$0xff] }
 0x18d   :  { %v3039_v4 = vadd.f32 %v3038_v0, %v3037_v60  ;;  %3205 = vmatprep.subr.bf16.mxu0 %v3204_v52  ;;  %539 = vmatmul.mubr.f32.gmra.mrb[8].mxu1 %v4918_v59  ;;  %v996_v52 = vld [vmem:[#allocation14 + $0x10] sm:$0xff]  ;;  %v1005_v60 = vld [vmem:[#allocation14 + $0x58] sm:$0xff] }
 0x18e   :  { %650 = vmatmul.mubr.f32.gmra.mrb[24].mxu0 %v4918_v59  ;;  %3175 = vmatpush1.bf16.msra.mxu1 %v3174_v56  ;;  %v4946_v56 = vpack.c.bf16 %v999_v44, %v995_v42  ;;  %v4955_v0 = vpack.c.bf16 %v1000_v53, %v996_v52  ;;  %v1026_v42 = vld [vmem:[#allocation14 + $0x100] sm:$0xff]  ;;  %v1028_v44 = vld [vmem:[#allocation14 + $0x110] sm:$0xff]  ;;  %v1037_v51 = vld [vmem:[#allocation14 + $0x158] sm:$0xff] }
 0x18f   :  { %v4925_v12 = vadd.f32 %v3039_v4, %v4886_v46  ;;  %3207 = vmatpush1.bf16.msra.mxu0 %v3206_v61  ;;  %v3040_v13 = vpop.f32.mrb[12].mxu0  ;;  %544 = vmatprep.mubr.f32.mxu1 %v5770_v39  ;;  %v1009_v61 = vld [vmem:[#allocation14 + $0x78] sm:$0xff]  ;;  %v1008_v4 = vld [vmem:[#allocation14 + $0x70] sm:$0xff] }
 0x190   :  { %v3041_v17 = vpop.f32.mrb[13].mxu0  ;;  %655 = vmatprep.mubr.f32.mxu0 %v5770_v39  ;;  %3177 = vmatprep.subr.bf16.mxu1 %v3176_v1  ;;  %5838 = vst [vmem:[#allocation27_spill] sm:$0xff] %v4946_v56  ;;  %v1002_v1 = vld [vmem:[#allocation14 + $0x40] sm:$0xff]  ;;  %v4962_v6 = vpack.c.bf16 %v1009_v61, %v1005_v60  ;;  %v1041_v52 = vld [vmem:[#allocation14 + $0x178] sm:$0xff]  ;;  %v1036_v60 = vld [vmem:[#allocation14 + $0x150] sm:$0xff] }
 0x191   :  { %v3042_v21 = vadd.f32 %v3041_v17, %v3040_v13  ;;  %3209 = vmatprep.subr.bf16.mxu0 %v3208_v5  ;;  %545 = vmatmul.mubr.f32.gmra.mrb[10].mxu1 %v4925_v12  ;;  %v4960_v5 = vpack.c.bf16 %v1007_v58, %v1003_v57  ;;  %v4968_v13 = vpack.c.bf16 %v1006_v2, %v1002_v1  ;;  %v1012_v17 = vld [vmem:[#allocation14 + $0x90] sm:$0xff]  ;;  %v1034_v57 = vld [vmem:[#allocation14 + $0x140] sm:$0xff]  ;;  %v1043_v1 = vld [vmem:[#allocation14 + $0x188] sm:$0xff] }
 0x192   :  { %656 = vmatmul.mubr.f32.gmra.mrb[26].mxu0 %v4925_v12  ;;  %3179 = vmatpush1.bf16.msra.mxu1 %v3178_v9  ;;  %v1015_v9 = vld [vmem:[#allocation14 + $0xa8] sm:$0xff]  ;;  %v1038_v58 = vld [vmem:[#allocation14 + $0x160] sm:$0xff]  ;;  %v1040_v61 = vld [vmem:[#allocation14 + $0x170] sm:$0xff] }
 0x193   :  { %v4932_v29 = vadd.f32 %v3042_v21, %v4886_v46  ;;  %3211 = vmatpush1.bf16.msra.mxu0 %v3210_v14  ;;  %v3043_v30 = vpop.f32.mrb[14].mxu0  ;;  %550 = vmatprep.mubr.f32.mxu1 %v5770_v39  ;;  %v4970_v14 = vpack.c.bf16 %v1008_v4, %v1004_v3  ;;  %v4976_v19 = vpack.c.bf16 %v1015_v9, %v1011_v8  ;;  %v1019_v21 = vld [vmem:[#allocation14 + $0xc8] sm:$0xff]  ;;  %v1045_v3 = vld [vmem:[#allocation14 + $0x198] sm:$0xff] }
 0x194   :  { %v3044_v34 = vpop.f32.mrb[15].mxu0  ;;  %661 = vmatprep.mubr.f32.mxu0 %v5770_v39  ;;  %3181 = vmatprep.subr.bf16.mxu1 %v3180_v18  ;;  %v1016_v18 = vld [vmem:[#allocation14 + $0xb0] sm:$0xff]  ;;  %v1047_v2 = vld [vmem:[#allocation14 + $0x1a8] sm:$0xff]  ;;  %v1049_v4 = vld [vmem:[#allocation14 + $0x1b8] sm:$0xff]  ;;  %v5032_v8 = vpack.c.bf16 %v1038_v58, %v1034_v57  ;;  %v5034_v9 = vpack.c.bf16 %v1040_v61, %v1036_v60 }
 0x195   :  { %v3045_v38 = vadd.f32 %v3044_v34, %v3043_v30  ;;  %3213 = vmatprep.subr.bf16.mxu0 %v3212_v22  ;;  %551 = vmatmul.mubr.f32.gmra.mrb[12].mxu1 %v4932_v29  ;;  %v1023_v22 = vld [vmem:[#allocation14 + $0xe8] sm:$0xff]  ;;  %v4986_v27 = vpack.c.bf16 %v1016_v18, %v1012_v17  ;;  %v1022_v30 = vld [vmem:[#allocation14 + $0xe0] sm:$0xff]  ;;  %v5042_v17 = vpack.c.bf16 %v1049_v4, %v1045_v3  ;;  %v1057_v23 = vld [vmem:[#allocation14 + $0x1f8] sm:$0xff] }
 0x196   :  { %662 = vmatmul.mubr.f32.gmra.mrb[28].mxu0 %v4932_v29  ;;  %3183 = vmatpush1.bf16.msra.mxu1 %v3182_v26  ;;  %v4984_v26 = vpack.c.bf16 %v1014_v16, %v1010_v15  ;;  %v1027_v34 = vld [vmem:[#allocation14 + $0x108] sm:$0xff]  ;;  %v1044_v15 = vld [vmem:[#allocation14 + $0x190] sm:$0xff]  ;;  %v1069_v61 = vld [vmem:[#allocation14 + $0x258] sm:$0xff] }
 0x197   :  { %v4939_v48 = vadd.f32 %v3045_v38, %v4886_v46  ;;  %3215 = vmatpush1.bf16.msra.mxu0 %v3214_v31  ;;  %556 = vmatprep.mubr.f32.mxu1 %v5770_v39  ;;  %v4948_v46 = vpack.c.bf16 %v1001_v47, %v997_v45  ;;  %v1020_v31 = vld [vmem:[#allocation14 + $0xd0] sm:$0xff]  ;;  %v5000_v38 = vpack.c.bf16 %v1022_v30, %v1018_v28  ;;  %v1051_v18 = vld [vmem:[#allocation14 + $0x1c8] sm:$0xff]  ;;  %v1050_v30 = vld [vmem:[#allocation14 + $0x1c0] sm:$0xff] }
 0x198   :  { %667 = vmatprep.mubr.f32.mxu0 %v5770_v39  ;;  %3185 = vmatprep.subr.bf16.mxu1 %v3184_v35  ;;  %v1031_v35 = vld [vmem:[#allocation14 + $0x128] sm:$0xff]  ;;  %v1032_v45 = vld [vmem:[#allocation14 + $0x130] sm:$0xff]  ;;  %v5010_v47 = vpack.c.bf16 %v1033_v37, %v1029_v36  ;;  %v1066_v4 = vld [vmem:[#allocation14 + $0x240] sm:$0xff] }
 0x199   :  { %5837 = vst [vmem:[#allocation26_spill] sm:$0xff] %v4939_v48  ;;  %3217 = vmatprep.subr.bf16.mxu0 %v3216_v40  ;;  %557 = vmatmul.mubr.f32.gmra.mrb[14].mxu1 %v4939_v48  ;;  %v2682_v54 = vmul.f32 %v4939_v48, %v4939_v48  ;;  %5839 = vst [vmem:[#allocation28_spill] sm:$0xff] %v4948_v46  ;;  %v5002_v40 = vpack.c.bf16 %v1024_v32, %v1020_v31  ;;  %v1048_v16 = vld [vmem:[#allocation14 + $0x1b0] sm:$0xff]  ;;  %v1054_v31 = vld [vmem:[#allocation14 + $0x1e0] sm:$0xff] }
 0x19a   :  { %668 = vmatmul.mubr.f32.gmra.mrb[30].mxu0 %v4939_v48  ;;  %3187 = vmatpush1.bf16.msra.mxu1 %v3186_v43  ;;  %v1030_v43 = vld [vmem:[#allocation14 + $0x120] sm:$0xff]  ;;  %v5050_v28 = vpack.c.bf16 %v1048_v16, %v1044_v15  ;;  %v1052_v32 = vld [vmem:[#allocation14 + $0x1d0] sm:$0xff]  ;;  %v1063_v37 = vld [vmem:[#allocation14 + $0x228] sm:$0xff] }
 0x19b   :  { %3219 = vmatpush1.bf16.msra.mxu0 %v3218_v49  ;;  %v2683_v62 = vsel %vm2675_vm0, %v2682_v54, 0.0  ;;  %736 = vmatprep.mubr.f32.mxu1 %v5770_v39  ;;  %v1035_v49 = vld [vmem:[#allocation14 + $0x148] sm:$0xff]  ;;  %v5016_v53 = vpack.c.bf16 %v1030_v43, %v1026_v42  ;;  %v5018_v54 = vpack.c.bf16 %v1032_v45, %v1028_v44  ;;  %v1061_v42 = vld [vmem:[#allocation14 + $0x218] sm:$0xff]  ;;  %v5064_v44 = vpack.c.bf16 %v1054_v31, %v1050_v30  ;;  %v1060_v57 = vld [vmem:[#allocation14 + $0x210] sm:$0xff] }
 0x19c   :  { %2684 = vadd.xlane.f32.xlu0 %v2683_v62  ;;  %847 = vmatprep.mubr.f32.mxu0 %v5770_v39  ;;  %v5026_v62 = vpack.c.bf16 %v1041_v52, %v1037_v51  ;;  %v1065_v43 = vld [vmem:[#allocation14 + $0x238] sm:$0xff]  ;;  %v1067_v58 = vld [vmem:[#allocation14 + $0x248] sm:$0xff]  ;;  %v1068_v16 = vld [vmem:[#allocation14 + $0x250] sm:$0xff]  ;;  %v5094_v31 = vpack.c.bf16 %v1070_v10, %v1066_v4 }
 0x19d   :  { %3221 = vmatprep.subr.bf16.mxu1 %v4946_v56  ;;  %3285 = vmatprep.subr.bf16.mxu0 %v4948_v46  ;;  %v5072_v52 = vpack.c.bf16 %v1065_v43, %v1061_v42  ;;  %v1071_v60 = vld [vmem:[#allocation14 + $0x268] sm:$0xff]  ;;  %v1081_v30 = vld [vmem:[#allocation14 + $0x2b8] sm:$0xff]  ;;  %v1076_v43 = vld [vmem:[#allocation14 + $0x290] sm:$0xff] }
 0x19e   :  { %737 = vmatmul.mubr.f32.vlgmr.msra.gmra.mrb[16].mxu1 %v4889_v55  ;;  %848 = vmatmul.mubr.f32.vlgmr.msra.gmra.mrb[32].mxu0 %v4889_v55  ;;  %v5086_v11 = vpack.c.bf16 %v1071_v60, %v1067_v58  ;;  %v1089_v58 = vld [vmem:[#allocation14 + $0x2f8] sm:$0xff]  ;;  %v1086_v4 = vld [vmem:[#allocation14 + $0x2e0] sm:$0xff]  ;;  %v1099_v55 = vld [vmem:[#allocation14 + $0x348] sm:$0xff] }
 0x19f   :  { %3223 = vmatpush1.bf16.msra.mxu1 %v4953_v63  ;;  %3287 = vmatpush1.bf16.msra.mxu0 %v4955_v0 }
 0x1a0   :  { %740 = vmatprep.mubr.f32.mxu1 %v5770_v39  ;;  %851 = vmatprep.mubr.f32.mxu0 %v5770_v39 }
 0x1a1   :  { %3225 = vmatprep.subr.bf16.mxu1 %v4960_v5  ;;  %3289 = vmatprep.subr.bf16.mxu0 %v4962_v6 }
 0x1a2   :  { %741 = vmatmul.mubr.f32.gmra.mrb[18].mxu1 %v4896_v7  ;;  %852 = vmatmul.mubr.f32.gmra.mrb[34].mxu0 %v4896_v7  ;;  %v4992_v7 = vpack.c.bf16 %v1023_v22, %v1019_v21  ;;  %v1055_v21 = vld [vmem:[#allocation14 + $0x1e8] sm:$0xff]  ;;  %v1053_v22 = vld [vmem:[#allocation14 + $0x1d8] sm:$0xff] }
 0x1a3   :  { %3227 = vmatpush1.bf16.msra.mxu1 %v4968_v13  ;;  %3291 = vmatpush1.bf16.msra.mxu0 %v4970_v14  ;;  %v5058_v36 = vpack.c.bf16 %v1057_v23, %v1053_v22  ;;  %v1079_v22 = vld [vmem:[#allocation14 + $0x2a8] sm:$0xff]  ;;  %v1077_v23 = vld [vmem:[#allocation14 + $0x298] sm:$0xff] }
 0x1a4   :  { %746 = vmatprep.mubr.f32.mxu1 %v5770_v39  ;;  %857 = vmatprep.mubr.f32.mxu0 %v5770_v39  ;;  %v5102_v42 = vpack.c.bf16 %v1081_v30, %v1077_v23  ;;  %v1095_v23 = vld [vmem:[#allocation14 + $0x328] sm:$0xff]  ;;  %v1093_v30 = vld [vmem:[#allocation14 + $0x318] sm:$0xff] }
 0x1a5   :  { %3229 = vmatprep.subr.bf16.mxu1 %v4976_v19  ;;  %3293 = vmatprep.subr.bf16.mxu0 %v4978_v20 }
 0x1a6   :  { %747 = vmatmul.mubr.f32.gmra.mrb[20].mxu1 %v4904_v24  ;;  %858 = vmatmul.mubr.f32.gmra.mrb[36].mxu0 %v4904_v24  ;;  %v5008_v24 = vpack.c.bf16 %v1031_v35, %v1027_v34  ;;  %v1056_v34 = vld [vmem:[#allocation14 + $0x1f0] sm:$0xff]  ;;  %v5056_v35 = vpack.c.bf16 %v1055_v21, %v1051_v18  ;;  %v1075_v21 = vld [vmem:[#allocation14 + $0x288] sm:$0xff]  ;;  %5841 = vst [vmem:[#allocation30_spill] sm:$0xff] %v5102_v42 }
 0x1a7   :  { %3231 = vmatpush1.bf16.msra.mxu1 %v4984_v26  ;;  %3295 = vmatpush1.bf16.msra.mxu0 %v4986_v27  ;;  %v5066_v45 = vpack.c.bf16 %v1056_v34, %v1052_v32  ;;  %v1072_v18 = vld [vmem:[#allocation14 + $0x270] sm:$0xff]  ;;  %v1074_v34 = vld [vmem:[#allocation14 + $0x280] sm:$0xff] }
 0x1a8   :  { %752 = vmatprep.mubr.f32.mxu1 %v5770_v39  ;;  %863 = vmatprep.mubr.f32.mxu0 %v5770_v39  ;;  %v5096_v32 = vpack.c.bf16 %v1072_v18, %v1068_v16  ;;  %v1084_v18 = vld [vmem:[#allocation14 + $0x2d0] sm:$0xff] }
 0x1a9   :  { %3233 = vmatprep.subr.bf16.mxu1 %v4992_v7  ;;  %3297 = vmatprep.subr.bf16.mxu0 %v4994_v33 }
 0x1aa   :  { %753 = vmatmul.mubr.f32.gmra.mrb[22].mxu1 %v4911_v41  ;;  %864 = vmatmul.mubr.f32.gmra.mrb[38].mxu0 %v4911_v41  ;;  %v5024_v41 = vpack.c.bf16 %v1039_v50, %v1035_v49  ;;  %v1058_v49 = vld [vmem:[#allocation14 + $0x200] sm:$0xff] }
 0x1ab   :  { %3235 = vmatpush1.bf16.msra.mxu1 %v5000_v38  ;;  %3299 = vmatpush1.bf16.msra.mxu0 %v5002_v40  ;;  %v1062_v50 = vld [vmem:[#allocation14 + $0x220] sm:$0xff] }
 0x1ac   :  { %758 = vmatprep.mubr.f32.mxu1 %v5770_v39  ;;  %869 = vmatprep.mubr.f32.mxu0 %v5770_v39 }
 0x1ad   :  { %3237 = vmatprep.subr.bf16.mxu1 %v5008_v24  ;;  %3301 = vmatprep.subr.bf16.mxu0 %v5010_v47 }
 0x1ae   :  { %759 = vmatmul.mubr.f32.gmra.mrb[24].mxu1 %v4918_v59  ;;  %870 = vmatmul.mubr.f32.gmra.mrb[40].mxu0 %v4918_v59  ;;  %v5040_v59 = vpack.c.bf16 %v1047_v2, %v1043_v1  ;;  %v1073_v1 = vld [vmem:[#allocation14 + $0x278] sm:$0xff]  ;;  %v5080_v2 = vpack.c.bf16 %v1062_v50, %v1058_v49  ;;  %v1080_v49 = vld [vmem:[#allocation14 + $0x2b0] sm:$0xff]  ;;  %v1083_v50 = vld [vmem:[#allocation14 + $0x2c8] sm:$0xff] }
 0x1af   :  { %3239 = vmatpush1.bf16.msra.mxu1 %v5016_v53  ;;  %3303 = vmatpush1.bf16.msra.mxu0 %v5018_v54  ;;  %v5088_v15 = vpack.c.bf16 %v1073_v1, %v1069_v61  ;;  %v5108_v61 = vpack.c.bf16 %v1080_v49, %v1076_v43  ;;  %v1082_v1 = vld [vmem:[#allocation14 + $0x2c0] sm:$0xff] }
 0x1b0   :  { %764 = vmatprep.mubr.f32.mxu1 %v5770_v39  ;;  %875 = vmatprep.mubr.f32.mxu0 %v5770_v39  ;;  %v1090_v43 = vld [vmem:[#allocation14 + $0x300] sm:$0xff] }
 0x1b1   :  { %3241 = vmatprep.subr.bf16.mxu1 %v5024_v41  ;;  %3305 = vmatprep.subr.bf16.mxu0 %v5026_v62  ;;  %5843 = vst [vmem:[#allocation32_spill] sm:$0xff] %v5108_v61  ;;  %v1094_v49 = vld [vmem:[#allocation14 + $0x320] sm:$0xff] }
 0x1b2   :  { %765 = vmatmul.mubr.f32.gmra.mrb[26].mxu1 %v4925_v12  ;;  %876 = vmatmul.mubr.f32.gmra.mrb[42].mxu0 %v4925_v12  ;;  %v1059_v12 = vld [vmem:[#allocation14 + $0x208] sm:$0xff] }
 0x1b3   :  { %3243 = vmatpush1.bf16.msra.mxu1 %v5032_v8  ;;  %3307 = vmatpush1.bf16.msra.mxu0 %v5034_v9  ;;  %v5070_v51 = vpack.c.bf16 %v1063_v37, %v1059_v12  ;;  %v1078_v12 = vld [vmem:[#allocation14 + $0x2a0] sm:$0xff]  ;;  %v5100_v37 = vpack.c.bf16 %v1079_v22, %v1075_v21  ;;  %v1088_v21 = vld [vmem:[#allocation14 + $0x2f0] sm:$0xff]  ;;  %v1091_v22 = vld [vmem:[#allocation14 + $0x308] sm:$0xff] }
 0x1b4   :  { %770 = vmatprep.mubr.f32.mxu1 %v5770_v39  ;;  %881 = vmatprep.mubr.f32.mxu0 %v5770_v39  ;;  %v5106_v60 = vpack.c.bf16 %v1078_v12, %v1074_v34  ;;  %v5118_v34 = vpack.c.bf16 %v1086_v4, %v1082_v1  ;;  %v5120_v12 = vpack.c.bf16 %v1088_v21, %v1084_v18  ;;  %v1098_v18 = vld [vmem:[#allocation14 + $0x340] sm:$0xff] }
 0x1b5   :  { %3245 = vmatprep.subr.bf16.mxu1 %v5040_v59  ;;  %3309 = vmatprep.subr.bf16.mxu0 %v5042_v17  ;;  %5840 = vst [vmem:[#allocation29_spill] sm:$0xff] %v5100_v37  ;;  %v5130_v1 = vpack.c.bf16 %v1094_v49, %v1090_v43  ;;  %v1102_v21 = vld [vmem:[#allocation14 + $0x360] sm:$0xff] }
 0x1b6   :  { %771 = vmatmul.mubr.f32.gmra.mrb[28].mxu1 %v4932_v29  ;;  %882 = vmatmul.mubr.f32.gmra.mrb[44].mxu0 %v4932_v29  ;;  %v1064_v29 = vld [vmem:[#allocation14 + $0x230] sm:$0xff]  ;;  %5842 = vst [vmem:[#allocation31_spill] sm:$0xff] %v5106_v60  ;;  %5846 = vst [vmem:[#allocation35_spill] sm:$0xff] %v5118_v34  ;;  %v5142_v43 = vpack.c.bf16 %v1102_v21, %v1098_v18 }
 0x1b7   :  { %3247 = vmatpush1.bf16.msra.mxu1 %v5048_v25  ;;  %3311 = vmatpush1.bf16.msra.mxu0 %v5050_v28  ;;  %v5082_v3 = vpack.c.bf16 %v1064_v29, %v1060_v57  ;;  %v1087_v57 = vld [vmem:[#allocation14 + $0x2e8] sm:$0xff]  ;;  %v1085_v29 = vld [vmem:[#allocation14 + $0x2d8] sm:$0xff]  ;;  %5847 = vst [vmem:[#allocation36_spill] sm:$0xff] %v5120_v12  ;;  %5850 = vst [vmem:[#allocation39_spill] sm:$0xff] %v5130_v1 }
 0x1b8   :  { %776 = vmatprep.mubr.f32.mxu1 %v5770_v39  ;;  %887 = vmatprep.mubr.f32.mxu0 %v5770_v39  ;;  %v5112_v10 = vpack.c.bf16 %v1087_v57, %v1083_v50  ;;  %v5114_v16 = vpack.c.bf16 %v1089_v58, %v1085_v29  ;;  %v5124_v50 = vpack.c.bf16 %v1095_v23, %v1091_v22  ;;  %v1092_v29 = vld [vmem:[#allocation14 + $0x310] sm:$0xff] }
 0x1b9   :  { %3249 = vmatprep.subr.bf16.mxu1 %v5056_v35  ;;  %3313 = vmatprep.subr.bf16.mxu0 %v5058_v36  ;;  %v1096_v58 = vld [vmem:[#allocation14 + $0x330] sm:$0xff]  ;;  %5854 = vst [vmem:[#allocation43_spill] sm:$0xff] %v5142_v43 }
 0x1ba   :  { %777 = vmatmul.mubr.f32.gmra.mrb[30].mxu1 %v4939_v48  ;;  %888 = vmatmul.mubr.f32.gmra.mrb[46].mxu0 %v4939_v48  ;;  %5844 = vst [vmem:[#allocation33_spill] sm:$0xff] %v5112_v10  ;;  %5845 = vst [vmem:[#allocation34_spill] sm:$0xff] %v5114_v16  ;;  %v1103_v48 = vld [vmem:[#allocation14 + $0x368] sm:$0xff]  ;;  %v5132_v4 = vpack.c.bf16 %v1096_v58, %v1092_v29  ;;  %v1100_v23 = vld [vmem:[#allocation14 + $0x350] sm:$0xff] }
 0x1bb   :  { %3251 = vmatpush1.bf16.msra.mxu1 %v5064_v44  ;;  %3315 = vmatpush1.bf16.msra.mxu0 %v5066_v45  ;;  %5848 = vst [vmem:[#allocation37_spill] sm:$0xff] %v5124_v50  ;;  %v1106_v29 = vld [vmem:[#allocation14 + $0x380] sm:$0xff] }
 0x1bc   :  { %3253 = vmatprep.subr.bf16.mxu1 %v5070_v51  ;;  %3317 = vmatprep.subr.bf16.mxu0 %v5072_v52  ;;  %5851 = vst [vmem:[#allocation40_spill] sm:$0xff] %v5132_v4  ;;  %v1110_v58 = vld [vmem:[#allocation14 + $0x3a0] sm:$0xff] }
 0x1bd   :  { %1186 = vmatprep.mubr.f32.mxu1 %v5770_v39  ;;  %1263 = vmatprep.mubr.f32.mxu0 %v5770_v39  ;;  %v1097_v39 = vld [vmem:[#allocation14 + $0x338] sm:$0xff]  ;;  %v5154_v18 = vpack.c.bf16 %v1110_v58, %v1106_v29 }
 0x1be   :  { %v5126_v57 = vpack.c.bf16 %v1097_v39, %v1093_v30  ;;  %v5136_v39 = vpack.c.bf16 %v1103_v48, %v1099_v55  ;;  %v1104_v30 = vld [vmem:[#allocation14 + $0x370] sm:$0xff] }
 0x1bf   :  { %3255 = vmatpush1.bf16.msra.mxu1 %v5080_v2  ;;  %3319 = vmatpush1.bf16.msra.mxu0 %v5082_v3  ;;  %v5144_v49 = vpack.c.bf16 %v1104_v30, %v1100_v23  ;;  %5858 = vst [vmem:[#allocation47_spill] sm:$0xff] %v5154_v18  ;;  %v1114_v23 = vld [vmem:[#allocation14 + $0x3c0] sm:$0xff]  ;;  %v1120_v30 = vld [vmem:[#allocation14 + $0x3f0] sm:$0xff] }
 0x1c0   :  { %3257 = vmatprep.subr.bf16.mxu1 %v5086_v11  ;;  %3321 = vmatprep.subr.bf16.mxu0 %v5088_v15  ;;  %5849 = vst [vmem:[#allocation38_spill] sm:$0xff] %v5126_v57  ;;  %5852 = vst [vmem:[#allocation41_spill] sm:$0xff] %v5136_v39 }
 0x1c1   :  { %5855 = vst [vmem:[#allocation44_spill] sm:$0xff] %v5144_v49 }
 0x1c3   :  { %3259 = vmatpush1.bf16.msra.mxu1 %v5094_v31  ;;  %3323 = vmatpush1.bf16.msra.mxu0 %v5096_v32 }
 0x1c4   :  { %3261 = vmatprep.subr.bf16.mxu1 %v5100_v37  ;;  %3325 = vmatprep.subr.bf16.mxu0 %v5102_v42 }
 0x1c7   :  { %3263 = vmatpush1.bf16.msra.mxu1 %v5106_v60  ;;  %3327 = vmatpush1.bf16.msra.mxu0 %v5108_v61  ;;  %v1101_v60 = vld [vmem:[#allocation14 + $0x358] sm:$0xff] }
 0x1c8   :  { %3265 = vmatprep.subr.bf16.mxu1 %v5112_v10  ;;  %3329 = vmatprep.subr.bf16.mxu0 %v5114_v16  ;;  %v1105_v61 = vld [vmem:[#allocation14 + $0x378] sm:$0xff]  ;;  %v1107_v16 = vld [vmem:[#allocation14 + $0x388] sm:$0xff] }
 0x1c9   :  { %v5138_v22 = vpack.c.bf16 %v1105_v61, %v1101_v60  ;;  %v1109_v10 = vld [vmem:[#allocation14 + $0x398] sm:$0xff]  ;;  %v1108_v60 = vld [vmem:[#allocation14 + $0x390] sm:$0xff] }
 0x1ca   :  { %v1112_v61 = vld [vmem:[#allocation14 + $0x3b0] sm:$0xff] }
 0x1cb   :  { %3267 = vmatpush1.bf16.msra.mxu1 %v5118_v34  ;;  %3331 = vmatpush1.bf16.msra.mxu0 %v5120_v12  ;;  %5853 = vst [vmem:[#allocation42_spill] sm:$0xff] %v5138_v22  ;;  %v1111_v34 = vld [vmem:[#allocation14 + $0x3a8] sm:$0xff]  ;;  %v1113_v12 = vld [vmem:[#allocation14 + $0x3b8] sm:$0xff]  ;;  %v5156_v21 = vpack.c.bf16 %v1112_v61, %v1108_v60 }
 0x1cc   :  { %3269 = vmatprep.subr.bf16.mxu1 %v5124_v50  ;;  %3333 = vmatprep.subr.bf16.mxu0 %v5126_v57  ;;  %v5148_v55 = vpack.c.bf16 %v1111_v34, %v1107_v16  ;;  %v5150_v48 = vpack.c.bf16 %v1113_v12, %v1109_v10  ;;  %v1115_v57 = vld [vmem:[#allocation14 + $0x3c8] sm:$0xff]  ;;  %v1117_v50 = vld [vmem:[#allocation14 + $0x3d8] sm:$0xff]  ;;  %v1118_v34 = vld [vmem:[#allocation14 + $0x3e0] sm:$0xff] }
 0x1cd   :  { %5859 = vst [vmem:[#allocation48_spill] sm:$0xff] %v5156_v21  ;;  %v1116_v12 = vld [vmem:[#allocation14 + $0x3d0] sm:$0xff]  ;;  %v5166_v29 = vpack.c.bf16 %v1118_v34, %v1114_v23  ;;  %v5868_v60 = vld [vmem:[#allocation34_spill] sm:$0xff]  ;;  %v5869_v61 = vld [vmem:[#allocation35_spill] sm:$0xff] }
 0x1ce   :  { %5856 = vst [vmem:[#allocation45_spill] sm:$0xff] %v5148_v55  ;;  %5857 = vst [vmem:[#allocation46_spill] sm:$0xff] %v5150_v48  ;;  %v5168_v58 = vpack.c.bf16 %v1120_v30, %v1116_v12  ;;  %v5870_v23 = vld [vmem:[#allocation36_spill] sm:$0xff]  ;;  %v5871_v34 = vld [vmem:[#allocation37_spill] sm:$0xff] }
 0x1cf   :  { %3271 = vmatpush1.bf16.msra.mxu1 %v5130_v1  ;;  %3335 = vmatpush1.bf16.msra.mxu0 %v5132_v4  ;;  %v1119_v1 = vld [vmem:[#allocation14 + $0x3e8] sm:$0xff]  ;;  %v1121_v4 = vld [vmem:[#allocation14 + $0x3f8] sm:$0xff]  ;;  %5862 = vst [vmem:[#allocation51_spill] sm:$0xff] %v5166_v29 }
 0x1d0   :  { %3273 = vmatprep.subr.bf16.mxu1 %v5136_v39  ;;  %3337 = vmatprep.subr.bf16.mxu0 %v5138_v22  ;;  %v5160_v10 = vpack.c.bf16 %v1119_v1, %v1115_v57  ;;  %v5162_v16 = vpack.c.bf16 %v1121_v4, %v1117_v50  ;;  %5863 = vst [vmem:[#allocation52_spill] sm:$0xff] %v5168_v58  ;;  %v5864_v50 = vmov 0.0   ;;  %v5865_v57 = vld [vmem:[#allocation31_spill] sm:$0xff]  ;;  %v5866_v1 = vld [vmem:[#allocation32_spill] sm:$0xff]  ;;  %v5867_v4 = vld [vmem:[#allocation33_spill] sm:$0xff] }
 0x1d1   :  { %v5872_v12 = vld [vmem:[#allocation38_spill] sm:$0xff]  ;;  %v5873_v30 = vld [vmem:[#allocation39_spill] sm:$0xff] }
 0x1d2   :  { %5860 = vst [vmem:[#allocation49_spill] sm:$0xff] %v5160_v10  ;;  %5861 = vst [vmem:[#allocation50_spill] sm:$0xff] %v5162_v16 }
 0x1d3   :  { %3275 = vmatpush1.bf16.msra.mxu1 %v5142_v43  ;;  %3339 = vmatpush1.bf16.msra.mxu0 %v5144_v49 }
 0x1d4   :  { %3277 = vmatprep.subr.bf16.mxu1 %v5148_v55  ;;  %3341 = vmatprep.subr.bf16.mxu0 %v5150_v48 }
 0x1d7   :  { %3279 = vmatpush1.bf16.msra.mxu1 %v5154_v18  ;;  %3343 = vmatpush1.bf16.msra.mxu0 %v5156_v21 }
 0x1d8   :  { %3281 = vmatprep.subr.bf16.mxu1 %v5160_v10  ;;  %3345 = vmatprep.subr.bf16.mxu0 %v5162_v16 }
 0x1db   :  { %3283 = vmatpush1.bf16.msra.mxu1 %v5166_v29  ;;  %3347 = vmatpush1.bf16.msra.mxu0 %v5168_v58 }
 0x1dc   :  { %3349 = vmatprep.subr.bf16.mxu1 %v4946_v56  ;;  %3413 = vmatprep.subr.bf16.mxu0 %v4948_v46 }
 0x1de   :  { %1187 = vmatmul.mubr.f32.vlgmr.msra.gmra.mrb[0].mxu1 %v5864_v50  ;;  %1264 = vmatmul.mubr.f32.vlgmr.msra.gmra.mrb[16].mxu0 %v5864_v50 }
 0x1df   :  { %1192 = vmatprep.mubr.f32.mxu1 %v5864_v50  ;;  %1269 = vmatprep.mubr.f32.mxu0 %v5864_v50 }
 0x1e0   :  { %3351 = vmatpush1.bf16.msra.mxu1 %v4953_v63  ;;  %3415 = vmatpush1.bf16.msra.mxu0 %v4955_v0 }
 0x1e1   :  { %3353 = vmatprep.subr.bf16.mxu1 %v4960_v5  ;;  %3417 = vmatprep.subr.bf16.mxu0 %v4962_v6 }
 0x1e2   :  { %1193 = vmatmul.mubr.f32.gmra.mrb[30].mxu1 %v5864_v50  ;;  %1270 = vmatmul.mubr.f32.gmra.mrb[46].mxu0 %v5864_v50  ;;  %v5874_v50 = vld [vmem:[#allocation40_spill] sm:$0xff] }
 0x1e4   :  { %3355 = vmatpush1.bf16.msra.mxu1 %v4968_v13  ;;  %3419 = vmatpush1.bf16.msra.mxu0 %v4970_v14 }
 0x1e5   :  { %3357 = vmatprep.subr.bf16.mxu1 %v4976_v19  ;;  %3421 = vmatprep.subr.bf16.mxu0 %v4978_v20 }
 0x1e8   :  { %3359 = vmatpush1.bf16.msra.mxu1 %v4984_v26  ;;  %3423 = vmatpush1.bf16.msra.mxu0 %v4986_v27 }
 0x1e9   :  { %3361 = vmatprep.subr.bf16.mxu1 %v4992_v7  ;;  %3425 = vmatprep.subr.bf16.mxu0 %v4994_v33 }
 0x1ec   :  { %3363 = vmatpush1.bf16.msra.mxu1 %v5000_v38  ;;  %3427 = vmatpush1.bf16.msra.mxu0 %v5002_v40 }
 0x1ed   :  { %3365 = vmatprep.subr.bf16.mxu1 %v5008_v24  ;;  %3429 = vmatprep.subr.bf16.mxu0 %v5010_v47 }
 0x1f0   :  { %3367 = vmatpush1.bf16.msra.mxu1 %v5016_v53  ;;  %3431 = vmatpush1.bf16.msra.mxu0 %v5018_v54 }
 0x1f1   :  { %3369 = vmatprep.subr.bf16.mxu1 %v5024_v41  ;;  %3433 = vmatprep.subr.bf16.mxu0 %v5026_v62 }
 0x1f4   :  { %3371 = vmatpush1.bf16.msra.mxu1 %v5032_v8  ;;  %3435 = vmatpush1.bf16.msra.mxu0 %v5034_v9 }
 0x1f5   :  { %3373 = vmatprep.subr.bf16.mxu1 %v5040_v59  ;;  %3437 = vmatprep.subr.bf16.mxu0 %v5042_v17 }
 0x1f8   :  { %3375 = vmatpush1.bf16.msra.mxu1 %v5048_v25  ;;  %3439 = vmatpush1.bf16.msra.mxu0 %v5050_v28 }
 0x1f9   :  { %3377 = vmatprep.subr.bf16.mxu1 %v5056_v35  ;;  %3441 = vmatprep.subr.bf16.mxu0 %v5058_v36 }
 0x1fc   :  { %3379 = vmatpush1.bf16.msra.mxu1 %v5064_v44  ;;  %3443 = vmatpush1.bf16.msra.mxu0 %v5066_v45 }
 0x1fd   :  { %3381 = vmatprep.subr.bf16.mxu1 %v5070_v51  ;;  %3445 = vmatprep.subr.bf16.mxu0 %v5072_v52 }
 0x200   :  { %3383 = vmatpush1.bf16.msra.mxu1 %v5080_v2  ;;  %3447 = vmatpush1.bf16.msra.mxu0 %v5082_v3 }
 0x201   :  { %3385 = vmatprep.subr.bf16.mxu1 %v5086_v11  ;;  %3449 = vmatprep.subr.bf16.mxu0 %v5088_v15 }
 0x204   :  { %3387 = vmatpush1.bf16.msra.mxu1 %v5094_v31  ;;  %3451 = vmatpush1.bf16.msra.mxu0 %v5096_v32 }
 0x205   :  { %3389 = vmatprep.subr.bf16.mxu1 %v5100_v37  ;;  %3453 = vmatprep.subr.bf16.mxu0 %v5102_v42 }
 0x208   :  { %3391 = vmatpush1.bf16.msra.mxu1 %v5865_v57  ;;  %3455 = vmatpush1.bf16.msra.mxu0 %v5866_v1 }
 0x209   :  { %3393 = vmatprep.subr.bf16.mxu1 %v5867_v4  ;;  %3457 = vmatprep.subr.bf16.mxu0 %v5868_v60 }
 0x20c   :  { %3395 = vmatpush1.bf16.msra.mxu1 %v5869_v61  ;;  %3459 = vmatpush1.bf16.msra.mxu0 %v5870_v23 }
 0x20d   :  { %3397 = vmatprep.subr.bf16.mxu1 %v5871_v34  ;;  %3461 = vmatprep.subr.bf16.mxu0 %v5872_v12 }
 0x210   :  { %3399 = vmatpush1.bf16.msra.mxu1 %v5873_v30  ;;  %3463 = vmatpush1.bf16.msra.mxu0 %v5874_v50  ;;  %v5821_v50 = vlaneseq }
 0x211   :  { %3401 = vmatprep.subr.bf16.mxu1 %v5136_v39  ;;  %3465 = vmatprep.subr.bf16.mxu0 %v5138_v22 }
 0x214   :  { %3403 = vmatpush1.bf16.msra.mxu1 %v5142_v43  ;;  %3467 = vmatpush1.bf16.msra.mxu0 %v5144_v49 }
 0x215   :  { %3405 = vmatprep.subr.bf16.mxu1 %v5148_v55  ;;  %3469 = vmatprep.subr.bf16.mxu0 %v5150_v48 }
 0x218   :  { %3407 = vmatpush1.bf16.msra.mxu1 %v5154_v18  ;;  %3471 = vmatpush1.bf16.msra.mxu0 %v5156_v21 }
 0x219   :  { %3409 = vmatprep.subr.bf16.mxu1 %v5160_v10  ;;  %3473 = vmatprep.subr.bf16.mxu0 %v5162_v16  ;;  %v5247_v10 = vshrl.u32 %v5821_v50, 7  ;;  %v408_v16 = vld [vmem:[#allocation12] sm:$0xff] }
 0x21b   :  { %5875 = vst [vmem:[#allocation53_spill] sm:$0xff] %v5247_v10 }
 0x21c   :  { %3411 = vmatpush1.bf16.msra.mxu1 %v5166_v29  ;;  %3475 = vmatpush1.bf16.msra.mxu0 %v5168_v58  ;;  %v412_v29 = vsub.s32 0, %v5247_v10  ;;  %v416_v58 = vsub.s32 1, %v5247_v10 }
 0x21d   :  { %3477 = vmatprep.subr.bf16.mxu1 %v4946_v56  ;;  %3541 = vmatprep.subr.bf16.mxu0 %v4948_v46 }
 0x21e   :  { %v5251_v56 = vrot.slane %v408_v16, %v412_v29 }
 0x220   :  { %5876 = vst [vmem:[#allocation54_spill] sm:$0xff] %v5251_v56 }
 0x26c   :  { %v558_v49 = vpop.f32.mrb[14].mxu1 }
 0x26d   :  { %v669_v55 = vpop.f32.mrb[30].mxu0  ;;  %v559_v43 = vpop.f32.mrb[15].mxu1  ;;  %v428_v49 = vsub.s32 4, %v5247_v10 }
 0x26e   :  { %v670_v48 = vpop.f32.mrb[31].mxu0  ;;  %v5254_v55 = vrot.slane %v408_v16, %v416_v58  ;;  %v424_v58 = vsub.s32 3, %v5247_v10 }
 0x26f   :  { %v5259_v46 = vrot.slane %v408_v16, %v428_v49 }
 0x270   :  { %5877 = vst [vmem:[#allocation55_spill] sm:$0xff] %v5254_v55 }
 0x271   :  { %v738_v22 = vpop.f32.mrb[16].mxu1  ;;  %v849_v18 = vpop.f32.mrb[32].mxu0  ;;  %5878 = vst [vmem:[#allocation56_spill] sm:$0xff] %v5259_v46 }
 0x272   :  { %v739_v39 = vpop.f32.mrb[17].mxu1  ;;  %v850_v21 = vpop.f32.mrb[33].mxu0  ;;  %v432_v22 = vsub.s32 5, %v5247_v10  ;;  %v420_v18 = vsub.s32 2, %v5247_v10 }
 0x274   :  { %v5262_v29 = vrot.slane %v408_v16, %v432_v22  ;;  %v5265_v60 = vrot.slane %v408_v16, %v420_v18 }
 0x2b1   :  { %v1188_v43 = vpop.f32.mrb[0].mxu1  ;;  %v1265_v39 = vpop.f32.mrb[16].mxu0 }
 0x2b2   :  { %v4116_v48 = vadd.f32 %v1188_v43, %v5251_v56  ;;  %v1190_v21 = vpop.f32.mrb[1].mxu1  ;;  %v1267_v50 = vpop.f32.mrb[17].mxu0  ;;  %v436_v56 = vsub.s32 6, %v5247_v10 }
 0x2b3   :  { %v4117_v30 = vadd.f32 %v1190_v21, %v5254_v55  ;;  %v4130_v55 = vadd.f32 %v1265_v39, %v5265_v60 }
 0x2b4   :  { %v2947_v12 = vmul.f32 -1.442695, %v4116_v48  ;;  %v440_v48 = vsub.s32 7, %v5247_v10 }
 0x2b5   :  { %v2948_v34 = vmul.f32 -1.442695, %v4117_v30  ;;  %v1194_v23 = vpop.f32.mrb[30].mxu1  ;;  %v1271_v61 = vpop.f32.mrb[46].mxu0  ;;  %v5271_v30 = vrot.slane %v408_v16, %v424_v58 }
 0x2b6   :  { %4250 = vpow2.f32 %v2947_v12  ;;  %v4156_v43 = vadd.f32 %v1194_v23, %v5259_v46  ;;  %v1196_v4 = vpop.f32.mrb[31].mxu1  ;;  %v1273_v49 = vpop.f32.mrb[47].mxu0  ;;  %v5274_v12 = vrot.slane %v408_v16, %v436_v56  ;;  %v5276_v23 = vrot.slane %v408_v16, %v440_v48 }
 0x2b7   :  { %v4157_v1 = vadd.f32 %v1196_v4, %v5262_v29  ;;  %4252 = vpow2.f32 %v2948_v34  ;;  %v4131_v18 = vadd.f32 %v1267_v50, %v5271_v30  ;;  %v2949_v46 = vmul.f32 -1.442695, %v4130_v55 }
 0x2b8   :  { %v2950_v22 = vmul.f32 -1.442695, %v4156_v43  ;;  %v4170_v4 = vadd.f32 %v1271_v61, %v5274_v12  ;;  %v4171_v43 = vadd.f32 %v1273_v49, %v5276_v23 }
 0x2b9   :  { %v2951_v21 = vmul.f32 -1.442695, %v4157_v1 }
 0x2ba   :  { %4254 = vpow2.f32 %v2950_v22  ;;  %v2952_v1 = vmul.f32 -1.442695, %v4170_v4 }
 0x2bb   :  { %4256 = vpow2.f32 %v2951_v21 }
 0x2bc   :  { %4258 = vtanh.f32 %v4131_v18 }
 0x2bd   :  { %4260 = vpow2.f32 %v2949_v46 }
 0x2c0   :  { %v4251_v34 = vpop.eup %4250 }
 0x2c1   :  { %v1302_v10 = vadd.f32 1.0, %v4251_v34  ;;  %v4253_v58 = vpop.eup %4252 }
 0x2c2   :  { %v1303_v39 = vadd.f32 1.0, %v4253_v58 }
 0x2c3   :  { %4262 = vrcp.f32 %v1302_v10 }
 0x2c4   :  { %v4255_v56 = vpop.eup %4254  ;;  %4264 = vtanh.f32 %v4171_v43 }
 0x2c5   :  { %4266 = vrcp.f32 %v1303_v39  ;;  %v1305_v16 = vadd.f32 1.0, %v4255_v56  ;;  %v4257_v22 = vpop.eup %4256 }
 0x2c6   :  { %4268 = vpow2.f32 %v2952_v1  ;;  %v1306_v50 = vadd.f32 1.0, %v4257_v22  ;;  %v4259_v61 = vpop.eup %4258 }
 0x2c7   :  { %4270 = vrcp.f32 %v1305_v16  ;;  %v4261_v55 = vpop.eup %4260 }
 0x2c8   :  { %4272 = vrcp.f32 %v1306_v50  ;;  %v1304_v34 = vadd.f32 1.0, %v4261_v55 }
 0x2ca   :  { %4274 = vrcp.f32 %v1304_v34  ;;  %v5879_v34 = vld [vmem:[#allocation32_spill] sm:$0xff] }
 0x2cd   :  { %v4263_v48 = vpop.eup %4262 }
 0x2ce   :  { %v4265_v49 = vpop.eup %4264  ;;  %v1324_v21 = vmul.f32 %v4263_v48, %v4259_v61 }
 0x2cf   :  { %v4267_v18 = vpop.eup %4266 }
 0x2d0   :  { %v4269_v46 = vpop.eup %4268  ;;  %v1322_v4 = vmul.f32 0.0, %v4267_v18 }
 0x2d1   :  { %v4271_v10 = vpop.eup %4270  ;;  %v1307_v56 = vadd.f32 1.0, %v4269_v46  ;;  %v5880_v46 = vld [vmem:[#allocation33_spill] sm:$0xff] }
 0x2d2   :  { %v5281_v58 = vadd.f32 %v1324_v21, %v1322_v4  ;;  %v1325_v43 = vmul.f32 %v4271_v10, %v4265_v49  ;;  %v4273_v39 = vpop.eup %4272  ;;  %v5881_v4 = vld [vmem:[#allocation34_spill] sm:$0xff]  ;;  %v5882_v10 = vld [vmem:[#allocation35_spill] sm:$0xff] }
 0x2d3   :  { %v1323_v1 = vmul.f32 0.0, %v4273_v39  ;;  %v5884_v39 = vld [vmem:[#allocation37_spill] sm:$0xff] }
 0x2d4   :  { %4276 = vtanh.f32 %v5281_v58  ;;  %v4275_v22 = vpop.eup %4274 }
 0x2d5   :  { %v5284_v16 = vadd.f32 %v1325_v43, %v1323_v1  ;;  %4278 = vrcp.f32 %v1307_v56  ;;  %v5883_v43 = vld [vmem:[#allocation36_spill] sm:$0xff]  ;;  %v5885_v56 = vld [vmem:[#allocation38_spill] sm:$0xff]  ;;  %v5886_v1 = vld [vmem:[#allocation39_spill] sm:$0xff] }
 0x2d7   :  { %4280 = vtanh.f32 %v5284_v16 }
 0x2de   :  { %v4277_v50 = vpop.eup %4276 }
 0x2df   :  { %v1330_v61 = vmul.f32 %v4277_v50, %v4275_v22  ;;  %v4279_v55 = vpop.eup %4278  ;;  %v5887_v22 = vld [vmem:[#allocation40_spill] sm:$0xff]  ;;  %v5888_v50 = vld [vmem:[#allocation41_spill] sm:$0xff] }
 0x2e1   :  { %v1341_v48 = vmul.f32 0.0, %v1330_v61  ;;  %v4281_v18 = vpop.eup %4280 }
 0x2e2   :  { %v1331_v49 = vmul.f32 %v4281_v18, %v4279_v55  ;;  %v5890_v55 = vld [vmem:[#allocation43_spill] sm:$0xff]  ;;  %v5892_v18 = vld [vmem:[#allocation45_spill] sm:$0xff] }
 0x2e3   :  { %1408 = vmatprep.mubr.f32.mxu1 %v1341_v48  ;;  %1485 = vmatprep.mubr.f32.mxu0 %v1341_v48  ;;  %v5891_v48 = vld [vmem:[#allocation44_spill] sm:$0xff] }
 0x2e4   :  { %1409 = vmatmul.mubr.f32.vlgmr.msra.gmra.mrb[2].mxu1 %v1330_v61  ;;  %1486 = vmatmul.mubr.f32.vlgmr.msra.gmra.mrb[18].mxu0 %v1330_v61  ;;  %v1342_v21 = vmul.f32 0.0, %v1331_v49  ;;  %v5889_v61 = vld [vmem:[#allocation42_spill] sm:$0xff] }
 0x2e5   :  { %1414 = vmatprep.mubr.f32.mxu1 %v1331_v49  ;;  %1491 = vmatprep.mubr.f32.mxu0 %v1331_v49  ;;  %v5893_v49 = vld [vmem:[#allocation46_spill] sm:$0xff] }
 0x2e6   :  { %3479 = vmatpush1.bf16.msra.mxu1 %v4953_v63  ;;  %3543 = vmatpush1.bf16.msra.mxu0 %v4955_v0 }
 0x2e7   :  { %3481 = vmatprep.subr.bf16.mxu1 %v4960_v5  ;;  %3545 = vmatprep.subr.bf16.mxu0 %v4962_v6 }
 0x2e8   :  { %1415 = vmatmul.mubr.f32.gmra.mrb[28].mxu1 %v1342_v21  ;;  %1492 = vmatmul.mubr.f32.gmra.mrb[44].mxu0 %v1342_v21  ;;  %v5894_v21 = vld [vmem:[#allocation47_spill] sm:$0xff] }
 0x2ea   :  { %3483 = vmatpush1.bf16.msra.mxu1 %v4968_v13  ;;  %3547 = vmatpush1.bf16.msra.mxu0 %v4970_v14 }
 0x2eb   :  { %3485 = vmatprep.subr.bf16.mxu1 %v4976_v19  ;;  %3549 = vmatprep.subr.bf16.mxu0 %v4978_v20 }
 0x2ee   :  { %3487 = vmatpush1.bf16.msra.mxu1 %v4984_v26  ;;  %3551 = vmatpush1.bf16.msra.mxu0 %v4986_v27 }
 0x2ef   :  { %3489 = vmatprep.subr.bf16.mxu1 %v4992_v7  ;;  %3553 = vmatprep.subr.bf16.mxu0 %v4994_v33 }
 0x2f2   :  { %3491 = vmatpush1.bf16.msra.mxu1 %v5000_v38  ;;  %3555 = vmatpush1.bf16.msra.mxu0 %v5002_v40 }
 0x2f3   :  { %3493 = vmatprep.subr.bf16.mxu1 %v5008_v24  ;;  %3557 = vmatprep.subr.bf16.mxu0 %v5010_v47 }
 0x2f6   :  { %3495 = vmatpush1.bf16.msra.mxu1 %v5016_v53  ;;  %3559 = vmatpush1.bf16.msra.mxu0 %v5018_v54 }
 0x2f7   :  { %3497 = vmatprep.subr.bf16.mxu1 %v5024_v41  ;;  %3561 = vmatprep.subr.bf16.mxu0 %v5026_v62 }
 0x2fa   :  { %3499 = vmatpush1.bf16.msra.mxu1 %v5032_v8  ;;  %3563 = vmatpush1.bf16.msra.mxu0 %v5034_v9 }
 0x2fb   :  { %3501 = vmatprep.subr.bf16.mxu1 %v5040_v59  ;;  %3565 = vmatprep.subr.bf16.mxu0 %v5042_v17 }
 0x2fe   :  { %3503 = vmatpush1.bf16.msra.mxu1 %v5048_v25  ;;  %3567 = vmatpush1.bf16.msra.mxu0 %v5050_v28 }
 0x2ff   :  { %3505 = vmatprep.subr.bf16.mxu1 %v5056_v35  ;;  %3569 = vmatprep.subr.bf16.mxu0 %v5058_v36 }
 0x302   :  { %3507 = vmatpush1.bf16.msra.mxu1 %v5064_v44  ;;  %3571 = vmatpush1.bf16.msra.mxu0 %v5066_v45 }
 0x303   :  { %3509 = vmatprep.subr.bf16.mxu1 %v5070_v51  ;;  %3573 = vmatprep.subr.bf16.mxu0 %v5072_v52 }
 0x306   :  { %3511 = vmatpush1.bf16.msra.mxu1 %v5080_v2  ;;  %3575 = vmatpush1.bf16.msra.mxu0 %v5082_v3 }
 0x307   :  { %3513 = vmatprep.subr.bf16.mxu1 %v5086_v11  ;;  %3577 = vmatprep.subr.bf16.mxu0 %v5088_v15 }
 0x30a   :  { %3515 = vmatpush1.bf16.msra.mxu1 %v5094_v31  ;;  %3579 = vmatpush1.bf16.msra.mxu0 %v5096_v32 }
 0x30b   :  { %3517 = vmatprep.subr.bf16.mxu1 %v5100_v37  ;;  %3581 = vmatprep.subr.bf16.mxu0 %v5102_v42 }
 0x30e   :  { %3519 = vmatpush1.bf16.msra.mxu1 %v5865_v57  ;;  %3583 = vmatpush1.bf16.msra.mxu0 %v5879_v34 }
 0x30f   :  { %3521 = vmatprep.subr.bf16.mxu1 %v5880_v46  ;;  %3585 = vmatprep.subr.bf16.mxu0 %v5881_v4  ;;  %v5903_v4 = vld [vmem:[#allocation55_spill] sm:$0xff] }
 0x312   :  { %3523 = vmatpush1.bf16.msra.mxu1 %v5882_v10  ;;  %3587 = vmatpush1.bf16.msra.mxu0 %v5883_v43  ;;  %v5902_v43 = vld [vmem:[#allocation54_spill] sm:$0xff] }
 0x313   :  { %3525 = vmatprep.subr.bf16.mxu1 %v5884_v39  ;;  %3589 = vmatprep.subr.bf16.mxu0 %v5885_v56  ;;  %v5895_v39 = vld [vmem:[#allocation48_spill] sm:$0xff]  ;;  %v5896_v56 = vld [vmem:[#allocation49_spill] sm:$0xff] }
 0x316   :  { %3527 = vmatpush1.bf16.msra.mxu1 %v5886_v1  ;;  %3591 = vmatpush1.bf16.msra.mxu0 %v5887_v22  ;;  %v5897_v1 = vld [vmem:[#allocation50_spill] sm:$0xff]  ;;  %v5898_v22 = vld [vmem:[#allocation51_spill] sm:$0xff] }
 0x317   :  { %3529 = vmatprep.subr.bf16.mxu1 %v5888_v50  ;;  %3593 = vmatprep.subr.bf16.mxu0 %v5889_v61  ;;  %v5899_v50 = vld [vmem:[#allocation52_spill] sm:$0xff]  ;;  %v5900_v61 = vld [vmem:[#allocation27_spill] sm:$0xff] }
 0x31a   :  { %3531 = vmatpush1.bf16.msra.mxu1 %v5890_v55  ;;  %3595 = vmatpush1.bf16.msra.mxu0 %v5891_v48  ;;  %v5901_v55 = vld [vmem:[#allocation28_spill] sm:$0xff] }
 0x31b   :  { %3533 = vmatprep.subr.bf16.mxu1 %v5892_v18  ;;  %3597 = vmatprep.subr.bf16.mxu0 %v5893_v49 }
 0x31e   :  { %3535 = vmatpush1.bf16.msra.mxu1 %v5894_v21  ;;  %3599 = vmatpush1.bf16.msra.mxu0 %v5895_v39 }
 0x31f   :  { %3537 = vmatprep.subr.bf16.mxu1 %v5896_v56  ;;  %3601 = vmatprep.subr.bf16.mxu0 %v5897_v1 }
 0x322   :  { %3539 = vmatpush1.bf16.msra.mxu1 %v5898_v22  ;;  %3603 = vmatpush1.bf16.msra.mxu0 %v5899_v50  ;;  %v5904_v22 = vld [vmem:[#allocation56_spill] sm:$0xff] }
 0x323   :  { %3605 = vmatprep.subr.bf16.mxu1 %v5900_v61  ;;  %3669 = vmatprep.subr.bf16.mxu0 %v5901_v55 }
 0x3b7   :  { %v1410_v48 = vpop.f32.mrb[2].mxu1  ;;  %v1487_v18 = vpop.f32.mrb[18].mxu0 }
 0x3b8   :  { %v4118_v49 = vadd.f32 %v1410_v48, %v5902_v43  ;;  %v1412_v10 = vpop.f32.mrb[3].mxu1  ;;  %v1489_v21 = vpop.f32.mrb[19].mxu0  ;;  %v4132_v48 = vadd.f32 %v1487_v18, %v5265_v60 }
 0x3b9   :  { %v4119_v39 = vadd.f32 %v1412_v10, %v5903_v4  ;;  %v4133_v10 = vadd.f32 %v1489_v21, %v5271_v30 }
 0x3ba   :  { %v2953_v46 = vmul.f32 -1.442695, %v4118_v49  ;;  %v2955_v49 = vmul.f32 -1.442695, %v4132_v48 }
 0x3bb   :  { %v2954_v56 = vmul.f32 -1.442695, %v4119_v39  ;;  %v1416_v34 = vpop.f32.mrb[28].mxu1  ;;  %v1493_v1 = vpop.f32.mrb[44].mxu0 }
 0x3bc   :  { %4282 = vpow2.f32 %v2953_v46  ;;  %v4154_v57 = vadd.f32 %v1416_v34, %v5904_v22  ;;  %v1418_v50 = vpop.f32.mrb[29].mxu1  ;;  %v1495_v42 = vpop.f32.mrb[45].mxu0  ;;  %v4168_v39 = vadd.f32 %v1493_v1, %v5274_v12 }
 0x3bd   :  { %v4155_v61 = vadd.f32 %v1418_v50, %v5262_v29  ;;  %4284 = vpow2.f32 %v2954_v56  ;;  %v4169_v46 = vadd.f32 %v1495_v42, %v5276_v23 }
 0x3be   :  { %v2956_v55 = vmul.f32 -1.442695, %v4154_v57  ;;  %v2958_v50 = vmul.f32 -1.442695, %v4168_v39 }
 0x3bf   :  { %v2957_v37 = vmul.f32 -1.442695, %v4155_v61 }
 0x3c0   :  { %4286 = vpow2.f32 %v2956_v55 }
 0x3c1   :  { %4288 = vpow2.f32 %v2957_v37 }
 0x3c2   :  { %4290 = vtanh.f32 %v4133_v10 }
 0x3c3   :  { %4292 = vpow2.f32 %v2955_v49 }
 0x3c6   :  { %v4283_v4 = vpop.eup %4282 }
 0x3c7   :  { %v1524_v34 = vadd.f32 1.0, %v4283_v4  ;;  %v4285_v22 = vpop.eup %4284 }
 0x3c8   :  { %v1525_v57 = vadd.f32 1.0, %v4285_v22 }
 0x3c9   :  { %4294 = vrcp.f32 %v1524_v34 }
 0x3ca   :  { %v4287_v56 = vpop.eup %4286  ;;  %4296 = vtanh.f32 %v4169_v46 }
 0x3cb   :  { %4298 = vrcp.f32 %v1525_v57  ;;  %v1527_v61 = vadd.f32 1.0, %v4287_v56  ;;  %v4289_v37 = vpop.eup %4288 }
 0x3cc   :  { %4300 = vpow2.f32 %v2958_v50  ;;  %v1528_v55 = vadd.f32 1.0, %v4289_v37  ;;  %v4291_v1 = vpop.eup %4290 }
 0x3cd   :  { %4302 = vrcp.f32 %v1527_v61  ;;  %v4293_v18 = vpop.eup %4292 }
 0x3ce   :  { %4304 = vrcp.f32 %v1528_v55  ;;  %v1526_v10 = vadd.f32 1.0, %v4293_v18 }
 0x3d0   :  { %4306 = vrcp.f32 %v1526_v10  ;;  %v5907_v10 = vld [vmem:[#allocation31_spill] sm:$0xff] }
 0x3d3   :  { %v4295_v21 = vpop.eup %4294 }
 0x3d4   :  { %v4297_v42 = vpop.eup %4296  ;;  %v1546_v4 = vmul.f32 %v4295_v21, %v4291_v1 }
 0x3d5   :  { %v4299_v48 = vpop.eup %4298 }
 0x3d6   :  { %v4301_v49 = vpop.eup %4300  ;;  %v1544_v39 = vmul.f32 %v4299_v48, %v5281_v58  ;;  %v5906_v48 = vld [vmem:[#allocation30_spill] sm:$0xff] }
 0x3d7   :  { %v4303_v22 = vpop.eup %4302  ;;  %v1529_v50 = vadd.f32 1.0, %v4301_v49  ;;  %v5908_v49 = vld [vmem:[#allocation32_spill] sm:$0xff] }
 0x3d8   :  { %v5360_v34 = vadd.f32 %v1546_v4, %v1544_v39  ;;  %v1547_v46 = vmul.f32 %v4303_v22, %v4297_v42  ;;  %v4305_v57 = vpop.eup %4304  ;;  %v5909_v39 = vld [vmem:[#allocation33_spill] sm:$0xff]  ;;  %v5910_v22 = vld [vmem:[#allocation34_spill] sm:$0xff] }
 0x3d9   :  { %v1545_v56 = vmul.f32 %v4305_v57, %v5284_v16  ;;  %v5905_v16 = vld [vmem:[#allocation29_spill] sm:$0xff]  ;;  %v5912_v57 = vld [vmem:[#allocation36_spill] sm:$0xff] }
 0x3da   :  { %4308 = vtanh.f32 %v5360_v34  ;;  %v4307_v37 = vpop.eup %4306 }
 0x3db   :  { %v5364_v61 = vadd.f32 %v1547_v46, %v1545_v56  ;;  %4310 = vrcp.f32 %v1529_v50  ;;  %v5911_v46 = vld [vmem:[#allocation35_spill] sm:$0xff]  ;;  %v5913_v50 = vld [vmem:[#allocation37_spill] sm:$0xff]  ;;  %v5914_v56 = vld [vmem:[#allocation38_spill] sm:$0xff] }
 0x3dd   :  { %4312 = vtanh.f32 %v5364_v61 }
 0x3e4   :  { %v4309_v55 = vpop.eup %4308 }
 0x3e5   :  { %v1552_v1 = vmul.f32 %v4309_v55, %v4307_v37  ;;  %v4311_v58 = vpop.eup %4310  ;;  %v5915_v37 = vld [vmem:[#allocation39_spill] sm:$0xff]  ;;  %v5916_v55 = vld [vmem:[#allocation40_spill] sm:$0xff] }
 0x3e7   :  { %v1563_v18 = vmul.f32 0.0, %v1552_v1  ;;  %v4313_v21 = vpop.eup %4312 }
 0x3e8   :  { %v1553_v42 = vmul.f32 %v4313_v21, %v4311_v58  ;;  %v5918_v58 = vld [vmem:[#allocation42_spill] sm:$0xff]  ;;  %v5920_v21 = vld [vmem:[#allocation44_spill] sm:$0xff] }
 0x3e9   :  { %1630 = vmatprep.mubr.f32.mxu1 %v1563_v18  ;;  %1707 = vmatprep.mubr.f32.mxu0 %v1563_v18  ;;  %v5919_v18 = vld [vmem:[#allocation43_spill] sm:$0xff] }
 0x3ea   :  { %1631 = vmatmul.mubr.f32.vlgmr.msra.gmra.mrb[4].mxu1 %v1552_v1  ;;  %1708 = vmatmul.mubr.f32.vlgmr.msra.gmra.mrb[20].mxu0 %v1552_v1  ;;  %v1564_v4 = vmul.f32 0.0, %v1553_v42  ;;  %v5917_v1 = vld [vmem:[#allocation41_spill] sm:$0xff] }
 0x3eb   :  { %1636 = vmatprep.mubr.f32.mxu1 %v1553_v42  ;;  %1713 = vmatprep.mubr.f32.mxu0 %v1553_v42  ;;  %v5921_v42 = vld [vmem:[#allocation45_spill] sm:$0xff] }
 0x3ec   :  { %3607 = vmatpush1.bf16.msra.mxu1 %v4953_v63  ;;  %3671 = vmatpush1.bf16.msra.mxu0 %v4955_v0 }
 0x3ed   :  { %3609 = vmatprep.subr.bf16.mxu1 %v4960_v5  ;;  %3673 = vmatprep.subr.bf16.mxu0 %v4962_v6 }
 0x3ee   :  { %1637 = vmatmul.mubr.f32.gmra.mrb[26].mxu1 %v1564_v4  ;;  %1714 = vmatmul.mubr.f32.gmra.mrb[42].mxu0 %v1564_v4  ;;  %v5922_v4 = vld [vmem:[#allocation46_spill] sm:$0xff] }
 0x3f0   :  { %3611 = vmatpush1.bf16.msra.mxu1 %v4968_v13  ;;  %3675 = vmatpush1.bf16.msra.mxu0 %v4970_v14 }
 0x3f1   :  { %3613 = vmatprep.subr.bf16.mxu1 %v4976_v19  ;;  %3677 = vmatprep.subr.bf16.mxu0 %v4978_v20 }
 0x3f4   :  { %3615 = vmatpush1.bf16.msra.mxu1 %v4984_v26  ;;  %3679 = vmatpush1.bf16.msra.mxu0 %v4986_v27 }
 0x3f5   :  { %3617 = vmatprep.subr.bf16.mxu1 %v4992_v7  ;;  %3681 = vmatprep.subr.bf16.mxu0 %v4994_v33 }
 0x3f8   :  { %3619 = vmatpush1.bf16.msra.mxu1 %v5000_v38  ;;  %3683 = vmatpush1.bf16.msra.mxu0 %v5002_v40 }
 0x3f9   :  { %3621 = vmatprep.subr.bf16.mxu1 %v5008_v24  ;;  %3685 = vmatprep.subr.bf16.mxu0 %v5010_v47 }
 0x3fc   :  { %3623 = vmatpush1.bf16.msra.mxu1 %v5016_v53  ;;  %3687 = vmatpush1.bf16.msra.mxu0 %v5018_v54 }
 0x3fd   :  { %3625 = vmatprep.subr.bf16.mxu1 %v5024_v41  ;;  %3689 = vmatprep.subr.bf16.mxu0 %v5026_v62 }
 0x400   :  { %3627 = vmatpush1.bf16.msra.mxu1 %v5032_v8  ;;  %3691 = vmatpush1.bf16.msra.mxu0 %v5034_v9 }
 0x401   :  { %3629 = vmatprep.subr.bf16.mxu1 %v5040_v59  ;;  %3693 = vmatprep.subr.bf16.mxu0 %v5042_v17 }
 0x404   :  { %3631 = vmatpush1.bf16.msra.mxu1 %v5048_v25  ;;  %3695 = vmatpush1.bf16.msra.mxu0 %v5050_v28 }
 0x405   :  { %3633 = vmatprep.subr.bf16.mxu1 %v5056_v35  ;;  %3697 = vmatprep.subr.bf16.mxu0 %v5058_v36 }
 0x408   :  { %3635 = vmatpush1.bf16.msra.mxu1 %v5064_v44  ;;  %3699 = vmatpush1.bf16.msra.mxu0 %v5066_v45 }
 0x409   :  { %3637 = vmatprep.subr.bf16.mxu1 %v5070_v51  ;;  %3701 = vmatprep.subr.bf16.mxu0 %v5072_v52 }
 0x40c   :  { %3639 = vmatpush1.bf16.msra.mxu1 %v5080_v2  ;;  %3703 = vmatpush1.bf16.msra.mxu0 %v5082_v3 }
 0x40d   :  { %3641 = vmatprep.subr.bf16.mxu1 %v5086_v11  ;;  %3705 = vmatprep.subr.bf16.mxu0 %v5088_v15 }
 0x410   :  { %3643 = vmatpush1.bf16.msra.mxu1 %v5094_v31  ;;  %3707 = vmatpush1.bf16.msra.mxu0 %v5096_v32 }
 0x411   :  { %3645 = vmatprep.subr.bf16.mxu1 %v5905_v16  ;;  %3709 = vmatprep.subr.bf16.mxu0 %v5906_v48 }
 0x414   :  { %3647 = vmatpush1.bf16.msra.mxu1 %v5907_v10  ;;  %3711 = vmatpush1.bf16.msra.mxu0 %v5908_v49 }
 0x415   :  { %3649 = vmatprep.subr.bf16.mxu1 %v5909_v39  ;;  %3713 = vmatprep.subr.bf16.mxu0 %v5910_v22  ;;  %v5931_v22 = vld [vmem:[#allocation55_spill] sm:$0xff] }
 0x418   :  { %3651 = vmatpush1.bf16.msra.mxu1 %v5911_v46  ;;  %3715 = vmatpush1.bf16.msra.mxu0 %v5912_v57  ;;  %v5923_v57 = vld [vmem:[#allocation47_spill] sm:$0xff] }
 0x419   :  { %3653 = vmatprep.subr.bf16.mxu1 %v5913_v50  ;;  %3717 = vmatprep.subr.bf16.mxu0 %v5914_v56  ;;  %v5924_v50 = vld [vmem:[#allocation48_spill] sm:$0xff]  ;;  %v5925_v56 = vld [vmem:[#allocation49_spill] sm:$0xff] }
 0x41c   :  { %3655 = vmatpush1.bf16.msra.mxu1 %v5915_v37  ;;  %3719 = vmatpush1.bf16.msra.mxu0 %v5916_v55  ;;  %v5926_v37 = vld [vmem:[#allocation50_spill] sm:$0xff]  ;;  %v5927_v55 = vld [vmem:[#allocation51_spill] sm:$0xff] }
 0x41d   :  { %3657 = vmatprep.subr.bf16.mxu1 %v5917_v1  ;;  %3721 = vmatprep.subr.bf16.mxu0 %v5918_v58  ;;  %v5928_v1 = vld [vmem:[#allocation52_spill] sm:$0xff]  ;;  %v5929_v58 = vld [vmem:[#allocation27_spill] sm:$0xff] }
 0x420   :  { %3659 = vmatpush1.bf16.msra.mxu1 %v5919_v18  ;;  %3723 = vmatpush1.bf16.msra.mxu0 %v5920_v21  ;;  %v5930_v18 = vld [vmem:[#allocation28_spill] sm:$0xff] }
 0x421   :  { %3661 = vmatprep.subr.bf16.mxu1 %v5921_v42  ;;  %3725 = vmatprep.subr.bf16.mxu0 %v5922_v4 }
 0x424   :  { %3663 = vmatpush1.bf16.msra.mxu1 %v5923_v57  ;;  %3727 = vmatpush1.bf16.msra.mxu0 %v5924_v50 }
 0x425   :  { %3665 = vmatprep.subr.bf16.mxu1 %v5925_v56  ;;  %3729 = vmatprep.subr.bf16.mxu0 %v5926_v37 }
 0x428   :  { %3667 = vmatpush1.bf16.msra.mxu1 %v5927_v55  ;;  %3731 = vmatpush1.bf16.msra.mxu0 %v5928_v1  ;;  %v5932_v55 = vld [vmem:[#allocation56_spill] sm:$0xff] }
 0x429   :  { %3733 = vmatprep.subr.bf16.mxu1 %v5929_v58  ;;  %3797 = vmatprep.subr.bf16.mxu0 %v5930_v18 }
 0x4bd   :  { %v1632_v21 = vpop.f32.mrb[4].mxu1  ;;  %v1709_v42 = vpop.f32.mrb[20].mxu0 }
 0x4be   :  { %v4120_v4 = vadd.f32 %v1632_v21, %v5902_v43  ;;  %v1634_v46 = vpop.f32.mrb[5].mxu1  ;;  %v1711_v57 = vpop.f32.mrb[21].mxu0  ;;  %v4134_v21 = vadd.f32 %v1709_v42, %v5265_v60 }
 0x4bf   :  { %v4121_v50 = vadd.f32 %v1634_v46, %v5931_v22  ;;  %v4135_v46 = vadd.f32 %v1711_v57, %v5271_v30 }
 0x4c0   :  { %v2959_v39 = vmul.f32 -1.442695, %v4120_v4  ;;  %v2961_v4 = vmul.f32 -1.442695, %v4134_v21 }
 0x4c1   :  { %v2960_v56 = vmul.f32 -1.442695, %v4121_v50  ;;  %v1638_v49 = vpop.f32.mrb[26].mxu1  ;;  %v1715_v37 = vpop.f32.mrb[42].mxu0 }
 0x4c2   :  { %4314 = vpow2.f32 %v2959_v39  ;;  %v4152_v10 = vadd.f32 %v1638_v49, %v5932_v55  ;;  %v1640_v1 = vpop.f32.mrb[27].mxu1  ;;  %v1717_v48 = vpop.f32.mrb[43].mxu0  ;;  %v4166_v50 = vadd.f32 %v1715_v37, %v5274_v12 }
 0x4c3   :  { %v4153_v58 = vadd.f32 %v1640_v1, %v5262_v29  ;;  %4316 = vpow2.f32 %v2960_v56  ;;  %v4167_v39 = vadd.f32 %v1717_v48, %v5276_v23 }
 0x4c4   :  { %v2962_v18 = vmul.f32 -1.442695, %v4152_v10  ;;  %v2964_v1 = vmul.f32 -1.442695, %v4166_v50 }
 0x4c5   :  { %v2963_v16 = vmul.f32 -1.442695, %v4153_v58 }
 0x4c6   :  { %4318 = vpow2.f32 %v2962_v18 }
 0x4c7   :  { %4320 = vpow2.f32 %v2963_v16 }
 0x4c8   :  { %4322 = vtanh.f32 %v4135_v46 }
 0x4c9   :  { %4324 = vpow2.f32 %v2961_v4 }
 0x4cc   :  { %v4315_v22 = vpop.eup %4314 }
 0x4cd   :  { %v1746_v49 = vadd.f32 1.0, %v4315_v22  ;;  %v4317_v55 = vpop.eup %4316 }
 0x4ce   :  { %v1747_v10 = vadd.f32 1.0, %v4317_v55 }
 0x4cf   :  { %4326 = vrcp.f32 %v1746_v49 }
 0x4d0   :  { %v4319_v56 = vpop.eup %4318  ;;  %4328 = vtanh.f32 %v4167_v39 }
 0x4d1   :  { %4330 = vrcp.f32 %v1747_v10  ;;  %v1749_v58 = vadd.f32 1.0, %v4319_v56  ;;  %v4321_v16 = vpop.eup %4320 }
 0x4d2   :  { %4332 = vpow2.f32 %v2964_v1  ;;  %v1750_v57 = vadd.f32 1.0, %v4321_v16  ;;  %v4323_v37 = vpop.eup %4322 }
 0x4d3   :  { %4334 = vrcp.f32 %v1749_v58  ;;  %v4325_v18 = vpop.eup %4324 }
 0x4d4   :  { %4336 = vrcp.f32 %v1750_v57  ;;  %v1748_v46 = vadd.f32 1.0, %v4325_v18 }
 0x4d6   :  { %4338 = vrcp.f32 %v1748_v46  ;;  %v5935_v46 = vld [vmem:[#allocation31_spill] sm:$0xff] }
 0x4d9   :  { %v4327_v42 = vpop.eup %4326 }
 0x4da   :  { %v4329_v48 = vpop.eup %4328  ;;  %v1768_v22 = vmul.f32 %v4327_v42, %v4323_v37 }
 0x4db   :  { %v4331_v21 = vpop.eup %4330 }
 0x4dc   :  { %v4333_v4 = vpop.eup %4332  ;;  %v1766_v50 = vmul.f32 %v4331_v21, %v5360_v34  ;;  %v5934_v21 = vld [vmem:[#allocation30_spill] sm:$0xff] }
 0x4dd   :  { %v4335_v55 = vpop.eup %4334  ;;  %v1751_v1 = vadd.f32 1.0, %v4333_v4  ;;  %v5936_v4 = vld [vmem:[#allocation32_spill] sm:$0xff] }
 0x4de   :  { %v5440_v49 = vadd.f32 %v1768_v22, %v1766_v50  ;;  %v1769_v39 = vmul.f32 %v4335_v55, %v4329_v48  ;;  %v4337_v10 = vpop.eup %4336  ;;  %v5937_v50 = vld [vmem:[#allocation33_spill] sm:$0xff]  ;;  %v5938_v55 = vld [vmem:[#allocation34_spill] sm:$0xff] }
 0x4df   :  { %v1767_v56 = vmul.f32 %v4337_v10, %v5364_v61  ;;  %v5933_v61 = vld [vmem:[#allocation29_spill] sm:$0xff]  ;;  %v5940_v10 = vld [vmem:[#allocation36_spill] sm:$0xff] }
 0x4e0   :  { %4340 = vtanh.f32 %v5440_v49  ;;  %v4339_v16 = vpop.eup %4338 }
 0x4e1   :  { %v5444_v58 = vadd.f32 %v1769_v39, %v1767_v56  ;;  %4342 = vrcp.f32 %v1751_v1  ;;  %v5939_v39 = vld [vmem:[#allocation35_spill] sm:$0xff]  ;;  %v5941_v1 = vld [vmem:[#allocation37_spill] sm:$0xff]  ;;  %v5942_v56 = vld [vmem:[#allocation38_spill] sm:$0xff] }
 0x4e3   :  { %4344 = vtanh.f32 %v5444_v58 }
 0x4ea   :  { %v4341_v57 = vpop.eup %4340 }
 0x4eb   :  { %v1774_v37 = vmul.f32 %v4341_v57, %v4339_v16  ;;  %v4343_v34 = vpop.eup %4342  ;;  %v5943_v16 = vld [vmem:[#allocation39_spill] sm:$0xff]  ;;  %v5944_v57 = vld [vmem:[#allocation40_spill] sm:$0xff] }
 0x4ed   :  { %v1785_v18 = vmul.f32 0.0, %v1774_v37  ;;  %v4345_v42 = vpop.eup %4344 }
 0x4ee   :  { %v1775_v48 = vmul.f32 %v4345_v42, %v4343_v34  ;;  %v5946_v34 = vld [vmem:[#allocation42_spill] sm:$0xff]  ;;  %v5948_v42 = vld [vmem:[#allocation44_spill] sm:$0xff] }
 0x4ef   :  { %1852 = vmatprep.mubr.f32.mxu1 %v1785_v18  ;;  %1929 = vmatprep.mubr.f32.mxu0 %v1785_v18  ;;  %v5947_v18 = vld [vmem:[#allocation43_spill] sm:$0xff] }
 0x4f0   :  { %1853 = vmatmul.mubr.f32.vlgmr.msra.gmra.mrb[6].mxu1 %v1774_v37  ;;  %1930 = vmatmul.mubr.f32.vlgmr.msra.gmra.mrb[22].mxu0 %v1774_v37  ;;  %v1786_v22 = vmul.f32 0.0, %v1775_v48  ;;  %v5945_v37 = vld [vmem:[#allocation41_spill] sm:$0xff] }
 0x4f1   :  { %1858 = vmatprep.mubr.f32.mxu1 %v1775_v48  ;;  %1935 = vmatprep.mubr.f32.mxu0 %v1775_v48  ;;  %v5949_v48 = vld [vmem:[#allocation45_spill] sm:$0xff] }
 0x4f2   :  { %3735 = vmatpush1.bf16.msra.mxu1 %v4953_v63  ;;  %3799 = vmatpush1.bf16.msra.mxu0 %v4955_v0 }
 0x4f3   :  { %3737 = vmatprep.subr.bf16.mxu1 %v4960_v5  ;;  %3801 = vmatprep.subr.bf16.mxu0 %v4962_v6 }
 0x4f4   :  { %1859 = vmatmul.mubr.f32.gmra.mrb[24].mxu1 %v1786_v22  ;;  %1936 = vmatmul.mubr.f32.gmra.mrb[40].mxu0 %v1786_v22  ;;  %v5950_v22 = vld [vmem:[#allocation46_spill] sm:$0xff] }
 0x4f6   :  { %3739 = vmatpush1.bf16.msra.mxu1 %v4968_v13  ;;  %3803 = vmatpush1.bf16.msra.mxu0 %v4970_v14 }
 0x4f7   :  { %3741 = vmatprep.subr.bf16.mxu1 %v4976_v19  ;;  %3805 = vmatprep.subr.bf16.mxu0 %v4978_v20 }
 0x4fa   :  { %3743 = vmatpush1.bf16.msra.mxu1 %v4984_v26  ;;  %3807 = vmatpush1.bf16.msra.mxu0 %v4986_v27 }
 0x4fb   :  { %3745 = vmatprep.subr.bf16.mxu1 %v4992_v7  ;;  %3809 = vmatprep.subr.bf16.mxu0 %v4994_v33 }
 0x4fe   :  { %3747 = vmatpush1.bf16.msra.mxu1 %v5000_v38  ;;  %3811 = vmatpush1.bf16.msra.mxu0 %v5002_v40 }
 0x4ff   :  { %3749 = vmatprep.subr.bf16.mxu1 %v5008_v24  ;;  %3813 = vmatprep.subr.bf16.mxu0 %v5010_v47 }
 0x502   :  { %3751 = vmatpush1.bf16.msra.mxu1 %v5016_v53  ;;  %3815 = vmatpush1.bf16.msra.mxu0 %v5018_v54 }
 0x503   :  { %3753 = vmatprep.subr.bf16.mxu1 %v5024_v41  ;;  %3817 = vmatprep.subr.bf16.mxu0 %v5026_v62 }
 0x506   :  { %3755 = vmatpush1.bf16.msra.mxu1 %v5032_v8  ;;  %3819 = vmatpush1.bf16.msra.mxu0 %v5034_v9 }
 0x507   :  { %3757 = vmatprep.subr.bf16.mxu1 %v5040_v59  ;;  %3821 = vmatprep.subr.bf16.mxu0 %v5042_v17 }
 0x50a   :  { %3759 = vmatpush1.bf16.msra.mxu1 %v5048_v25  ;;  %3823 = vmatpush1.bf16.msra.mxu0 %v5050_v28 }
 0x50b   :  { %3761 = vmatprep.subr.bf16.mxu1 %v5056_v35  ;;  %3825 = vmatprep.subr.bf16.mxu0 %v5058_v36 }
 0x50e   :  { %3763 = vmatpush1.bf16.msra.mxu1 %v5064_v44  ;;  %3827 = vmatpush1.bf16.msra.mxu0 %v5066_v45 }
 0x50f   :  { %3765 = vmatprep.subr.bf16.mxu1 %v5070_v51  ;;  %3829 = vmatprep.subr.bf16.mxu0 %v5072_v52 }
 0x512   :  { %3767 = vmatpush1.bf16.msra.mxu1 %v5080_v2  ;;  %3831 = vmatpush1.bf16.msra.mxu0 %v5082_v3 }
 0x513   :  { %3769 = vmatprep.subr.bf16.mxu1 %v5086_v11  ;;  %3833 = vmatprep.subr.bf16.mxu0 %v5088_v15 }
 0x516   :  { %3771 = vmatpush1.bf16.msra.mxu1 %v5094_v31  ;;  %3835 = vmatpush1.bf16.msra.mxu0 %v5096_v32 }
 0x517   :  { %3773 = vmatprep.subr.bf16.mxu1 %v5933_v61  ;;  %3837 = vmatprep.subr.bf16.mxu0 %v5934_v21 }
 0x51a   :  { %3775 = vmatpush1.bf16.msra.mxu1 %v5935_v46  ;;  %3839 = vmatpush1.bf16.msra.mxu0 %v5936_v4 }
 0x51b   :  { %3777 = vmatprep.subr.bf16.mxu1 %v5937_v50  ;;  %3841 = vmatprep.subr.bf16.mxu0 %v5938_v55  ;;  %v5959_v55 = vld [vmem:[#allocation55_spill] sm:$0xff] }
 0x51e   :  { %3779 = vmatpush1.bf16.msra.mxu1 %v5939_v39  ;;  %3843 = vmatpush1.bf16.msra.mxu0 %v5940_v10  ;;  %v5951_v10 = vld [vmem:[#allocation47_spill] sm:$0xff] }
 0x51f   :  { %3781 = vmatprep.subr.bf16.mxu1 %v5941_v1  ;;  %3845 = vmatprep.subr.bf16.mxu0 %v5942_v56  ;;  %v5952_v1 = vld [vmem:[#allocation48_spill] sm:$0xff]  ;;  %v5953_v56 = vld [vmem:[#allocation49_spill] sm:$0xff] }
 0x522   :  { %3783 = vmatpush1.bf16.msra.mxu1 %v5943_v16  ;;  %3847 = vmatpush1.bf16.msra.mxu0 %v5944_v57  ;;  %v5954_v16 = vld [vmem:[#allocation50_spill] sm:$0xff]  ;;  %v5955_v57 = vld [vmem:[#allocation51_spill] sm:$0xff] }
 0x523   :  { %3785 = vmatprep.subr.bf16.mxu1 %v5945_v37  ;;  %3849 = vmatprep.subr.bf16.mxu0 %v5946_v34  ;;  %v5956_v37 = vld [vmem:[#allocation52_spill] sm:$0xff]  ;;  %v5957_v34 = vld [vmem:[#allocation27_spill] sm:$0xff] }
 0x526   :  { %3787 = vmatpush1.bf16.msra.mxu1 %v5947_v18  ;;  %3851 = vmatpush1.bf16.msra.mxu0 %v5948_v42  ;;  %v5958_v18 = vld [vmem:[#allocation28_spill] sm:$0xff] }
 0x527   :  { %3789 = vmatprep.subr.bf16.mxu1 %v5949_v48  ;;  %3853 = vmatprep.subr.bf16.mxu0 %v5950_v22 }
 0x52a   :  { %3791 = vmatpush1.bf16.msra.mxu1 %v5951_v10  ;;  %3855 = vmatpush1.bf16.msra.mxu0 %v5952_v1 }
 0x52b   :  { %3793 = vmatprep.subr.bf16.mxu1 %v5953_v56  ;;  %3857 = vmatprep.subr.bf16.mxu0 %v5954_v16 }
 0x52e   :  { %3795 = vmatpush1.bf16.msra.mxu1 %v5955_v57  ;;  %3859 = vmatpush1.bf16.msra.mxu0 %v5956_v37  ;;  %v5960_v57 = vld [vmem:[#allocation56_spill] sm:$0xff] }
 0x52f   :  { %3861 = vmatprep.subr.bf16.mxu1 %v5957_v34  ;;  %3925 = vmatprep.subr.bf16.mxu0 %v5958_v18 }
 0x5c3   :  { %v1854_v42 = vpop.f32.mrb[6].mxu1  ;;  %v1931_v48 = vpop.f32.mrb[22].mxu0 }
 0x5c4   :  { %v4122_v22 = vadd.f32 %v1854_v42, %v5902_v43  ;;  %v1856_v39 = vpop.f32.mrb[7].mxu1  ;;  %v1933_v10 = vpop.f32.mrb[23].mxu0  ;;  %v4136_v42 = vadd.f32 %v1931_v48, %v5265_v60 }
 0x5c5   :  { %v4123_v1 = vadd.f32 %v1856_v39, %v5959_v55  ;;  %v4137_v39 = vadd.f32 %v1933_v10, %v5271_v30 }
 0x5c6   :  { %v2965_v50 = vmul.f32 -1.442695, %v4122_v22  ;;  %v2967_v22 = vmul.f32 -1.442695, %v4136_v42 }
 0x5c7   :  { %v2966_v56 = vmul.f32 -1.442695, %v4123_v1  ;;  %v1860_v4 = vpop.f32.mrb[24].mxu1  ;;  %v1937_v16 = vpop.f32.mrb[40].mxu0 }
 0x5c8   :  { %4346 = vpow2.f32 %v2965_v50  ;;  %v4150_v46 = vadd.f32 %v1860_v4, %v5960_v57  ;;  %v1862_v37 = vpop.f32.mrb[25].mxu1  ;;  %v1939_v21 = vpop.f32.mrb[41].mxu0  ;;  %v4164_v1 = vadd.f32 %v1937_v16, %v5274_v12 }
 0x5c9   :  { %v4151_v34 = vadd.f32 %v1862_v37, %v5262_v29  ;;  %4348 = vpow2.f32 %v2966_v56  ;;  %v4165_v50 = vadd.f32 %v1939_v21, %v5276_v23 }
 0x5ca   :  { %v2968_v18 = vmul.f32 -1.442695, %v4150_v46  ;;  %v2970_v37 = vmul.f32 -1.442695, %v4164_v1 }
 0x5cb   :  { %v2969_v61 = vmul.f32 -1.442695, %v4151_v34 }
 0x5cc   :  { %4350 = vpow2.f32 %v2968_v18 }
 0x5cd   :  { %4352 = vpow2.f32 %v2969_v61 }
 0x5ce   :  { %4354 = vtanh.f32 %v4137_v39 }
 0x5cf   :  { %4356 = vpow2.f32 %v2967_v22 }
 0x5d2   :  { %v4347_v55 = vpop.eup %4346 }
 0x5d3   :  { %v1968_v4 = vadd.f32 1.0, %v4347_v55  ;;  %v4349_v57 = vpop.eup %4348 }
 0x5d4   :  { %v1969_v46 = vadd.f32 1.0, %v4349_v57 }
 0x5d5   :  { %4358 = vrcp.f32 %v1968_v4 }
 0x5d6   :  { %v4351_v56 = vpop.eup %4350  ;;  %4360 = vtanh.f32 %v4165_v50 }
 0x5d7   :  { %4362 = vrcp.f32 %v1969_v46  ;;  %v1971_v34 = vadd.f32 1.0, %v4351_v56  ;;  %v4353_v61 = vpop.eup %4352 }
 0x5d8   :  { %4364 = vpow2.f32 %v2970_v37  ;;  %v1972_v10 = vadd.f32 1.0, %v4353_v61  ;;  %v4355_v16 = vpop.eup %4354 }
 0x5d9   :  { %4366 = vrcp.f32 %v1971_v34  ;;  %v4357_v18 = vpop.eup %4356 }
 0x5da   :  { %4368 = vrcp.f32 %v1972_v10  ;;  %v1970_v39 = vadd.f32 1.0, %v4357_v18 }
 0x5dc   :  { %4370 = vrcp.f32 %v1970_v39  ;;  %v5963_v39 = vld [vmem:[#allocation31_spill] sm:$0xff] }
 0x5df   :  { %v4359_v48 = vpop.eup %4358 }
 0x5e0   :  { %v4361_v21 = vpop.eup %4360  ;;  %v1990_v55 = vmul.f32 %v4359_v48, %v4355_v16 }
 0x5e1   :  { %v4363_v42 = vpop.eup %4362 }
 0x5e2   :  { %v4365_v22 = vpop.eup %4364  ;;  %v1988_v1 = vmul.f32 %v4363_v42, %v5440_v49  ;;  %v5962_v42 = vld [vmem:[#allocation30_spill] sm:$0xff] }
 0x5e3   :  { %v4367_v57 = vpop.eup %4366  ;;  %v1973_v37 = vadd.f32 1.0, %v4365_v22  ;;  %v5964_v22 = vld [vmem:[#allocation32_spill] sm:$0xff] }
 0x5e4   :  { %v5520_v4 = vadd.f32 %v1990_v55, %v1988_v1  ;;  %v1991_v50 = vmul.f32 %v4367_v57, %v4361_v21  ;;  %v4369_v46 = vpop.eup %4368  ;;  %v5965_v1 = vld [vmem:[#allocation33_spill] sm:$0xff]  ;;  %v5966_v57 = vld [vmem:[#allocation34_spill] sm:$0xff] }
 0x5e5   :  { %v1989_v56 = vmul.f32 %v4369_v46, %v5444_v58  ;;  %v5961_v58 = vld [vmem:[#allocation29_spill] sm:$0xff]  ;;  %v5968_v46 = vld [vmem:[#allocation36_spill] sm:$0xff] }
 0x5e6   :  { %4372 = vtanh.f32 %v5520_v4  ;;  %v4371_v61 = vpop.eup %4370 }
 0x5e7   :  { %v5524_v34 = vadd.f32 %v1991_v50, %v1989_v56  ;;  %4374 = vrcp.f32 %v1973_v37  ;;  %v5967_v50 = vld [vmem:[#allocation35_spill] sm:$0xff]  ;;  %v5969_v37 = vld [vmem:[#allocation37_spill] sm:$0xff]  ;;  %v5970_v56 = vld [vmem:[#allocation38_spill] sm:$0xff] }
 0x5e9   :  { %4376 = vtanh.f32 %v5524_v34 }
 0x5f0   :  { %v4373_v10 = vpop.eup %4372 }
 0x5f1   :  { %v1996_v16 = vmul.f32 %v4373_v10, %v4371_v61  ;;  %v4375_v49 = vpop.eup %4374  ;;  %v5971_v61 = vld [vmem:[#allocation39_spill] sm:$0xff]  ;;  %v5972_v10 = vld [vmem:[#allocation40_spill] sm:$0xff] }
 0x5f3   :  { %v2007_v18 = vmul.f32 0.0, %v1996_v16  ;;  %v4377_v48 = vpop.eup %4376 }
 0x5f4   :  { %v1997_v21 = vmul.f32 %v4377_v48, %v4375_v49  ;;  %v5974_v49 = vld [vmem:[#allocation42_spill] sm:$0xff]  ;;  %v5976_v48 = vld [vmem:[#allocation44_spill] sm:$0xff] }
 0x5f5   :  { %2074 = vmatprep.mubr.f32.mxu1 %v2007_v18  ;;  %2151 = vmatprep.mubr.f32.mxu0 %v2007_v18  ;;  %v5975_v18 = vld [vmem:[#allocation43_spill] sm:$0xff] }
 0x5f6   :  { %2075 = vmatmul.mubr.f32.vlgmr.msra.gmra.mrb[8].mxu1 %v1996_v16  ;;  %2152 = vmatmul.mubr.f32.vlgmr.msra.gmra.mrb[24].mxu0 %v1996_v16  ;;  %v2008_v55 = vmul.f32 0.0, %v1997_v21  ;;  %v5973_v16 = vld [vmem:[#allocation41_spill] sm:$0xff] }
 0x5f7   :  { %2080 = vmatprep.mubr.f32.mxu1 %v1997_v21  ;;  %2157 = vmatprep.mubr.f32.mxu0 %v1997_v21  ;;  %v5977_v21 = vld [vmem:[#allocation45_spill] sm:$0xff] }
 0x5f8   :  { %3863 = vmatpush1.bf16.msra.mxu1 %v4953_v63  ;;  %3927 = vmatpush1.bf16.msra.mxu0 %v4955_v0 }
 0x5f9   :  { %3865 = vmatprep.subr.bf16.mxu1 %v4960_v5  ;;  %3929 = vmatprep.subr.bf16.mxu0 %v4962_v6 }
 0x5fa   :  { %2081 = vmatmul.mubr.f32.gmra.mrb[22].mxu1 %v2008_v55  ;;  %2158 = vmatmul.mubr.f32.gmra.mrb[38].mxu0 %v2008_v55  ;;  %v5978_v55 = vld [vmem:[#allocation46_spill] sm:$0xff] }
 0x5fc   :  { %3867 = vmatpush1.bf16.msra.mxu1 %v4968_v13  ;;  %3931 = vmatpush1.bf16.msra.mxu0 %v4970_v14 }
 0x5fd   :  { %3869 = vmatprep.subr.bf16.mxu1 %v4976_v19  ;;  %3933 = vmatprep.subr.bf16.mxu0 %v4978_v20 }
 0x600   :  { %3871 = vmatpush1.bf16.msra.mxu1 %v4984_v26  ;;  %3935 = vmatpush1.bf16.msra.mxu0 %v4986_v27 }
 0x601   :  { %3873 = vmatprep.subr.bf16.mxu1 %v4992_v7  ;;  %3937 = vmatprep.subr.bf16.mxu0 %v4994_v33 }
 0x604   :  { %3875 = vmatpush1.bf16.msra.mxu1 %v5000_v38  ;;  %3939 = vmatpush1.bf16.msra.mxu0 %v5002_v40 }
 0x605   :  { %3877 = vmatprep.subr.bf16.mxu1 %v5008_v24  ;;  %3941 = vmatprep.subr.bf16.mxu0 %v5010_v47 }
 0x608   :  { %3879 = vmatpush1.bf16.msra.mxu1 %v5016_v53  ;;  %3943 = vmatpush1.bf16.msra.mxu0 %v5018_v54 }
 0x609   :  { %3881 = vmatprep.subr.bf16.mxu1 %v5024_v41  ;;  %3945 = vmatprep.subr.bf16.mxu0 %v5026_v62 }
 0x60c   :  { %3883 = vmatpush1.bf16.msra.mxu1 %v5032_v8  ;;  %3947 = vmatpush1.bf16.msra.mxu0 %v5034_v9 }
 0x60d   :  { %3885 = vmatprep.subr.bf16.mxu1 %v5040_v59  ;;  %3949 = vmatprep.subr.bf16.mxu0 %v5042_v17 }
 0x610   :  { %3887 = vmatpush1.bf16.msra.mxu1 %v5048_v25  ;;  %3951 = vmatpush1.bf16.msra.mxu0 %v5050_v28 }
 0x611   :  { %3889 = vmatprep.subr.bf16.mxu1 %v5056_v35  ;;  %3953 = vmatprep.subr.bf16.mxu0 %v5058_v36 }
 0x614   :  { %3891 = vmatpush1.bf16.msra.mxu1 %v5064_v44  ;;  %3955 = vmatpush1.bf16.msra.mxu0 %v5066_v45 }
 0x615   :  { %3893 = vmatprep.subr.bf16.mxu1 %v5070_v51  ;;  %3957 = vmatprep.subr.bf16.mxu0 %v5072_v52 }
 0x618   :  { %3895 = vmatpush1.bf16.msra.mxu1 %v5080_v2  ;;  %3959 = vmatpush1.bf16.msra.mxu0 %v5082_v3 }
 0x619   :  { %3897 = vmatprep.subr.bf16.mxu1 %v5086_v11  ;;  %3961 = vmatprep.subr.bf16.mxu0 %v5088_v15 }
 0x61c   :  { %3899 = vmatpush1.bf16.msra.mxu1 %v5094_v31  ;;  %3963 = vmatpush1.bf16.msra.mxu0 %v5096_v32 }
 0x61d   :  { %3901 = vmatprep.subr.bf16.mxu1 %v5961_v58  ;;  %3965 = vmatprep.subr.bf16.mxu0 %v5962_v42 }
 0x620   :  { %3903 = vmatpush1.bf16.msra.mxu1 %v5963_v39  ;;  %3967 = vmatpush1.bf16.msra.mxu0 %v5964_v22 }
 0x621   :  { %3905 = vmatprep.subr.bf16.mxu1 %v5965_v1  ;;  %3969 = vmatprep.subr.bf16.mxu0 %v5966_v57  ;;  %v5987_v57 = vld [vmem:[#allocation55_spill] sm:$0xff] }
 0x624   :  { %3907 = vmatpush1.bf16.msra.mxu1 %v5967_v50  ;;  %3971 = vmatpush1.bf16.msra.mxu0 %v5968_v46  ;;  %v5979_v46 = vld [vmem:[#allocation47_spill] sm:$0xff] }
 0x625   :  { %3909 = vmatprep.subr.bf16.mxu1 %v5969_v37  ;;  %3973 = vmatprep.subr.bf16.mxu0 %v5970_v56  ;;  %v5980_v37 = vld [vmem:[#allocation48_spill] sm:$0xff]  ;;  %v5981_v56 = vld [vmem:[#allocation49_spill] sm:$0xff] }
 0x628   :  { %3911 = vmatpush1.bf16.msra.mxu1 %v5971_v61  ;;  %3975 = vmatpush1.bf16.msra.mxu0 %v5972_v10  ;;  %v5982_v61 = vld [vmem:[#allocation50_spill] sm:$0xff]  ;;  %v5983_v10 = vld [vmem:[#allocation51_spill] sm:$0xff] }
 0x629   :  { %3913 = vmatprep.subr.bf16.mxu1 %v5973_v16  ;;  %3977 = vmatprep.subr.bf16.mxu0 %v5974_v49  ;;  %v5984_v16 = vld [vmem:[#allocation52_spill] sm:$0xff]  ;;  %v5985_v49 = vld [vmem:[#allocation27_spill] sm:$0xff] }
 0x62c   :  { %3915 = vmatpush1.bf16.msra.mxu1 %v5975_v18  ;;  %3979 = vmatpush1.bf16.msra.mxu0 %v5976_v48  ;;  %v5986_v18 = vld [vmem:[#allocation28_spill] sm:$0xff] }
 0x62d   :  { %3917 = vmatprep.subr.bf16.mxu1 %v5977_v21  ;;  %3981 = vmatprep.subr.bf16.mxu0 %v5978_v55 }
 0x630   :  { %3919 = vmatpush1.bf16.msra.mxu1 %v5979_v46  ;;  %3983 = vmatpush1.bf16.msra.mxu0 %v5980_v37 }
 0x631   :  { %3921 = vmatprep.subr.bf16.mxu1 %v5981_v56  ;;  %3985 = vmatprep.subr.bf16.mxu0 %v5982_v61 }
 0x634   :  { %3923 = vmatpush1.bf16.msra.mxu1 %v5983_v10  ;;  %3987 = vmatpush1.bf16.msra.mxu0 %v5984_v16  ;;  %v5988_v10 = vld [vmem:[#allocation56_spill] sm:$0xff] }
 0x635   :  { %3989 = vmatprep.subr.bf16.mxu1 %v5985_v49  ;;  %4053 = vmatprep.subr.bf16.mxu0 %v5986_v18 }
 0x6c9   :  { %v2076_v48 = vpop.f32.mrb[8].mxu1  ;;  %v2153_v21 = vpop.f32.mrb[24].mxu0 }
 0x6ca   :  { %v4124_v55 = vadd.f32 %v2076_v48, %v5902_v43  ;;  %v2078_v50 = vpop.f32.mrb[9].mxu1  ;;  %v2155_v46 = vpop.f32.mrb[25].mxu0  ;;  %v4138_v48 = vadd.f32 %v2153_v21, %v5265_v60 }
 0x6cb   :  { %v4125_v37 = vadd.f32 %v2078_v50, %v5987_v57  ;;  %v4139_v50 = vadd.f32 %v2155_v46, %v5271_v30 }
 0x6cc   :  { %v2971_v1 = vmul.f32 -1.442695, %v4124_v55  ;;  %v2973_v55 = vmul.f32 -1.442695, %v4138_v48 }
 0x6cd   :  { %v2972_v56 = vmul.f32 -1.442695, %v4125_v37  ;;  %v2082_v22 = vpop.f32.mrb[22].mxu1  ;;  %v2159_v61 = vpop.f32.mrb[38].mxu0 }
 0x6ce   :  { %4378 = vpow2.f32 %v2971_v1  ;;  %v4148_v39 = vadd.f32 %v2082_v22, %v5988_v10  ;;  %v2084_v16 = vpop.f32.mrb[23].mxu1  ;;  %v2161_v42 = vpop.f32.mrb[39].mxu0  ;;  %v4162_v37 = vadd.f32 %v2159_v61, %v5274_v12 }
 0x6cf   :  { %v4149_v49 = vadd.f32 %v2084_v16, %v5262_v29  ;;  %4380 = vpow2.f32 %v2972_v56  ;;  %v4163_v1 = vadd.f32 %v2161_v42, %v5276_v23 }
 0x6d0   :  { %v2974_v18 = vmul.f32 -1.442695, %v4148_v39  ;;  %v2976_v16 = vmul.f32 -1.442695, %v4162_v37 }
 0x6d1   :  { %v2975_v58 = vmul.f32 -1.442695, %v4149_v49 }
 0x6d2   :  { %4382 = vpow2.f32 %v2974_v18 }
 0x6d3   :  { %4384 = vpow2.f32 %v2975_v58 }
 0x6d4   :  { %4386 = vtanh.f32 %v4139_v50 }
 0x6d5   :  { %4388 = vpow2.f32 %v2973_v55 }
 0x6d8   :  { %v4379_v57 = vpop.eup %4378 }
 0x6d9   :  { %v2190_v22 = vadd.f32 1.0, %v4379_v57  ;;  %v4381_v10 = vpop.eup %4380 }
 0x6da   :  { %v2191_v39 = vadd.f32 1.0, %v4381_v10 }
 0x6db   :  { %4390 = vrcp.f32 %v2190_v22 }
 0x6dc   :  { %v4383_v56 = vpop.eup %4382  ;;  %4392 = vtanh.f32 %v4163_v1 }
 0x6dd   :  { %4394 = vrcp.f32 %v2191_v39  ;;  %v2193_v21 = vadd.f32 1.0, %v4383_v56  ;;  %v4385_v58 = vpop.eup %4384 }
 0x6de   :  { %4396 = vpow2.f32 %v2976_v16  ;;  %v2194_v46 = vadd.f32 1.0, %v4385_v58  ;;  %v4387_v61 = vpop.eup %4386 }
 0x6df   :  { %4398 = vrcp.f32 %v2193_v21  ;;  %v4389_v49 = vpop.eup %4388 }
 0x6e0   :  { %4400 = vrcp.f32 %v2194_v46  ;;  %v2192_v50 = vadd.f32 1.0, %v4389_v49 }
 0x6e2   :  { %4402 = vrcp.f32 %v2192_v50 }
 0x6e5   :  { %v4391_v18 = vpop.eup %4390 }
 0x6e6   :  { %v4393_v42 = vpop.eup %4392  ;;  %v2212_v57 = vmul.f32 %v4391_v18, %v4387_v61 }
 0x6e7   :  { %v4395_v48 = vpop.eup %4394 }
 0x6e8   :  { %v4397_v55 = vpop.eup %4396  ;;  %v2210_v37 = vmul.f32 %v4395_v48, %v5520_v4 }
 0x6e9   :  { %v4399_v10 = vpop.eup %4398  ;;  %v2195_v16 = vadd.f32 1.0, %v4397_v55 }
 0x6ea   :  { %v5600_v22 = vadd.f32 %v2212_v57, %v2210_v37  ;;  %v2213_v1 = vmul.f32 %v4399_v10, %v4393_v42  ;;  %v4401_v39 = vpop.eup %4400 }
 0x6eb   :  { %v2211_v56 = vmul.f32 %v4401_v39, %v5524_v34 }
 0x6ec   :  { %4404 = vtanh.f32 %v5600_v22  ;;  %v4403_v58 = vpop.eup %4402 }
 0x6ed   :  { %v5604_v21 = vadd.f32 %v2213_v1, %v2211_v56  ;;  %4406 = vrcp.f32 %v2195_v16 }
 0x6ef   :  { %4408 = vtanh.f32 %v5604_v21 }
 0x6f6   :  { %v4405_v46 = vpop.eup %4404 }
 0x6f7   :  { %v2218_v61 = vmul.f32 %v4405_v46, %v4403_v58  ;;  %v4407_v4 = vpop.eup %4406 }
 0x6f9   :  { %v2229_v49 = vmul.f32 0.0, %v2218_v61  ;;  %v4409_v18 = vpop.eup %4408 }
 0x6fa   :  { %v2219_v42 = vmul.f32 %v4409_v18, %v4407_v4 }
 0x6fb   :  { %2296 = vmatprep.mubr.f32.mxu1 %v2229_v49  ;;  %2373 = vmatprep.mubr.f32.mxu0 %v2229_v49 }
 0x6fc   :  { %2297 = vmatmul.mubr.f32.vlgmr.msra.gmra.mrb[10].mxu1 %v2218_v61  ;;  %2374 = vmatmul.mubr.f32.vlgmr.msra.gmra.mrb[26].mxu0 %v2218_v61  ;;  %v2230_v57 = vmul.f32 0.0, %v2219_v42 }
 0x6fd   :  { %2302 = vmatprep.mubr.f32.mxu1 %v2219_v42  ;;  %2379 = vmatprep.mubr.f32.mxu0 %v2219_v42 }
 0x6fe   :  { %3991 = vmatpush1.bf16.msra.mxu1 %v4953_v63  ;;  %4055 = vmatpush1.bf16.msra.mxu0 %v4955_v0  ;;  %v5989_v63 = vld [vmem:[#allocation29_spill] sm:$0xff]  ;;  %v5990_v0 = vld [vmem:[#allocation30_spill] sm:$0xff] }
 0x6ff   :  { %3993 = vmatprep.subr.bf16.mxu1 %v4960_v5  ;;  %4057 = vmatprep.subr.bf16.mxu0 %v4962_v6  ;;  %v5991_v5 = vld [vmem:[#allocation31_spill] sm:$0xff]  ;;  %v5992_v6 = vld [vmem:[#allocation32_spill] sm:$0xff] }
 0x700   :  { %2303 = vmatmul.mubr.f32.gmra.mrb[20].mxu1 %v2230_v57  ;;  %2380 = vmatmul.mubr.f32.gmra.mrb[36].mxu0 %v2230_v57 }
 0x702   :  { %3995 = vmatpush1.bf16.msra.mxu1 %v4968_v13  ;;  %4059 = vmatpush1.bf16.msra.mxu0 %v4970_v14  ;;  %v5993_v13 = vld [vmem:[#allocation33_spill] sm:$0xff]  ;;  %v5994_v14 = vld [vmem:[#allocation34_spill] sm:$0xff] }
 0x703   :  { %3997 = vmatprep.subr.bf16.mxu1 %v4976_v19  ;;  %4061 = vmatprep.subr.bf16.mxu0 %v4978_v20  ;;  %v5995_v19 = vld [vmem:[#allocation35_spill] sm:$0xff]  ;;  %v5996_v20 = vld [vmem:[#allocation36_spill] sm:$0xff] }
 0x706   :  { %3999 = vmatpush1.bf16.msra.mxu1 %v4984_v26  ;;  %4063 = vmatpush1.bf16.msra.mxu0 %v4986_v27  ;;  %v5997_v26 = vld [vmem:[#allocation37_spill] sm:$0xff]  ;;  %v5998_v27 = vld [vmem:[#allocation38_spill] sm:$0xff] }
 0x707   :  { %4001 = vmatprep.subr.bf16.mxu1 %v4992_v7  ;;  %4065 = vmatprep.subr.bf16.mxu0 %v4994_v33  ;;  %v5999_v7 = vld [vmem:[#allocation39_spill] sm:$0xff]  ;;  %v6000_v33 = vld [vmem:[#allocation40_spill] sm:$0xff] }
 0x70a   :  { %4003 = vmatpush1.bf16.msra.mxu1 %v5000_v38  ;;  %4067 = vmatpush1.bf16.msra.mxu0 %v5002_v40  ;;  %v6001_v38 = vld [vmem:[#allocation41_spill] sm:$0xff]  ;;  %v6002_v40 = vld [vmem:[#allocation42_spill] sm:$0xff] }
 0x70b   :  { %4005 = vmatprep.subr.bf16.mxu1 %v5008_v24  ;;  %4069 = vmatprep.subr.bf16.mxu0 %v5010_v47  ;;  %v6003_v24 = vld [vmem:[#allocation43_spill] sm:$0xff]  ;;  %v6004_v47 = vld [vmem:[#allocation44_spill] sm:$0xff] }
 0x70e   :  { %4007 = vmatpush1.bf16.msra.mxu1 %v5016_v53  ;;  %4071 = vmatpush1.bf16.msra.mxu0 %v5018_v54  ;;  %v6005_v53 = vld [vmem:[#allocation45_spill] sm:$0xff]  ;;  %v6006_v54 = vld [vmem:[#allocation46_spill] sm:$0xff] }
 0x70f   :  { %4009 = vmatprep.subr.bf16.mxu1 %v5024_v41  ;;  %4073 = vmatprep.subr.bf16.mxu0 %v5026_v62  ;;  %v6007_v41 = vld [vmem:[#allocation47_spill] sm:$0xff]  ;;  %v6008_v62 = vld [vmem:[#allocation48_spill] sm:$0xff] }
 0x712   :  { %4011 = vmatpush1.bf16.msra.mxu1 %v5032_v8  ;;  %4075 = vmatpush1.bf16.msra.mxu0 %v5034_v9  ;;  %v6009_v8 = vld [vmem:[#allocation49_spill] sm:$0xff]  ;;  %v6010_v9 = vld [vmem:[#allocation50_spill] sm:$0xff] }
 0x713   :  { %4013 = vmatprep.subr.bf16.mxu1 %v5040_v59  ;;  %4077 = vmatprep.subr.bf16.mxu0 %v5042_v17  ;;  %v6011_v59 = vld [vmem:[#allocation51_spill] sm:$0xff]  ;;  %v6012_v17 = vld [vmem:[#allocation52_spill] sm:$0xff] }
 0x716   :  { %4015 = vmatpush1.bf16.msra.mxu1 %v5048_v25  ;;  %4079 = vmatpush1.bf16.msra.mxu0 %v5050_v28  ;;  %v6013_v25 = vmov 0.0  }
 0x717   :  { %4017 = vmatprep.subr.bf16.mxu1 %v5056_v35  ;;  %4081 = vmatprep.subr.bf16.mxu0 %v5058_v36 }
 0x71a   :  { %4019 = vmatpush1.bf16.msra.mxu1 %v5064_v44  ;;  %4083 = vmatpush1.bf16.msra.mxu0 %v5066_v45 }
 0x71b   :  { %4021 = vmatprep.subr.bf16.mxu1 %v5070_v51  ;;  %4085 = vmatprep.subr.bf16.mxu0 %v5072_v52  ;;  %v6014_v51 = vld [vmem:[#allocation55_spill] sm:$0xff] }
 0x71e   :  { %4023 = vmatpush1.bf16.msra.mxu1 %v5080_v2  ;;  %4087 = vmatpush1.bf16.msra.mxu0 %v5082_v3 }
 0x71f   :  { %4025 = vmatprep.subr.bf16.mxu1 %v5086_v11  ;;  %4089 = vmatprep.subr.bf16.mxu0 %v5088_v15 }
 0x722   :  { %4027 = vmatpush1.bf16.msra.mxu1 %v5094_v31  ;;  %4091 = vmatpush1.bf16.msra.mxu0 %v5096_v32  ;;  %v6015_v31 = vld [vmem:[#allocation56_spill] sm:$0xff] }
 0x723   :  { %4029 = vmatprep.subr.bf16.mxu1 %v5989_v63  ;;  %4093 = vmatprep.subr.bf16.mxu0 %v5990_v0  ;;  %v5678_v0 = vpop.permute.xlu0 %2667 }
 0x726   :  { %4031 = vmatpush1.bf16.msra.mxu1 %v5991_v5  ;;  %4095 = vmatpush1.bf16.msra.mxu0 %v5992_v6 }
 0x727   :  { %4033 = vmatprep.subr.bf16.mxu1 %v5993_v13  ;;  %4097 = vmatprep.subr.bf16.mxu0 %v5994_v14 }
 0x72a   :  { %4035 = vmatpush1.bf16.msra.mxu1 %v5995_v19  ;;  %4099 = vmatpush1.bf16.msra.mxu0 %v5996_v20 }
 0x72b   :  { %4037 = vmatprep.subr.bf16.mxu1 %v5997_v26  ;;  %4101 = vmatprep.subr.bf16.mxu0 %v5998_v27  ;;  %v2685_v26 = vpop.xlane.xlu0 %2684 }
 0x72e   :  { %4039 = vmatpush1.bf16.msra.mxu1 %v5999_v7  ;;  %4103 = vmatpush1.bf16.msra.mxu0 %v6000_v33 }
 0x72f   :  { %4041 = vmatprep.subr.bf16.mxu1 %v6001_v38  ;;  %4105 = vmatprep.subr.bf16.mxu0 %v6002_v40  ;;  %v2686_v40 = vmax.f32 %v2685_v26, 1e-24 }
 0x732   :  { %4043 = vmatpush1.bf16.msra.mxu1 %v6003_v24  ;;  %4107 = vmatpush1.bf16.msra.mxu0 %v6004_v47 }
 0x733   :  { %4045 = vmatprep.subr.bf16.mxu1 %v6005_v53  ;;  %4109 = vmatprep.subr.bf16.mxu0 %v6006_v54 }
 0x736   :  { %4047 = vmatpush1.bf16.msra.mxu1 %v6007_v41  ;;  %4111 = vmatpush1.bf16.msra.mxu0 %v6008_v62 }
 0x737   :  { %4049 = vmatprep.subr.bf16.mxu1 %v6009_v8  ;;  %4113 = vmatprep.subr.bf16.mxu0 %v6010_v9 }
 0x73a   :  { %4051 = vmatpush1.bf16.msra.mxu1 %v6011_v59  ;;  %4115 = vmatpush1.bf16.msra.mxu0 %v6012_v17 }
 0x73b   :  { %3050 = vmatprep.subr.mxu1 %v6013_v25 }
 0x7cf   :  { %v2298_v28 = vpop.f32.mrb[10].mxu1  ;;  %v2375_v35 = vpop.f32.mrb[26].mxu0 }
 0x7d0   :  { %v4126_v36 = vadd.f32 %v2298_v28, %v5902_v43  ;;  %v2300_v44 = vpop.f32.mrb[11].mxu1  ;;  %v2377_v45 = vpop.f32.mrb[27].mxu0  ;;  %v4140_v10 = vadd.f32 %v2375_v35, %v5265_v60 }
 0x7d1   :  { %v4127_v52 = vadd.f32 %v2300_v44, %v6014_v51  ;;  %v4141_v1 = vadd.f32 %v2377_v45, %v5271_v30 }
 0x7d2   :  { %v2977_v2 = vmul.f32 -1.442695, %v4126_v36  ;;  %v2979_v39 = vmul.f32 -1.442695, %v4140_v10  ;;  %v6016_v36 = vld [vmem:[#allocation26_spill] sm:$0xff] }
 0x7d3   :  { %v2978_v3 = vmul.f32 -1.442695, %v4127_v52  ;;  %v2304_v11 = vpop.f32.mrb[20].mxu1  ;;  %v2381_v15 = vpop.f32.mrb[36].mxu0 }
 0x7d4   :  { %4410 = vpow2.f32 %v2977_v2  ;;  %v4146_v32 = vadd.f32 %v2304_v11, %v6015_v31  ;;  %v2306_v34 = vpop.f32.mrb[21].mxu1  ;;  %v2383_v48 = vpop.f32.mrb[37].mxu0  ;;  %v4160_v16 = vadd.f32 %v2381_v15, %v5274_v12 }
 0x7d5   :  { %v4147_v50 = vadd.f32 %v2306_v34, %v5262_v29  ;;  %4412 = vpow2.f32 %v2978_v3  ;;  %v4161_v58 = vadd.f32 %v2383_v48, %v5276_v23 }
 0x7d6   :  { %v2980_v55 = vmul.f32 -1.442695, %v4146_v32  ;;  %v2982_v4 = vmul.f32 -1.442695, %v4160_v16 }
 0x7d7   :  { %v2981_v37 = vmul.f32 -1.442695, %v4147_v50 }
 0x7d8   :  { %4414 = vpow2.f32 %v2980_v55 }
 0x7d9   :  { %4416 = vpow2.f32 %v2981_v37 }
 0x7da   :  { %4418 = vtanh.f32 %v4141_v1 }
 0x7db   :  { %4420 = vpow2.f32 %v2979_v39 }
 0x7de   :  { %v4411_v56 = vpop.eup %4410 }
 0x7df   :  { %v2412_v46 = vadd.f32 1.0, %v4411_v56  ;;  %v4413_v61 = vpop.eup %4412 }
 0x7e0   :  { %v2413_v49 = vadd.f32 1.0, %v4413_v61 }
 0x7e1   :  { %4422 = vrcp.f32 %v2412_v46 }
 0x7e2   :  { %v4415_v18 = vpop.eup %4414  ;;  %4424 = vtanh.f32 %v4161_v58 }
 0x7e3   :  { %4426 = vrcp.f32 %v2413_v49  ;;  %v2415_v42 = vadd.f32 1.0, %v4415_v18  ;;  %v4417_v57 = vpop.eup %4416 }
 0x7e4   :  { %4428 = vpow2.f32 %v2982_v4  ;;  %v2416_v63 = vadd.f32 1.0, %v4417_v57  ;;  %v4419_v5 = vpop.eup %4418 }
 0x7e5   :  { %4430 = vrcp.f32 %v2415_v42  ;;  %v4421_v6 = vpop.eup %4420 }
 0x7e6   :  { %4432 = vrcp.f32 %v2416_v63  ;;  %v2414_v27 = vadd.f32 1.0, %v4421_v6 }
 0x7e8   :  { %4434 = vrcp.f32 %v2414_v27 }
 0x7eb   :  { %v4423_v13 = vpop.eup %4422 }
 0x7ec   :  { %v4425_v14 = vpop.eup %4424  ;;  %v2434_v19 = vmul.f32 %v4423_v13, %v4419_v5 }
 0x7ed   :  { %v4427_v20 = vpop.eup %4426 }
 0x7ee   :  { %v4429_v7 = vpop.eup %4428  ;;  %v2432_v33 = vmul.f32 %v4427_v20, %v5600_v22 }
 0x7ef   :  { %v4431_v38 = vpop.eup %4430  ;;  %v2417_v54 = vadd.f32 1.0, %v4429_v7 }
 0x7f0   :  { %v5681_v24 = vadd.f32 %v2434_v19, %v2432_v33  ;;  %v2435_v47 = vmul.f32 %v4431_v38, %v4425_v14  ;;  %v4433_v53 = vpop.eup %4432 }
 0x7f1   :  { %v2433_v41 = vmul.f32 %v4433_v53, %v5604_v21 }
 0x7f2   :  { %4436 = vtanh.f32 %v5681_v24  ;;  %v4435_v8 = vpop.eup %4434 }
 0x7f3   :  { %4438 = vrsqrt.f32 %v2686_v40  ;;  %v5685_v62 = vadd.f32 %v2435_v47, %v2433_v41 }
 0x7f4   :  { %4440 = vrcp.f32 %v2417_v54 }
 0x7f5   :  { %4442 = vtanh.f32 %v5685_v62 }
 0x7fc   :  { %v4437_v22 = vpop.eup %4436 }
 0x7fd   :  { %v2440_v9 = vmul.f32 %v4437_v22, %v4435_v8  ;;  %v4439_v59 = vpop.eup %4438 }
 0x7fe   :  { %v4441_v17 = vpop.eup %4440  ;;  %v2688_v44 = vmul.f32 %v4439_v59, %v6016_v36  ;;  %v2799_v36 = vpop.xlane.xlu1 %2798 }
 0x7ff   :  { %v2451_v28 = vmul.f32 0.0, %v2440_v9  ;;  %v4443_v35 = vpop.eup %4442 }
 0x800   :  { %v2441_v45 = vmul.f32 %v4443_v35, %v4441_v17 }
 0x801   :  { %2518 = vmatprep.mubr.f32.mxu1 %v2451_v28  ;;  %2595 = vmatprep.mubr.f32.mxu0 %v2451_v28 }
 0x802   :  { %2519 = vmatmul.mubr.f32.vlgmr.msra.gmra.mrb[12].mxu1 %v2440_v9  ;;  %2596 = vmatmul.mubr.f32.vlgmr.msra.gmra.mrb[28].mxu0 %v2440_v9  ;;  %v2452_v21 = vmul.f32 0.0, %v2441_v45 }
 0x803   :  { %3051 = vmatpush3.xpose.msra.mxu1 %v2688_v44  ;;  %2524 = vmatprep.mubr.f32.mxu1 %v2441_v45  ;;  %v2800_v44 = vmax.f32 %v2799_v36, 1e-24 }
 0x804   :  { %2601 = vmatprep.mubr.f32.mxu0 %v2441_v45  ;;  %3055 = vmatprep.subr.mxu1 %v6013_v25 }
 0x806   :  { %2525 = vmatmul.mubr.f32.gmra.mrb[18].mxu1 %v2452_v21  ;;  %2602 = vmatmul.mubr.f32.gmra.mrb[34].mxu0 %v2452_v21 }
 0x807   :  { %3052 = vmatprep.mubr.msk.f32.mxu1 %vm4739_vm1, %v6013_v25 }
 0x8d5   :  { %v2520_v52 = vpop.f32.mrb[12].mxu1  ;;  %v2597_v2 = vpop.f32.mrb[28].mxu0 }
 0x8d6   :  { %v4128_v3 = vadd.f32 %v2520_v52, %v5902_v43  ;;  %v2522_v11 = vpop.f32.mrb[13].mxu1  ;;  %v2599_v15 = vpop.f32.mrb[29].mxu0  ;;  %v4142_v43 = vadd.f32 %v2597_v2, %v5265_v60 }
 0x8d7   :  { %v4129_v32 = vadd.f32 %v2522_v11, %v6014_v51  ;;  %v4143_v51 = vadd.f32 %v2599_v15, %v5271_v30  ;;  %v6017_v15 = vld [vmem:[#allocation25_spill] sm:$0xff] }
 0x8d8   :  { %v2983_v34 = vmul.f32 -1.442695, %v4128_v3  ;;  %v2985_v58 = vmul.f32 -1.442695, %v4142_v43 }
 0x8d9   :  { %v2984_v48 = vmul.f32 -1.442695, %v4129_v32  ;;  %v2526_v50 = vpop.f32.mrb[18].mxu1  ;;  %v2603_v55 = vpop.f32.mrb[34].mxu0 }
 0x8da   :  { %4444 = vpow2.f32 %v2983_v34  ;;  %v4144_v37 = vadd.f32 %v2526_v50, %v6015_v31  ;;  %v2528_v10 = vpop.f32.mrb[19].mxu1  ;;  %v2605_v1 = vpop.f32.mrb[35].mxu0  ;;  %v4158_v46 = vadd.f32 %v2603_v55, %v5274_v12 }
 0x8db   :  { %v4145_v39 = vadd.f32 %v2528_v10, %v5262_v29  ;;  %4446 = vpow2.f32 %v2984_v48  ;;  %v4159_v4 = vadd.f32 %v2605_v1, %v5276_v23 }
 0x8dc   :  { %v2986_v16 = vmul.f32 -1.442695, %v4144_v37  ;;  %v2988_v29 = vmul.f32 -1.442695, %v4158_v46 }
 0x8dd   :  { %v2987_v56 = vmul.f32 -1.442695, %v4145_v39 }
 0x8de   :  { %4448 = vpow2.f32 %v2986_v16 }
 0x8df   :  { %4450 = vpow2.f32 %v2987_v56 }
 0x8e0   :  { %4452 = vtanh.f32 %v4143_v51 }
 0x8e1   :  { %4454 = vpow2.f32 %v2985_v58 }
 0x8e4   :  { %v4445_v61 = vpop.eup %4444 }
 0x8e5   :  { %v2634_v31 = vadd.f32 1.0, %v4445_v61  ;;  %v4447_v49 = vpop.eup %4446  ;;  %v6018_v61 = vlaneseq }
 0x8e6   :  { %v2635_v18 = vadd.f32 1.0, %v4447_v49 }
 0x8e7   :  { %4456 = vrcp.f32 %v2634_v31  ;;  %v6019_v31 = vld [vmem:[#allocation53_spill] sm:$0xff] }
 0x8e8   :  { %v4449_v42 = vpop.eup %4448  ;;  %4458 = vtanh.f32 %v4159_v4  ;;  %v960_v4 = vand.u32 127, %v6018_v61 }
 0x8e9   :  { %4460 = vrcp.f32 %v2635_v18  ;;  %v2637_v60 = vadd.f32 1.0, %v4449_v42  ;;  %v4451_v57 = vpop.eup %4450 }
 0x8ea   :  { %4462 = vpow2.f32 %v2988_v29  ;;  %v2638_v30 = vadd.f32 1.0, %v4451_v57  ;;  %v4453_v12 = vpop.eup %4452  ;;  %vm2772_vm3 = vcmp.eq.s32.totalorder %v6019_v31, %v960_v4 }
 0x8eb   :  { %4464 = vrcp.f32 %v2637_v60  ;;  %v4455_v63 = vpop.eup %4454  ;;  %v2989_v18 = vsel %vm2772_vm3, 1.0, %v6013_v25 }
 0x8ec   :  { %4466 = vrcp.f32 %v2638_v30  ;;  %v2636_v14 = vadd.f32 1.0, %v4455_v63 }
 0x8ee   :  { %4468 = vrcp.f32 %v2636_v14 }
 0x8f1   :  { %v4457_v5 = vpop.eup %4456 }
 0x8f2   :  { %v4459_v23 = vpop.eup %4458  ;;  %v2656_v6 = vmul.f32 %v4457_v5, %v4453_v12 }
 0x8f3   :  { %v4461_v13 = vpop.eup %4460 }
 0x8f4   :  { %v4463_v19 = vpop.eup %4462  ;;  %v2654_v20 = vmul.f32 %v4461_v13, %v5681_v24 }
 0x8f5   :  { %v4465_v26 = vpop.eup %4464  ;;  %v2639_v38 = vadd.f32 1.0, %v4463_v19 }
 0x8f6   :  { %v2658_v27 = vadd.f32 %v2656_v6, %v2654_v20  ;;  %v2657_v7 = vmul.f32 %v4465_v26, %v4459_v23  ;;  %v4467_v33 = vpop.eup %4466 }
 0x8f7   :  { %v2655_v40 = vmul.f32 %v4467_v33, %v5685_v62 }
 0x8f8   :  { %4470 = vtanh.f32 %v2658_v27  ;;  %v4469_v53 = vpop.eup %4468 }
 0x8f9   :  { %v2659_v47 = vadd.f32 %v2657_v7, %v2655_v40  ;;  %4472 = vrcp.f32 %v2639_v38 }
 0x8fb   :  { %4474 = vtanh.f32 %v2659_v47 }
 0x8fc   :  { %4476 = vrsqrt.f32 %v2800_v44 }
 0x902   :  { %v4471_v54 = vpop.eup %4470 }
 0x903   :  { %v2662_v41 = vmul.f32 %v4471_v54, %v4469_v53  ;;  %v4473_v8 = vpop.eup %4472 }
 0x905   :  { %v2670_v22 = vmul.f32 %v5678_v0, %v2662_v41  ;;  %v4475_v9 = vpop.eup %4474 }
 0x906   :  { %v2663_v59 = vmul.f32 %v4475_v9, %v4473_v8 }
 0x907   :  { %v2674_v24 = vmul.f32 %v2670_v22, %v2670_v22  ;;  %2672 = vst [vmem:[#allocation15] sm:$0xff] %v2670_v22 }
 0x908   :  { %v2671_v28 = vmul.f32 %v5678_v0, %v2663_v59  ;;  %v4477_v0 = vpop.eup %4476 }
 0x909   :  { %v2676_v17 = vsel %vm2675_vm0, %v2674_v24, 0.0  ;;  %v2802_v32 = vmul.f32 %v4477_v0, %v6017_v15 }
 0x90a   :  { %2677 = vadd.xlane.f32.xlu1 %v2676_v17  ;;  %v2789_v35 = vmul.f32 %v2671_v28, %v2671_v28  ;;  %2673 = vst [vmem:[#allocation16] sm:$0xff] %v2671_v28 }
 0x90c   :  { %v2790_v62 = vsel %vm2675_vm0, %v2789_v35, 0.0 }
 0x90e   :  { %2791 = vadd.xlane.f32.xlu1 %v2790_v62 }
 0x997   :  { %v2678_v45 = vpop.xlane.xlu1 %2677 }
 0x998   :  { %v2679_v21 = vmax.f32 %v2678_v45, 1e-24 }
 0x99a   :  { %4478 = vrsqrt.f32 %v2679_v21 }
 0x99b   :  { %v2792_v52 = vpop.xlane.xlu1 %2791 }
 0x99c   :  { %v2793_v2 = vmax.f32 %v2792_v52, 1e-24 }
 0x99e   :  { %4480 = vrsqrt.f32 %v2793_v2 }
 0x9a4   :  { %v4479_v3 = vpop.eup %4478 }
 0x9a5   :  { %v2681_v11 = vmul.f32 %v4479_v3, %v2670_v22 }
 0x9a7   :  { %3053 = vmatmul.mubr.f32.vlgmr.msra.gmra.mrb[32].mxu1 %v2681_v11 }
 0x9a8   :  { %v4481_v34 = vpop.eup %4480  ;;  %3056 = vmatpush3.xpose.msra.mxu1 %v2802_v32  ;;  %3057 = vmatprep.mubr.msk.f32.mxu1 %vm4739_vm1, %v6013_v25 }
 0x9a9   :  { %v2795_v48 = vmul.f32 %v4481_v34, %v2671_v28 }
 0x9ab   :  { %3058 = vmatmul.mubr.f32.vlgmr.msra.gmra.mrb[34].mxu1 %v2795_v48 }
 0xa7a   :  { %v2755_v50 = vpop.f32.mrb[32].mxu1 }
 0xa7b   :  { %v3054_v55 = vpop.f32.mrb[33].mxu1  ;;  %v2760_v37 = vsel %vm2759_vm2, %v2755_v50, -inf  ;;  %v2775_v57 = vmul.f32 %v2989_v18, %v2755_v50 }
 0xa7c   :  { %2761 = vmax.xlane.f32.xlu1 %v2760_v37 }
 0xa7d   :  { %v2776_v30 = vsel %vm2759_vm2, %v2775_v57, 0.0 }
 0xa7e   :  { %v2869_v10 = vpop.f32.mrb[34].mxu1 }
 0xa7f   :  { %v3059_v1 = vpop.f32.mrb[35].mxu1  ;;  %v2873_v39 = vsel %vm2759_vm2, %v2869_v10, -inf  ;;  %v2885_v12 = vmul.f32 %v2989_v18, %v2869_v10 }
 0xa80   :  { %2874 = vmax.xlane.f32.xlu1 %v2873_v39 }
 0xa81   :  { %v2886_v63 = vsel %vm2759_vm2, %v2885_v12, 0.0 }
 0xb09   :  { %v2762_v16 = vpop.xlane.xlu1 %2761 }
 0xb0a   :  { %v2763_v56 = vsub.f32 %v2755_v50, %v2762_v16 }
 0xb0c   :  { %v2764_v43 = vmul.f32 1.442695, %v2763_v56 }
 0xb0d   :  { %v5711_v51 = vpop.xlane.xlu1 %2874 }
 0xb0e   :  { %4482 = vpow2.f32 %v2764_v43  ;;  %v2876_v58 = vsub.f32 %v2869_v10, %v5711_v51 }
 0xb10   :  { %v2877_v46 = vmul.f32 1.442695, %v2876_v58 }
 0xb12   :  { %4484 = vpow2.f32 %v2877_v46 }
 0xb18   :  { %v4483_v49 = vpop.eup %4482 }
 0xb19   :  { %v2766_v29 = vsel %vm2759_vm2, %v4483_v49, 0.0 }
 0xb1a   :  { %2767 = vadd.xlane.f32.xlu1 %v2766_v29 }
 0xb1c   :  { %v4485_v42 = vpop.eup %4484 }
 0xb1d   :  { %v2879_v60 = vsel %vm2759_vm2, %v4485_v42, 0.0 }
 0xb1e   :  { %2880 = vadd.xlane.f32.xlu1 %v2879_v60 }
 0xb22   :  { %2777 = vadd.xlane.f32.xlu1 %v2776_v30 }
 0xb26   :  { %2887 = vadd.xlane.f32.xlu1 %v2886_v63 }
 0xb27   :  { %4655 = shalt.err (!%p4652_p4)
}
 0xb28   :  { %s4656_s5 = scalar_lea.hbm %s5768_s8, 128 }
 0xb29   :  { %p4657_p5 = scmp.ne.s32.totalorder %s5768_s8, %s4656_s5  ;;  %p4660_p6 = scmp.lt.u32.totalorder %s4656_s5, %s5768_s8 }
 0xb2b   :  { %p4662_p7 = pnand %p4660_p6, %p4657_p5 }
 0xb2d   :  { %4665 = shalt.err (!%p4662_p7)
}
 0xb2e   :  { %2920 = dma.vmem_to_hbm [thread:$0]  %s2918_s27, 128, %s5768_s8, [#allocation17]  }
 0xb2f   :  { %s4666_s18 = scalar_lea.vmem %s2908_s29, 128  ;;  %p4671_p9 = scmp.lt.s32.totalorder %s2908_s29, %s2908_s29 }
 0xb30   :  { %p4667_p8 = scmp.ne.s32.totalorder %s2908_s29, %s4666_s18  ;;  %p4672_p10 = scmp.lt.s32.totalorder %s4666_s18, %s4666_s18 }
 0xb32   :  { %p4673_p11 = por %p4672_p10, %p4671_p9 }
 0xb34   :  { %p4674_p12 = pnand %p4673_p11, %p4667_p8 }
 0xb36   :  { %4677 = shalt.err (!%p4674_p12)
}
 0xb37   :  { %s4678_s21 = scalar_lea.hbm %s5767_s7, 128 }
 0xb38   :  { %p4679_p13 = scmp.ne.s32.totalorder %s5767_s7, %s4678_s21  ;;  %p4682_p0 = scmp.lt.u32.totalorder %s4678_s21, %s5767_s7 }
 0xb3a   :  { %p4684_p1 = pnand %p4682_p0, %p4679_p13 }
 0xb3c   :  { %4687 = shalt.err (!%p4684_p1)
}
 0xb3d   :  { %2910 = dma.vmem_to_hbm [thread:$0]  %s2908_s29, 128, %s5767_s7, [#allocation5]   ;;  %vm2899_vm4 = vcmask 0  }
 0xb3e   :  { %s4742_s7 = smov [#allocation18]  }
 0xb3f   :  { %s2927_s16 = sshll.u32 %s4742_s7, 4  ;;  %s2928_s16 = int_to_ptr.vmem [resolvable:$true] %s2927_s16 }
 0xb40   :  { %s4688_s4 = scalar_lea.vmem %s2928_s16, 16  ;;  %s4692_s24 = scalar_lea.vmem %s2928_s16, 32 }
 0xb41   :  { %p4689_p2 = scmp.ne.s32.totalorder %s2928_s16, %s4688_s4  ;;  %p4693_p3 = scmp.lt.s32.totalorder %s2928_s16, %s2928_s16 }
 0xb42   :  { %p4694_p4 = scmp.lt.s32.totalorder %s4692_s24, %s4688_s4 }
 0xb44   :  { %p4695_p5 = por %p4694_p4, %p4693_p3 }
 0xb46   :  { %p4696_p6 = pnand %p4695_p5, %p4689_p2 }
 0xba7   :  { %v2768_v25 = vpop.xlane.xlu1 %2767 }
 0xba8   :  { %4486 = vlog2.f32 %v2768_v25 }
 0xbab   :  { %v2881_v5 = vpop.xlane.xlu1 %2880 }
 0xbac   :  { %4488 = vlog2.f32 %v2881_v5 }
 0xbaf   :  { %v2778_v13 = vpop.xlane.xlu1 %2777 }
 0xbb2   :  { %v4487_v23 = vpop.eup %4486 }
 0xbb3   :  { %v2770_v6 = vmul.f32 0.6931472, %v4487_v23  ;;  %v2888_v38 = vpop.xlane.xlu1 %2887 }
 0xbb5   :  { %v2771_v14 = vadd.f32 %v2770_v6, %v2762_v16 }
 0xbb6   :  { %v4489_v19 = vpop.eup %4488 }
 0xbb7   :  { %v2883_v20 = vmul.f32 0.6931472, %v4489_v19  ;;  %v2779_v26 = vsub.f32 %v2771_v14, %v2778_v13 }
 0xbb9   :  { %v2780_v27 = vsel %vm2675_vm0, %v2779_v26, 0.0  ;;  %v2884_v7 = vadd.f32 %v2883_v20, %v5711_v51 }
 0xbba   :  { %v2781_v33 = vrot.slane %v2780_v27, 4 }
 0xbbb   :  { %v2889_v40 = vsub.f32 %v2884_v7, %v2888_v38 }
 0xbbc   :  { %v2782_v47 = vadd.f32 %v2781_v33, %v2780_v27 }
 0xbbd   :  { %v2890_v53 = vsel %vm2675_vm0, %v2889_v40, 0.0 }
 0xbbe   :  { %v2783_v54 = vrot.slane %v2782_v47, 2  ;;  %v2891_v41 = vrot.slane %v2890_v53, 4 }
 0xbc0   :  { %v2784_v8 = vadd.f32 %v2783_v54, %v2782_v47  ;;  %v2892_v22 = vadd.f32 %v2891_v41, %v2890_v53 }
 0xbc2   :  { %v2785_v9 = vrot.slane %v2784_v8, 1  ;;  %v2893_v24 = vrot.slane %v2892_v22, 2 }
 0xbc4   :  { %v2894_v59 = vadd.f32 %v2893_v24, %v2892_v22  ;;  %v2786_v17 = vadd.f32 %v2785_v9, %v2784_v8 }
 0xbc6   :  { %v2895_v28 = vrot.slane %v2894_v59, 1  ;;  %v2788_v62 = vmul.f32 0.5, %v2786_v17 }
 0xbc8   :  { %v2896_v35 = vadd.f32 %v2895_v28, %v2894_v59 }
 0xbca   :  { %v2897_v36 = vmul.f32 0.5, %v2896_v35 }
 0xbcc   :  { %v2898_v44 = vadd.f32 %v2897_v36, %v2788_v62 }
 0xbce   :  { %2900 = vst.msk [vmem:[#allocation18] sm:$0x1] %vm2899_vm4, %v2898_v44 }
 0xbcf   :  { %4699 = shalt.err (!%p4696_p6)
}
 0xbd0   :  { %s4700_s6 = scalar_lea.hbm %s5769_s9, 16 }
 0xbd1   :  { %p4701_p7 = scmp.ne.s32.totalorder %s5769_s9, %s4700_s6  ;;  %p4704_p8 = scmp.lt.u32.totalorder %s4700_s6, %s5769_s9 }
 0xbd3   :  { %p4706_p9 = pnand %p4704_p8, %p4701_p7 }
 0xbd5   :  { %4709 = shalt.err (!%p4706_p9)
}
 0xbd6   :  { %2930 = dma.vmem_to_hbm [thread:$0]  %s2928_s16, 16, %s5769_s9, [#allocation17]  }
 0xbd7   :  { %4718 = dma.done.wait [#allocation5], 128  }
 0xbd8   :  { %4719 = vsyncadd [#allocation5], 4294967168 }
 0xbd9   :  { %4720 = dma.done.wait [#allocation17], 144  }
 0xbda   :  { %4721 = vsyncadd [#allocation17], 4294967152 }
 0xbdb   :  { %2940 = vsyncpa [#allocation4], 1 }
 0xbdc   :  { %2941 = vsyncpa [#allocation7], 1 }
 0xbdd   :  { %2942 = vsyncpa [#allocation10], 1 }
 0xbde   :  { %2943 = vsyncpa [#allocation13], 1 }
 0xbdf   :  { %2944 = vsyncpa [#allocation5], 1 }
 0xbe0   :  { %2945 = vsyncpa [#allocation17], 1 }

</bundles_post_ra>
